<compile_context>
chip_gen: v5e
topology: v5e:2x2
jax: 0.10.0
libtpu: 0.0.40
codegen_flags: <defaults>
</compile_context>

<pallas_src>
import jax
import jax.numpy as jnp
from jax.experimental import pallas as pl
from jax.experimental.pallas import tpu as pltpu


# ------------------------------ fused kernel ------------------------------- #

def make_forward(input_size, conv_params, hidden_sizes, num_classes,
                 max_batch_tile=8):
    C0, H0, W0 = input_size
    # Static geometry per conv stage: (H, W, Cin, Cout, K, pad) at the conv input.
    conv_geom = []
    H, W, C = H0, W0, C0
    for (in_c, out_c, k) in conv_params:
        assert in_c == C, "conv_params channel chain mismatch"
        assert k % 2 == 1, "Conv2d_pad assumed 'same'-padded with odd kernel"
        assert H % 2 == 0 and W % 2 == 0, "MaxPool2d(2) needs even H, W"
        conv_geom.append((H, W, in_c, out_c, k, k // 2))
        H, W, C = H // 2, W // 2, out_c
    Hf, Wf, Cf = H, W, C
    d_flat = Hf * Wf * Cf
    n_conv = len(conv_params)
    n_fc = len(hidden_sizes) + 1
    p0 = conv_geom[0][5]

    def make_kernel(B):
        def kernel(*refs):
            # ---- unpack refs: inputs, output, scratch -------------------- #
            x_ref = refs[0]
            pos = 1
            conv_w = []
            for _ in range(n_conv):
                conv_w.append((refs[pos], refs[pos + 1])); pos += 2
            fc_w = []
            for _ in range(n_fc):
                fc_w.append((refs[pos], refs[pos + 1])); pos += 2
            out_ref = refs[pos]; pos += 1
            patch_refs = list(refs[pos:pos + n_conv]); pos += n_conv
            y_refs = list(refs[pos:pos + n_conv]); pos += n_conv
            act_refs = list(refs[pos:pos + (n_conv - 1)]); pos += n_conv - 1
            pool_ref = refs[pos]; pos += 1
            flat_ref = refs[pos]

            # First conv layer reads the pre-padded input block directly.
            xp = x_ref
            for l, (Hl, Wl, Ci, Co, K, _pad) in enumerate(conv_geom):
                patch_ref = patch_refs[l]
                y_ref = y_refs[l]
                wc_ref, bc_ref = conv_w[l]
                M = B * Hl * Wl
                Ho, Wo = Hl // 2, Wl // 2

                # im2col: all K*K taps folded into the contraction dimension.
                for kh in range(K):
                    for kw in range(K):
                        tap = xp[:, pl.ds(kh, Hl), pl.ds(kw, Wl), :]   # (B,Hl,Wl,Ci)
                        patch_ref[:, pl.ds((kh * K + kw) * Ci, Ci)] = (
                            tap.reshape(M, Ci))

                # One MXU matmul per conv layer (f32 operands / f32 accumulate).
                y_ref[...] = jnp.dot(patch_ref[...], wc_ref[...],
                                     preferred_element_type=jnp.float32) + bc_ref[...]

                # Fused MaxPool2d(2):
                #   (a) pool over W: max of even/odd rows (row index = b,h,w)
                yw = jnp.maximum(y_ref[pl.ds(0, M // 2, stride=2), :],
                                 y_ref[pl.ds(1, M // 2, stride=2), :])   # (B*Hl*Wo, Co)
                #   (b) pool over H: rows h=2ho / 2ho+1 are Wo apart; compare
                #       two contiguous row blocks (vectorized, no per-row loop).
                yw = yw.reshape(B * Ho, 2 * Wo, Co)
                pooled = jnp.maximum(yw[:, :Wo, :], yw[:, Wo:, :])       # (B*Ho, Wo, Co)

                if l + 1 < n_conv:
                    Hn, Wn, Cn, _, _, pn = conv_geom[l + 1]
                    nxt = act_refs[l]
                    Hp, Wp = Hn + 2 * pn, Wn + 2 * pn
                    # Zero only the halo; the interior is fully overwritten below.
                    zrow = jnp.zeros((B, pn, Wp, Cn), jnp.float32)
                    zcol = jnp.zeros((B, Hp, pn, Cn), jnp.float32)
                    nxt[:, pl.ds(0, pn), :, :] = zrow
                    nxt[:, pl.ds(pn + Hn, pn), :, :] = zrow
                    nxt[:, :, pl.ds(0, pn), :] = zcol
                    nxt[:, :, pl.ds(pn + Wn, pn), :] = zcol
                    # Single windowed store of the pooled activations.
                    nxt[:, pl.ds(pn, Hn), pl.ds(pn, Wn), :] = (
                        pooled.reshape(B, Hn, Wn, Cn))
                    xp = nxt
                else:
                    # Last conv stage: stash pooled result, then flatten in
                    # NHWC (h, w, c) order (FC1 columns are permuted to match).
                    pool_ref[...] = pooled.reshape(B, Hf, Wf, Cf)
                    for q in range(Hf * Wf):
                        ho, wo = q // Wf, q % Wf
                        flat_ref[:, pl.ds(q * Cf, Cf)] = pool_ref[:, ho, wo, :]

            # ---- classifier: Linear (+ReLU) stack fused with log_softmax -- #
            h = flat_ref[...]                                  # (B, d_flat) f32
            for i, (wf_ref, bf_ref) in enumerate(fc_w):
                h = jnp.dot(h, wf_ref[...],
                            preferred_element_type=jnp.float32) + bf_ref[...]
                if i < n_fc - 1:
                    h = jnp.maximum(h, 0.0)                    # ReLU
            m = jnp.max(h, axis=1, keepdims=True)
            s = h - m
            lse = jnp.log(jnp.sum(jnp.exp(s), axis=1, keepdims=True))
            out_ref[0] = s - lse                               # (B, num_classes)

        return kernel

    def forward(kparams, x_nchw):
        N = x_nchw.shape[0]
        # Batch tile: up to `max_batch_tile` elements per grid step, but keep
        # the grid length >= 2 so a v7x megacore can split it across both TCs.
        B = max(1, min(max_batch_tile, pl.cdiv(N, 2)))
        n_blk = pl.cdiv(N, B)
        N_pad = n_blk * B

        # NCHW -> NHWC, 'same' zero-pad for the first conv, and batch padding
        # to a multiple of B -- all fused into one cheap XLA prologue.
        x = jnp.transpose(x_nchw, (0, 2, 3, 1)).astype(jnp.float32)
        x = jnp.pad(x, ((0, N_pad - N), (p0, p0), (p0, p0), (0, 0)))

        inputs = [x]
        in_specs = [pl.BlockSpec((B, H0 + 2 * p0, W0 + 2 * p0, C0),
                                 lambda n: (n, 0, 0, 0))]
        full2 = lambda n: (0, 0)
        for wc, bc in kparams["conv"]:
            inputs += [wc, bc]
            in_specs += [pl.BlockSpec(wc.shape, full2), pl.BlockSpec(bc.shape, full2)]
        for wf, bf in kparams["fc"]:
            inputs += [wf, bf]
            in_specs += [pl.BlockSpec(wf.shape, full2), pl.BlockSpec(bf.shape, full2)]

        scratch = []
        for (Hl, Wl, Ci, Co, K, _p) in conv_geom:
            scratch.append(pltpu.VMEM((B * Hl * Wl, K * K * Ci), jnp.float32))  # im2col
        for (Hl, Wl, Ci, Co, K, _p) in conv_geom:
            scratch.append(pltpu.VMEM((B * Hl * Wl, Co), jnp.float32))          # conv out
        for (Hn, Wn, Cn, _, _, pn) in conv_geom[1:]:
            scratch.append(pltpu.VMEM((B, Hn + 2 * pn, Wn + 2 * pn, Cn),
                                      jnp.float32))                            # padded act
        scratch.append(pltpu.VMEM((B, Hf, Wf, Cf), jnp.float32))                # pooled
        scratch.append(pltpu.VMEM((B, d_flat), jnp.float32))                    # flatten

        # Total scratch is < 1 MiB even at B=8, so no vmem_limit override is
        # needed on any generation (v7x's 64 MiB included).
        out = pl.pallas_call(
            make_kernel(B),
            out_shape=jax.ShapeDtypeStruct((n_blk, B, num_classes), jnp.float32),
            grid=(n_blk,),
            in_specs=in_specs,
            out_specs=pl.BlockSpec((1, B, num_classes), lambda n: (n, 0, 0)),
            scratch_shapes=scratch,
            compiler_params=pltpu.CompilerParams(
                dimension_semantics=("parallel",)),
        )(*inputs)
        return out.reshape(N_pad, num_classes)[:N]

    return forward


# --------------------------- parameters (PyTorch layout) -------------------- #

def init_params(key, input_size, conv_params, hidden_sizes, num_classes):
    """Parameters in PyTorch layout: conv (Cout, Cin, K, K); fc (Dout, Din)."""
    c, h, w = input_size
    params = {"conv": [], "fc": []}
    out_c = c
    for (in_c, out_c, k) in conv_params:
        key, k_w, k_b = jax.random.split(key, 3)
        wt = 0.05 * jax.random.normal(k_w, (out_c, in_c, k, k), jnp.float32)
        bt = 0.05 * jax.random.normal(k_b, (out_c,), jnp.float32)
        params["conv"].append((wt, bt))
        h, w = h // 2, w // 2
    dims = [out_c * h * w] + list(hidden_sizes) + [num_classes]
    for i in range(len(dims) - 1):
        key, k_w, k_b = jax.random.split(key, 3)
        wt = 0.05 * jax.random.normal(k_w, (dims[i + 1], dims[i]), jnp.float32)
        bt = 0.05 * jax.random.normal(k_b, (dims[i + 1],), jnp.float32)
        params["fc"].append((wt, bt))
    return params


def prepare_params(params, input_size):
    """One-time re-layout for the fused kernel: conv weights folded to
    (K*K*Cin, Cout) f32 (rows ordered kh, kw, ci), fc weights transposed to
    (Din, Dout) f32 (FC1 columns permuted from NCHW- to NHWC-flatten order),
    biases (1, D) f32."""
    c, h, w = input_size
    kp = {"conv": [], "fc": []}
    for (wt, bt) in params["conv"]:
        co, ci, k, _ = wt.shape
        wf = jnp.transpose(wt, (2, 3, 1, 0)).reshape(k * k * ci, co)
        kp["conv"].append((wf.astype(jnp.float32),
                           bt.reshape(1, co).astype(jnp.float32)))
        h, w, c = h // 2, w // 2, co
    w1, b1 = params["fc"][0]
    d_out = w1.shape[0]
    w1r = (w1.reshape(d_out, c, h, w).transpose(0, 2, 3, 1)
             .reshape(d_out, h * w * c))
    kp["fc"].append((w1r.T.astype(jnp.float32),
                     b1.reshape(1, -1).astype(jnp.float32)))
    for (wt, bt) in params["fc"][1:]:
        kp["fc"].append((wt.T.astype(jnp.float32),
                         bt.reshape(1, -1).astype(jnp.float32)))
    return kp


# ------------------------------- reference ---------------------------------- #

def reference_forward(params, x_nchw):
    """Pure-XLA reference mirroring the PyTorch module."""
    x = x_nchw
    for wt, bt in params["conv"]:
        x = jax.lax.conv_general_dilated(
            x, wt, window_strides=(1, 1), padding="SAME",
            dimension_numbers=("NCHW", "OIHW", "NCHW"),
            precision=jax.lax.Precision.HIGHEST) + bt[None, :, None, None]
        n, c, h, w = x.shape
        x = x.reshape(n, c, h // 2, 2, w // 2, 2).max(axis=(3, 5))
    x = x.reshape(x.shape[0], -1)
    n_fc = len(params["fc"])
    for i, (wt, bt) in enumerate(params["fc"]):
        x = jnp.dot(x, wt.T, precision=jax.lax.Precision.HIGHEST) + bt
        if i < n_fc - 1:
            x = jnp.maximum(x, 0.0)
    return jax.nn.log_softmax(x, axis=1)


# ---------------------------------- main ------------------------------------ #

if __name__ == "__main__":
    input_size = (4, 16, 16)                  # (C, H, W)
    conv_params = [(4, 8, 3), (8, 16, 3)]     # (in_c, out_c, kernel)
    hidden_sizes = [32]
    num_classes = 10

    key = jax.random.PRNGKey(0)
    k_params, k_x = jax.random.split(key)
    torch_params = init_params(k_params, input_size, conv_params,
                               hidden_sizes, num_classes)
    kparams = prepare_params(torch_params, input_size)

    fwd = jax.jit(make_forward(input_size, conv_params, hidden_sizes,
                               num_classes))

    def check(batch, key):
        x = jax.random.normal(key, (batch,) + input_size, jnp.float32)  # NCHW
        out = jax.block_until_ready(fwd(kparams, x))
        assert out.shape == (batch, num_classes)
        assert bool(jnp.all(jnp.isfinite(out)))
        # log-probabilities must normalize (softmax done in f32 in-kernel)
        assert bool(jnp.allclose(jnp.sum(jnp.exp(out), axis=1), 1.0, atol=1e-3))
        # cross-check vs pure-XLA reference (f32 everywhere)
        ref = reference_forward(torch_params, x)
        assert bool(jnp.allclose(out, ref, atol=5e-2)), \
            float(jnp.max(jnp.abs(out - ref)))

    # batch=2 exercises B_tile=1 / grid=2; batch=16 exercises B_tile=8 / grid=2.
    k1, k2 = jax.random.split(k_x)
    check(2, k1)
    check(16, k2)
    print("KERNEL_OK")
</pallas_src>

<mosaic_0001>
module attributes {stable_mosaic.version = 11 : i64} {
  func.func @kernel(%arg0: i32, %arg1: memref<1x18x18x4xf32, #tpu.memory_space<vmem>>, %arg2: memref<36x8xf32, #tpu.memory_space<vmem>>, %arg3: memref<1x8xf32, #tpu.memory_space<vmem>>, %arg4: memref<72x16xf32, #tpu.memory_space<vmem>>, %arg5: memref<1x16xf32, #tpu.memory_space<vmem>>, %arg6: memref<256x32xf32, #tpu.memory_space<vmem>>, %arg7: memref<1x32xf32, #tpu.memory_space<vmem>>, %arg8: memref<32x10xf32, #tpu.memory_space<vmem>>, %arg9: memref<1x10xf32, #tpu.memory_space<vmem>>, %arg10: memref<1x1x10xf32, #tpu.memory_space<vmem>>, %arg11: memref<256x36xf32, #tpu.memory_space<vmem>>, %arg12: memref<64x72xf32, #tpu.memory_space<vmem>>, %arg13: memref<256x8xf32, #tpu.memory_space<vmem>>, %arg14: memref<64x16xf32, #tpu.memory_space<vmem>>, %arg15: memref<1x10x10x8xf32, #tpu.memory_space<vmem>>, %arg16: memref<1x4x4x16xf32, #tpu.memory_space<vmem>>, %arg17: memref<1x256xf32, #tpu.memory_space<vmem>>) attributes {dimension_semantics = [#tpu.dimension_semantics<parallel>], iteration_bounds = array<i64: 2>, scalar_prefetch = 0 : i64, scratch_operands = 7 : i64, tpu.core_type = #tpu.core_type<tc>, window_params = [{transform_indices = @transform_0, window_bounds = array<i64: 1, 18, 18, 4>}, {pipeline_mode = #tpu.pipeline_mode<synchronous>, transform_indices = @transform_1, window_bounds = array<i64: 36, 8>}, {pipeline_mode = #tpu.pipeline_mode<synchronous>, transform_indices = @transform_2, window_bounds = array<i64: 1, 8>}, {pipeline_mode = #tpu.pipeline_mode<synchronous>, transform_indices = @transform_3, window_bounds = array<i64: 72, 16>}, {pipeline_mode = #tpu.pipeline_mode<synchronous>, transform_indices = @transform_4, window_bounds = array<i64: 1, 16>}, {pipeline_mode = #tpu.pipeline_mode<synchronous>, transform_indices = @transform_5, window_bounds = array<i64: 256, 32>}, {pipeline_mode = #tpu.pipeline_mode<synchronous>, transform_indices = @transform_6, window_bounds = array<i64: 1, 32>}, {pipeline_mode = #tpu.pipeline_mode<synchronous>, transform_indices = @transform_7, window_bounds = array<i64: 32, 10>}, {pipeline_mode = #tpu.pipeline_mode<synchronous>, transform_indices = @transform_8, window_bounds = array<i64: 1, 10>}, {transform_indices = @transform_9, window_bounds = array<i64: 1, 1, 10>}]} {
    %c0 = arith.constant 0 : index
    %c0_0 = arith.constant 0 : index
    %c0_1 = arith.constant 0 : index
    %c0_2 = arith.constant 0 : index
    %0 = vector.load %arg1[%c0, %c0_0, %c0_1, %c0_2] : memref<1x18x18x4xf32, #tpu.memory_space<vmem>>, vector<1x16x16x4xf32>
    %1 = vector.shape_cast %0 : vector<1x16x16x4xf32> to vector<256x4xf32>
    %c0_3 = arith.constant 0 : index
    %c0_4 = arith.constant 0 : index
    %2 = vector.load %arg11[%c0_3, %c0_4] : memref<256x36xf32, #tpu.memory_space<vmem>>, vector<256x4xf32>
    tpu.vector_store %arg11[%c0_3, %c0_4], %1 {strides = array<i32>} : memref<256x36xf32, #tpu.memory_space<vmem>>, vector<256x4xf32>,
    %c0_5 = arith.constant 0 : index
    %c0_6 = arith.constant 0 : index
    %c1 = arith.constant 1 : index
    %c0_7 = arith.constant 0 : index
    %3 = vector.load %arg1[%c0_5, %c0_6, %c1, %c0_7] : memref<1x18x18x4xf32, #tpu.memory_space<vmem>>, vector<1x16x16x4xf32>
    %4 = vector.shape_cast %3 : vector<1x16x16x4xf32> to vector<256x4xf32>
    %c0_8 = arith.constant 0 : index
    %c4 = arith.constant 4 : index
    %5 = vector.load %arg11[%c0_8, %c4] : memref<256x36xf32, #tpu.memory_space<vmem>>, vector<256x4xf32>
    tpu.vector_store %arg11[%c0_8, %c4], %4 {strides = array<i32>} : memref<256x36xf32, #tpu.memory_space<vmem>>, vector<256x4xf32>,
    %c0_9 = arith.constant 0 : index
    %c0_10 = arith.constant 0 : index
    %c2 = arith.constant 2 : index
    %c0_11 = arith.constant 0 : index
    %6 = vector.load %arg1[%c0_9, %c0_10, %c2, %c0_11] : memref<1x18x18x4xf32, #tpu.memory_space<vmem>>, vector<1x16x16x4xf32>
    %7 = vector.shape_cast %6 : vector<1x16x16x4xf32> to vector<256x4xf32>
    %c0_12 = arith.constant 0 : index
    %c8 = arith.constant 8 : index
    %8 = vector.load %arg11[%c0_12, %c8] : memref<256x36xf32, #tpu.memory_space<vmem>>, vector<256x4xf32>
    tpu.vector_store %arg11[%c0_12, %c8], %7 {strides = array<i32>} : memref<256x36xf32, #tpu.memory_space<vmem>>, vector<256x4xf32>,
    %c0_13 = arith.constant 0 : index
    %c1_14 = arith.constant 1 : index
    %c0_15 = arith.constant 0 : index
    %c0_16 = arith.constant 0 : index
    %9 = vector.load %arg1[%c0_13, %c1_14, %c0_15, %c0_16] : memref<1x18x18x4xf32, #tpu.memory_space<vmem>>, vector<1x16x16x4xf32>
    %10 = vector.shape_cast %9 : vector<1x16x16x4xf32> to vector<256x4xf32>
    %c0_17 = arith.constant 0 : index
    %c12 = arith.constant 12 : index
    %11 = vector.load %arg11[%c0_17, %c12] : memref<256x36xf32, #tpu.memory_space<vmem>>, vector<256x4xf32>
    tpu.vector_store %arg11[%c0_17, %c12], %10 {strides = array<i32>} : memref<256x36xf32, #tpu.memory_space<vmem>>, vector<256x4xf32>,
    %c0_18 = arith.constant 0 : index
    %c1_19 = arith.constant 1 : index
    %c1_20 = arith.constant 1 : index
    %c0_21 = arith.constant 0 : index
    %12 = vector.load %arg1[%c0_18, %c1_19, %c1_20, %c0_21] : memref<1x18x18x4xf32, #tpu.memory_space<vmem>>, vector<1x16x16x4xf32>
    %13 = vector.shape_cast %12 : vector<1x16x16x4xf32> to vector<256x4xf32>
    %c0_22 = arith.constant 0 : index
    %c16 = arith.constant 16 : index
    %14 = vector.load %arg11[%c0_22, %c16] : memref<256x36xf32, #tpu.memory_space<vmem>>, vector<256x4xf32>
    tpu.vector_store %arg11[%c0_22, %c16], %13 {strides = array<i32>} : memref<256x36xf32, #tpu.memory_space<vmem>>, vector<256x4xf32>,
    %c0_23 = arith.constant 0 : index
    %c1_24 = arith.constant 1 : index
    %c2_25 = arith.constant 2 : index
    %c0_26 = arith.constant 0 : index
    %15 = vector.load %arg1[%c0_23, %c1_24, %c2_25, %c0_26] : memref<1x18x18x4xf32, #tpu.memory_space<vmem>>, vector<1x16x16x4xf32>
    %16 = vector.shape_cast %15 : vector<1x16x16x4xf32> to vector<256x4xf32>
    %c0_27 = arith.constant 0 : index
    %c20 = arith.constant 20 : index
    %17 = vector.load %arg11[%c0_27, %c20] : memref<256x36xf32, #tpu.memory_space<vmem>>, vector<256x4xf32>
    tpu.vector_store %arg11[%c0_27, %c20], %16 {strides = array<i32>} : memref<256x36xf32, #tpu.memory_space<vmem>>, vector<256x4xf32>,
    %c0_28 = arith.constant 0 : index
    %c2_29 = arith.constant 2 : index
    %c0_30 = arith.constant 0 : index
    %c0_31 = arith.constant 0 : index
    %18 = vector.load %arg1[%c0_28, %c2_29, %c0_30, %c0_31] : memref<1x18x18x4xf32, #tpu.memory_space<vmem>>, vector<1x16x16x4xf32>
    %19 = vector.shape_cast %18 : vector<1x16x16x4xf32> to vector<256x4xf32>
    %c0_32 = arith.constant 0 : index
    %c24 = arith.constant 24 : index
    %20 = vector.load %arg11[%c0_32, %c24] : memref<256x36xf32, #tpu.memory_space<vmem>>, vector<256x4xf32>
    tpu.vector_store %arg11[%c0_32, %c24], %19 {strides = array<i32>} : memref<256x36xf32, #tpu.memory_space<vmem>>, vector<256x4xf32>,
    %c0_33 = arith.constant 0 : index
    %c2_34 = arith.constant 2 : index
    %c1_35 = arith.constant 1 : index
    %c0_36 = arith.constant 0 : index
    %21 = vector.load %arg1[%c0_33, %c2_34, %c1_35, %c0_36] : memref<1x18x18x4xf32, #tpu.memory_space<vmem>>, vector<1x16x16x4xf32>
    %22 = vector.shape_cast %21 : vector<1x16x16x4xf32> to vector<256x4xf32>
    %c0_37 = arith.constant 0 : index
    %c28 = arith.constant 28 : index
    %23 = vector.load %arg11[%c0_37, %c28] : memref<256x36xf32, #tpu.memory_space<vmem>>, vector<256x4xf32>
    tpu.vector_store %arg11[%c0_37, %c28], %22 {strides = array<i32>} : memref<256x36xf32, #tpu.memory_space<vmem>>, vector<256x4xf32>,
    %c0_38 = arith.constant 0 : index
    %c2_39 = arith.constant 2 : index
    %c2_40 = arith.constant 2 : index
    %c0_41 = arith.constant 0 : index
    %24 = vector.load %arg1[%c0_38, %c2_39, %c2_40, %c0_41] : memref<1x18x18x4xf32, #tpu.memory_space<vmem>>, vector<1x16x16x4xf32>
    %25 = vector.shape_cast %24 : vector<1x16x16x4xf32> to vector<256x4xf32>
    %c0_42 = arith.constant 0 : index
    %c32 = arith.constant 32 : index
    %26 = vector.load %arg11[%c0_42, %c32] : memref<256x36xf32, #tpu.memory_space<vmem>>, vector<256x4xf32>
    tpu.vector_store %arg11[%c0_42, %c32], %25 {strides = array<i32>} : memref<256x36xf32, #tpu.memory_space<vmem>>, vector<256x4xf32>,
    %c0_43 = arith.constant 0 : index
    %c0_44 = arith.constant 0 : index
    %27 = vector.load %arg11[%c0_43, %c0_44] : memref<256x36xf32, #tpu.memory_space<vmem>>, vector<256x36xf32>
    %c0_45 = arith.constant 0 : index
    %c0_46 = arith.constant 0 : index
    %28 = vector.load %arg2[%c0_45, %c0_46] : memref<36x8xf32, #tpu.memory_space<vmem>>, vector<36x8xf32>
    %cst = arith.constant dense<0.000000e+00> : vector<256x8xf32>
    %29 = tpu.matmul %27, %28, %cst {dimension_numbers = #tpu.dot_dimension_numbers<[1], [0], [0], [1], [0, 0, 1, 1], [], []>} : vector<256x36xf32>, vector<36x8xf32>, vector<256x8xf32> -> vector<256x8xf32>
    %c0_47 = arith.constant 0 : index
    %c0_48 = arith.constant 0 : index
    %30 = vector.load %arg3[%c0_47, %c0_48] : memref<1x8xf32, #tpu.memory_space<vmem>>, vector<1x8xf32>
    %31 = vector.broadcast %30 : vector<1x8xf32> to vector<256x8xf32>
    %32 = arith.addf %29, %31 : vector<256x8xf32>
    %c0_49 = arith.constant 0 : index
    %c0_50 = arith.constant 0 : index
    %33 = vector.load %arg13[%c0_49, %c0_50] : memref<256x8xf32, #tpu.memory_space<vmem>>, vector<256x8xf32>
    tpu.vector_store %arg13[%c0_49, %c0_50], %32 {strides = array<i32>} : memref<256x8xf32, #tpu.memory_space<vmem>>, vector<256x8xf32>,
    %c0_51 = arith.constant 0 : index
    %c0_52 = arith.constant 0 : index
    %34 = tpu.strided_load %arg13[%c0_51, %c0_52] {strides = array<i32: 2, 1>} : memref<256x8xf32, #tpu.memory_space<vmem>>, vector<128x8xf32>
    %c1_53 = arith.constant 1 : index
    %c0_54 = arith.constant 0 : index
    %35 = tpu.strided_load %arg13[%c1_53, %c0_54] {strides = array<i32: 2, 1>} : memref<256x8xf32, #tpu.memory_space<vmem>>, vector<128x8xf32>
    %36 = arith.maximumf %34, %35 : vector<128x8xf32>
    %37 = vector.shape_cast %36 : vector<128x8xf32> to vector<8x16x8xf32>
    %38 = vector.extract_strided_slice %37 {offsets = [0, 0, 0], sizes = [8, 8, 8], strides = [1, 1, 1]} : vector<8x16x8xf32> to vector<8x8x8xf32>
    %39 = vector.extract_strided_slice %37 {offsets = [0, 8, 0], sizes = [8, 8, 8], strides = [1, 1, 1]} : vector<8x16x8xf32> to vector<8x8x8xf32>
    %40 = arith.maximumf %38, %39 : vector<8x8x8xf32>
    %cst_55 = arith.constant 0.000000e+00 : f32
    %41 = vector.broadcast %cst_55 : f32 to vector<1x1x10x8xf32>
    %cst_56 = arith.constant 0.000000e+00 : f32
    %42 = vector.broadcast %cst_56 : f32 to vector<1x10x1x8xf32>
    %c0_57 = arith.constant 0 : index
    %c0_58 = arith.constant 0 : index
    %c0_59 = arith.constant 0 : index
    %c0_60 = arith.constant 0 : index
    %43 = vector.load %arg15[%c0_57, %c0_58, %c0_59, %c0_60] : memref<1x10x10x8xf32, #tpu.memory_space<vmem>>, vector<1x1x10x8xf32>
    tpu.vector_store %arg15[%c0_57, %c0_58, %c0_59, %c0_60], %41 {strides = array<i32>} : memref<1x10x10x8xf32, #tpu.memory_space<vmem>>, vector<1x1x10x8xf32>,
    %c0_61 = arith.constant 0 : index
    %c9 = arith.constant 9 : index
    %c0_62 = arith.constant 0 : index
    %c0_63 = arith.constant 0 : index
    %44 = vector.load %arg15[%c0_61, %c9, %c0_62, %c0_63] : memref<1x10x10x8xf32, #tpu.memory_space<vmem>>, vector<1x1x10x8xf32>
    tpu.vector_store %arg15[%c0_61, %c9, %c0_62, %c0_63], %41 {strides = array<i32>} : memref<1x10x10x8xf32, #tpu.memory_space<vmem>>, vector<1x1x10x8xf32>,
    %c0_64 = arith.constant 0 : index
    %c0_65 = arith.constant 0 : index
    %c0_66 = arith.constant 0 : index
    %c0_67 = arith.constant 0 : index
    %45 = vector.load %arg15[%c0_64, %c0_65, %c0_66, %c0_67] : memref<1x10x10x8xf32, #tpu.memory_space<vmem>>, vector<1x10x1x8xf32>
    tpu.vector_store %arg15[%c0_64, %c0_65, %c0_66, %c0_67], %42 {strides = array<i32>} : memref<1x10x10x8xf32, #tpu.memory_space<vmem>>, vector<1x10x1x8xf32>,
    %c0_68 = arith.constant 0 : index
    %c0_69 = arith.constant 0 : index
    %c9_70 = arith.constant 9 : index
    %c0_71 = arith.constant 0 : index
    %46 = vector.load %arg15[%c0_68, %c0_69, %c9_70, %c0_71] : memref<1x10x10x8xf32, #tpu.memory_space<vmem>>, vector<1x10x1x8xf32>
    tpu.vector_store %arg15[%c0_68, %c0_69, %c9_70, %c0_71], %42 {strides = array<i32>} : memref<1x10x10x8xf32, #tpu.memory_space<vmem>>, vector<1x10x1x8xf32>,
    %47 = vector.shape_cast %40 : vector<8x8x8xf32> to vector<1x8x8x8xf32>
    %c0_72 = arith.constant 0 : index
    %c1_73 = arith.constant 1 : index
    %c1_74 = arith.constant 1 : index
    %c0_75 = arith.constant 0 : index
    %48 = vector.load %arg15[%c0_72, %c1_73, %c1_74, %c0_75] : memref<1x10x10x8xf32, #tpu.memory_space<vmem>>, vector<1x8x8x8xf32>
    tpu.vector_store %arg15[%c0_72, %c1_73, %c1_74, %c0_75], %47 {strides = array<i32>} : memref<1x10x10x8xf32, #tpu.memory_space<vmem>>, vector<1x8x8x8xf32>,
    %c0_76 = arith.constant 0 : index
    %c0_77 = arith.constant 0 : index
    %c0_78 = arith.constant 0 : index
    %c0_79 = arith.constant 0 : index
    %49 = vector.load %arg15[%c0_76, %c0_77, %c0_78, %c0_79] : memref<1x10x10x8xf32, #tpu.memory_space<vmem>>, vector<1x8x8x8xf32>
    %50 = vector.shape_cast %49 : vector<1x8x8x8xf32> to vector<64x8xf32>
    %c0_80 = arith.constant 0 : index
    %c0_81 = arith.constant 0 : index
    %51 = vector.load %arg12[%c0_80, %c0_81] : memref<64x72xf32, #tpu.memory_space<vmem>>, vector<64x8xf32>
    tpu.vector_store %arg12[%c0_80, %c0_81], %50 {strides = array<i32>} : memref<64x72xf32, #tpu.memory_space<vmem>>, vector<64x8xf32>,
    %c0_82 = arith.constant 0 : index
    %c0_83 = arith.constant 0 : index
    %c1_84 = arith.constant 1 : index
    %c0_85 = arith.constant 0 : index
    %52 = vector.load %arg15[%c0_82, %c0_83, %c1_84, %c0_85] : memref<1x10x10x8xf32, #tpu.memory_space<vmem>>, vector<1x8x8x8xf32>
    %53 = vector.shape_cast %52 : vector<1x8x8x8xf32> to vector<64x8xf32>
    %c0_86 = arith.constant 0 : index
    %c8_87 = arith.constant 8 : index
    %54 = vector.load %arg12[%c0_86, %c8_87] : memref<64x72xf32, #tpu.memory_space<vmem>>, vector<64x8xf32>
    tpu.vector_store %arg12[%c0_86, %c8_87], %53 {strides = array<i32>} : memref<64x72xf32, #tpu.memory_space<vmem>>, vector<64x8xf32>,
    %c0_88 = arith.constant 0 : index
    %c0_89 = arith.constant 0 : index
    %c2_90 = arith.constant 2 : index
    %c0_91 = arith.constant 0 : index
    %55 = vector.load %arg15[%c0_88, %c0_89, %c2_90, %c0_91] : memref<1x10x10x8xf32, #tpu.memory_space<vmem>>, vector<1x8x8x8xf32>
    %56 = vector.shape_cast %55 : vector<1x8x8x8xf32> to vector<64x8xf32>
    %c0_92 = arith.constant 0 : index
    %c16_93 = arith.constant 16 : index
    %57 = vector.load %arg12[%c0_92, %c16_93] : memref<64x72xf32, #tpu.memory_space<vmem>>, vector<64x8xf32>
    tpu.vector_store %arg12[%c0_92, %c16_93], %56 {strides = array<i32>} : memref<64x72xf32, #tpu.memory_space<vmem>>, vector<64x8xf32>,
    %c0_94 = arith.constant 0 : index
    %c1_95 = arith.constant 1 : index
    %c0_96 = arith.constant 0 : index
    %c0_97 = arith.constant 0 : index
    %58 = vector.load %arg15[%c0_94, %c1_95, %c0_96, %c0_97] : memref<1x10x10x8xf32, #tpu.memory_space<vmem>>, vector<1x8x8x8xf32>
    %59 = vector.shape_cast %58 : vector<1x8x8x8xf32> to vector<64x8xf32>
    %c0_98 = arith.constant 0 : index
    %c24_99 = arith.constant 24 : index
    %60 = vector.load %arg12[%c0_98, %c24_99] : memref<64x72xf32, #tpu.memory_space<vmem>>, vector<64x8xf32>
    tpu.vector_store %arg12[%c0_98, %c24_99], %59 {strides = array<i32>} : memref<64x72xf32, #tpu.memory_space<vmem>>, vector<64x8xf32>,
    %c0_100 = arith.constant 0 : index
    %c1_101 = arith.constant 1 : index
    %c1_102 = arith.constant 1 : index
    %c0_103 = arith.constant 0 : index
    %61 = vector.load %arg15[%c0_100, %c1_101, %c1_102, %c0_103] : memref<1x10x10x8xf32, #tpu.memory_space<vmem>>, vector<1x8x8x8xf32>
    %62 = vector.shape_cast %61 : vector<1x8x8x8xf32> to vector<64x8xf32>
    %c0_104 = arith.constant 0 : index
    %c32_105 = arith.constant 32 : index
    %63 = vector.load %arg12[%c0_104, %c32_105] : memref<64x72xf32, #tpu.memory_space<vmem>>, vector<64x8xf32>
    tpu.vector_store %arg12[%c0_104, %c32_105], %62 {strides = array<i32>} : memref<64x72xf32, #tpu.memory_space<vmem>>, vector<64x8xf32>,
    %c0_106 = arith.constant 0 : index
    %c1_107 = arith.constant 1 : index
    %c2_108 = arith.constant 2 : index
    %c0_109 = arith.constant 0 : index
    %64 = vector.load %arg15[%c0_106, %c1_107, %c2_108, %c0_109] : memref<1x10x10x8xf32, #tpu.memory_space<vmem>>, vector<1x8x8x8xf32>
    %65 = vector.shape_cast %64 : vector<1x8x8x8xf32> to vector<64x8xf32>
    %c0_110 = arith.constant 0 : index
    %c40 = arith.constant 40 : index
    %66 = vector.load %arg12[%c0_110, %c40] : memref<64x72xf32, #tpu.memory_space<vmem>>, vector<64x8xf32>
    tpu.vector_store %arg12[%c0_110, %c40], %65 {strides = array<i32>} : memref<64x72xf32, #tpu.memory_space<vmem>>, vector<64x8xf32>,
    %c0_111 = arith.constant 0 : index
    %c2_112 = arith.constant 2 : index
    %c0_113 = arith.constant 0 : index
    %c0_114 = arith.constant 0 : index
    %67 = vector.load %arg15[%c0_111, %c2_112, %c0_113, %c0_114] : memref<1x10x10x8xf32, #tpu.memory_space<vmem>>, vector<1x8x8x8xf32>
    %68 = vector.shape_cast %67 : vector<1x8x8x8xf32> to vector<64x8xf32>
    %c0_115 = arith.constant 0 : index
    %c48 = arith.constant 48 : index
    %69 = vector.load %arg12[%c0_115, %c48] : memref<64x72xf32, #tpu.memory_space<vmem>>, vector<64x8xf32>
    tpu.vector_store %arg12[%c0_115, %c48], %68 {strides = array<i32>} : memref<64x72xf32, #tpu.memory_space<vmem>>, vector<64x8xf32>,
    %c0_116 = arith.constant 0 : index
    %c2_117 = arith.constant 2 : index
    %c1_118 = arith.constant 1 : index
    %c0_119 = arith.constant 0 : index
    %70 = vector.load %arg15[%c0_116, %c2_117, %c1_118, %c0_119] : memref<1x10x10x8xf32, #tpu.memory_space<vmem>>, vector<1x8x8x8xf32>
    %71 = vector.shape_cast %70 : vector<1x8x8x8xf32> to vector<64x8xf32>
    %c0_120 = arith.constant 0 : index
    %c56 = arith.constant 56 : index
    %72 = vector.load %arg12[%c0_120, %c56] : memref<64x72xf32, #tpu.memory_space<vmem>>, vector<64x8xf32>
    tpu.vector_store %arg12[%c0_120, %c56], %71 {strides = array<i32>} : memref<64x72xf32, #tpu.memory_space<vmem>>, vector<64x8xf32>,
    %c0_121 = arith.constant 0 : index
    %c2_122 = arith.constant 2 : index
    %c2_123 = arith.constant 2 : index
    %c0_124 = arith.constant 0 : index
    %73 = vector.load %arg15[%c0_121, %c2_122, %c2_123, %c0_124] : memref<1x10x10x8xf32, #tpu.memory_space<vmem>>, vector<1x8x8x8xf32>
    %74 = vector.shape_cast %73 : vector<1x8x8x8xf32> to vector<64x8xf32>
    %c0_125 = arith.constant 0 : index
    %c64 = arith.constant 64 : index
    %75 = vector.load %arg12[%c0_125, %c64] : memref<64x72xf32, #tpu.memory_space<vmem>>, vector<64x8xf32>
    tpu.vector_store %arg12[%c0_125, %c64], %74 {strides = array<i32>} : memref<64x72xf32, #tpu.memory_space<vmem>>, vector<64x8xf32>,
    %c0_126 = arith.constant 0 : index
    %c0_127 = arith.constant 0 : index
    %76 = vector.load %arg12[%c0_126, %c0_127] : memref<64x72xf32, #tpu.memory_space<vmem>>, vector<64x72xf32>
    %c0_128 = arith.constant 0 : index
    %c0_129 = arith.constant 0 : index
    %77 = vector.load %arg4[%c0_128, %c0_129] : memref<72x16xf32, #tpu.memory_space<vmem>>, vector<72x16xf32>
    %cst_130 = arith.constant dense<0.000000e+00> : vector<64x16xf32>
    %78 = tpu.matmul %76, %77, %cst_130 {dimension_numbers = #tpu.dot_dimension_numbers<[1], [0], [0], [1], [0, 0, 1, 1], [], []>} : vector<64x72xf32>, vector<72x16xf32>, vector<64x16xf32> -> vector<64x16xf32>
    %c0_131 = arith.constant 0 : index
    %c0_132 = arith.constant 0 : index
    %79 = vector.load %arg5[%c0_131, %c0_132] : memref<1x16xf32, #tpu.memory_space<vmem>>, vector<1x16xf32>
    %80 = vector.broadcast %79 : vector<1x16xf32> to vector<64x16xf32>
    %81 = arith.addf %78, %80 : vector<64x16xf32>
    %c0_133 = arith.constant 0 : index
    %c0_134 = arith.constant 0 : index
    %82 = vector.load %arg14[%c0_133, %c0_134] : memref<64x16xf32, #tpu.memory_space<vmem>>, vector<64x16xf32>
    tpu.vector_store %arg14[%c0_133, %c0_134], %81 {strides = array<i32>} : memref<64x16xf32, #tpu.memory_space<vmem>>, vector<64x16xf32>,
    %c0_135 = arith.constant 0 : index
    %c0_136 = arith.constant 0 : index
    %83 = tpu.strided_load %arg14[%c0_135, %c0_136] {strides = array<i32: 2, 1>} : memref<64x16xf32, #tpu.memory_space<vmem>>, vector<32x16xf32>
    %c1_137 = arith.constant 1 : index
    %c0_138 = arith.constant 0 : index
    %84 = tpu.strided_load %arg14[%c1_137, %c0_138] {strides = array<i32: 2, 1>} : memref<64x16xf32, #tpu.memory_space<vmem>>, vector<32x16xf32>
    %85 = arith.maximumf %83, %84 : vector<32x16xf32>
    %86 = vector.shape_cast %85 : vector<32x16xf32> to vector<4x8x16xf32>
    %87 = vector.extract_strided_slice %86 {offsets = [0, 0, 0], sizes = [4, 4, 16], strides = [1, 1, 1]} : vector<4x8x16xf32> to vector<4x4x16xf32>
    %88 = vector.extract_strided_slice %86 {offsets = [0, 4, 0], sizes = [4, 4, 16], strides = [1, 1, 1]} : vector<4x8x16xf32> to vector<4x4x16xf32>
    %89 = arith.maximumf %87, %88 : vector<4x4x16xf32>
    %90 = vector.shape_cast %89 : vector<4x4x16xf32> to vector<1x4x4x16xf32>
    %c0_139 = arith.constant 0 : index
    %c0_140 = arith.constant 0 : index
    %c0_141 = arith.constant 0 : index
    %c0_142 = arith.constant 0 : index
    %91 = vector.load %arg16[%c0_139, %c0_140, %c0_141, %c0_142] : memref<1x4x4x16xf32, #tpu.memory_space<vmem>>, vector<1x4x4x16xf32>
    tpu.vector_store %arg16[%c0_139, %c0_140, %c0_141, %c0_142], %90 {strides = array<i32>} : memref<1x4x4x16xf32, #tpu.memory_space<vmem>>, vector<1x4x4x16xf32>,
    %c0_143 = arith.constant 0 : index
    %c0_144 = arith.constant 0 : index
    %c0_145 = arith.constant 0 : index
    %c0_146 = arith.constant 0 : index
    %92 = vector.load %arg16[%c0_143, %c0_144, %c0_145, %c0_146] : memref<1x4x4x16xf32, #tpu.memory_space<vmem>>, vector<1x1x1x16xf32>
    %93 = vector.shape_cast %92 : vector<1x1x1x16xf32> to vector<1x16xf32>
    %c0_147 = arith.constant 0 : index
    %c0_148 = arith.constant 0 : index
    %94 = vector.load %arg17[%c0_147, %c0_148] : memref<1x256xf32, #tpu.memory_space<vmem>>, vector<1x16xf32>
    tpu.vector_store %arg17[%c0_147, %c0_148], %93 {strides = array<i32>} : memref<1x256xf32, #tpu.memory_space<vmem>>, vector<1x16xf32>,
    %c0_149 = arith.constant 0 : index
    %c0_150 = arith.constant 0 : index
    %c1_151 = arith.constant 1 : index
    %c0_152 = arith.constant 0 : index
    %95 = vector.load %arg16[%c0_149, %c0_150, %c1_151, %c0_152] : memref<1x4x4x16xf32, #tpu.memory_space<vmem>>, vector<1x1x1x16xf32>
    %96 = vector.shape_cast %95 : vector<1x1x1x16xf32> to vector<1x16xf32>
    %c0_153 = arith.constant 0 : index
    %c16_154 = arith.constant 16 : index
    %97 = vector.load %arg17[%c0_153, %c16_154] : memref<1x256xf32, #tpu.memory_space<vmem>>, vector<1x16xf32>
    tpu.vector_store %arg17[%c0_153, %c16_154], %96 {strides = array<i32>} : memref<1x256xf32, #tpu.memory_space<vmem>>, vector<1x16xf32>,
    %c0_155 = arith.constant 0 : index
    %c0_156 = arith.constant 0 : index
    %c2_157 = arith.constant 2 : index
    %c0_158 = arith.constant 0 : index
    %98 = vector.load %arg16[%c0_155, %c0_156, %c2_157, %c0_158] : memref<1x4x4x16xf32, #tpu.memory_space<vmem>>, vector<1x1x1x16xf32>
    %99 = vector.shape_cast %98 : vector<1x1x1x16xf32> to vector<1x16xf32>
    %c0_159 = arith.constant 0 : index
    %c32_160 = arith.constant 32 : index
    %100 = vector.load %arg17[%c0_159, %c32_160] : memref<1x256xf32, #tpu.memory_space<vmem>>, vector<1x16xf32>
    tpu.vector_store %arg17[%c0_159, %c32_160], %99 {strides = array<i32>} : memref<1x256xf32, #tpu.memory_space<vmem>>, vector<1x16xf32>,
    %c0_161 = arith.constant 0 : index
    %c0_162 = arith.constant 0 : index
    %c3 = arith.constant 3 : index
    %c0_163 = arith.constant 0 : index
    %101 = vector.load %arg16[%c0_161, %c0_162, %c3, %c0_163] : memref<1x4x4x16xf32, #tpu.memory_space<vmem>>, vector<1x1x1x16xf32>
    %102 = vector.shape_cast %101 : vector<1x1x1x16xf32> to vector<1x16xf32>
    %c0_164 = arith.constant 0 : index
    %c48_165 = arith.constant 48 : index
    %103 = vector.load %arg17[%c0_164, %c48_165] : memref<1x256xf32, #tpu.memory_space<vmem>>, vector<1x16xf32>
    tpu.vector_store %arg17[%c0_164, %c48_165], %102 {strides = array<i32>} : memref<1x256xf32, #tpu.memory_space<vmem>>, vector<1x16xf32>,
    %c0_166 = arith.constant 0 : index
    %c1_167 = arith.constant 1 : index
    %c0_168 = arith.constant 0 : index
    %c0_169 = arith.constant 0 : index
    %104 = vector.load %arg16[%c0_166, %c1_167, %c0_168, %c0_169] : memref<1x4x4x16xf32, #tpu.memory_space<vmem>>, vector<1x1x1x16xf32>
    %105 = vector.shape_cast %104 : vector<1x1x1x16xf32> to vector<1x16xf32>
    %c0_170 = arith.constant 0 : index
    %c64_171 = arith.constant 64 : index
    %106 = vector.load %arg17[%c0_170, %c64_171] : memref<1x256xf32, #tpu.memory_space<vmem>>, vector<1x16xf32>
    tpu.vector_store %arg17[%c0_170, %c64_171], %105 {strides = array<i32>} : memref<1x256xf32, #tpu.memory_space<vmem>>, vector<1x16xf32>,
    %c0_172 = arith.constant 0 : index
    %c1_173 = arith.constant 1 : index
    %c1_174 = arith.constant 1 : index
    %c0_175 = arith.constant 0 : index
    %107 = vector.load %arg16[%c0_172, %c1_173, %c1_174, %c0_175] : memref<1x4x4x16xf32, #tpu.memory_space<vmem>>, vector<1x1x1x16xf32>
    %108 = vector.shape_cast %107 : vector<1x1x1x16xf32> to vector<1x16xf32>
    %c0_176 = arith.constant 0 : index
    %c80 = arith.constant 80 : index
    %109 = vector.load %arg17[%c0_176, %c80] : memref<1x256xf32, #tpu.memory_space<vmem>>, vector<1x16xf32>
    tpu.vector_store %arg17[%c0_176, %c80], %108 {strides = array<i32>} : memref<1x256xf32, #tpu.memory_space<vmem>>, vector<1x16xf32>,
    %c0_177 = arith.constant 0 : index
    %c1_178 = arith.constant 1 : index
    %c2_179 = arith.constant 2 : index
    %c0_180 = arith.constant 0 : index
    %110 = vector.load %arg16[%c0_177, %c1_178, %c2_179, %c0_180] : memref<1x4x4x16xf32, #tpu.memory_space<vmem>>, vector<1x1x1x16xf32>
    %111 = vector.shape_cast %110 : vector<1x1x1x16xf32> to vector<1x16xf32>
    %c0_181 = arith.constant 0 : index
    %c96 = arith.constant 96 : index
    %112 = vector.load %arg17[%c0_181, %c96] : memref<1x256xf32, #tpu.memory_space<vmem>>, vector<1x16xf32>
    tpu.vector_store %arg17[%c0_181, %c96], %111 {strides = array<i32>} : memref<1x256xf32, #tpu.memory_space<vmem>>, vector<1x16xf32>,
    %c0_182 = arith.constant 0 : index
    %c1_183 = arith.constant 1 : index
    %c3_184 = arith.constant 3 : index
    %c0_185 = arith.constant 0 : index
    %113 = vector.load %arg16[%c0_182, %c1_183, %c3_184, %c0_185] : memref<1x4x4x16xf32, #tpu.memory_space<vmem>>, vector<1x1x1x16xf32>
    %114 = vector.shape_cast %113 : vector<1x1x1x16xf32> to vector<1x16xf32>
    %c0_186 = arith.constant 0 : index
    %c112 = arith.constant 112 : index
    %115 = vector.load %arg17[%c0_186, %c112] : memref<1x256xf32, #tpu.memory_space<vmem>>, vector<1x16xf32>
    tpu.vector_store %arg17[%c0_186, %c112], %114 {strides = array<i32>} : memref<1x256xf32, #tpu.memory_space<vmem>>, vector<1x16xf32>,
    %c0_187 = arith.constant 0 : index
    %c2_188 = arith.constant 2 : index
    %c0_189 = arith.constant 0 : index
    %c0_190 = arith.constant 0 : index
    %116 = vector.load %arg16[%c0_187, %c2_188, %c0_189, %c0_190] : memref<1x4x4x16xf32, #tpu.memory_space<vmem>>, vector<1x1x1x16xf32>
    %117 = vector.shape_cast %116 : vector<1x1x1x16xf32> to vector<1x16xf32>
    %c0_191 = arith.constant 0 : index
    %c128 = arith.constant 128 : index
    %118 = vector.load %arg17[%c0_191, %c128] : memref<1x256xf32, #tpu.memory_space<vmem>>, vector<1x16xf32>
    tpu.vector_store %arg17[%c0_191, %c128], %117 {strides = array<i32>} : memref<1x256xf32, #tpu.memory_space<vmem>>, vector<1x16xf32>,
    %c0_192 = arith.constant 0 : index
    %c2_193 = arith.constant 2 : index
    %c1_194 = arith.constant 1 : index
    %c0_195 = arith.constant 0 : index
    %119 = vector.load %arg16[%c0_192, %c2_193, %c1_194, %c0_195] : memref<1x4x4x16xf32, #tpu.memory_space<vmem>>, vector<1x1x1x16xf32>
    %120 = vector.shape_cast %119 : vector<1x1x1x16xf32> to vector<1x16xf32>
    %c0_196 = arith.constant 0 : index
    %c144 = arith.constant 144 : index
    %121 = vector.load %arg17[%c0_196, %c144] : memref<1x256xf32, #tpu.memory_space<vmem>>, vector<1x16xf32>
    tpu.vector_store %arg17[%c0_196, %c144], %120 {strides = array<i32>} : memref<1x256xf32, #tpu.memory_space<vmem>>, vector<1x16xf32>,
    %c0_197 = arith.constant 0 : index
    %c2_198 = arith.constant 2 : index
    %c2_199 = arith.constant 2 : index
    %c0_200 = arith.constant 0 : index
    %122 = vector.load %arg16[%c0_197, %c2_198, %c2_199, %c0_200] : memref<1x4x4x16xf32, #tpu.memory_space<vmem>>, vector<1x1x1x16xf32>
    %123 = vector.shape_cast %122 : vector<1x1x1x16xf32> to vector<1x16xf32>
    %c0_201 = arith.constant 0 : index
    %c160 = arith.constant 160 : index
    %124 = vector.load %arg17[%c0_201, %c160] : memref<1x256xf32, #tpu.memory_space<vmem>>, vector<1x16xf32>
    tpu.vector_store %arg17[%c0_201, %c160], %123 {strides = array<i32>} : memref<1x256xf32, #tpu.memory_space<vmem>>, vector<1x16xf32>,
    %c0_202 = arith.constant 0 : index
    %c2_203 = arith.constant 2 : index
    %c3_204 = arith.constant 3 : index
    %c0_205 = arith.constant 0 : index
    %125 = vector.load %arg16[%c0_202, %c2_203, %c3_204, %c0_205] : memref<1x4x4x16xf32, #tpu.memory_space<vmem>>, vector<1x1x1x16xf32>
    %126 = vector.shape_cast %125 : vector<1x1x1x16xf32> to vector<1x16xf32>
    %c0_206 = arith.constant 0 : index
    %c176 = arith.constant 176 : index
    %127 = vector.load %arg17[%c0_206, %c176] : memref<1x256xf32, #tpu.memory_space<vmem>>, vector<1x16xf32>
    tpu.vector_store %arg17[%c0_206, %c176], %126 {strides = array<i32>} : memref<1x256xf32, #tpu.memory_space<vmem>>, vector<1x16xf32>,
    %c0_207 = arith.constant 0 : index
    %c3_208 = arith.constant 3 : index
    %c0_209 = arith.constant 0 : index
    %c0_210 = arith.constant 0 : index
    %128 = vector.load %arg16[%c0_207, %c3_208, %c0_209, %c0_210] : memref<1x4x4x16xf32, #tpu.memory_space<vmem>>, vector<1x1x1x16xf32>
    %129 = vector.shape_cast %128 : vector<1x1x1x16xf32> to vector<1x16xf32>
    %c0_211 = arith.constant 0 : index
    %c192 = arith.constant 192 : index
    %130 = vector.load %arg17[%c0_211, %c192] : memref<1x256xf32, #tpu.memory_space<vmem>>, vector<1x16xf32>
    tpu.vector_store %arg17[%c0_211, %c192], %129 {strides = array<i32>} : memref<1x256xf32, #tpu.memory_space<vmem>>, vector<1x16xf32>,
    %c0_212 = arith.constant 0 : index
    %c3_213 = arith.constant 3 : index
    %c1_214 = arith.constant 1 : index
    %c0_215 = arith.constant 0 : index
    %131 = vector.load %arg16[%c0_212, %c3_213, %c1_214, %c0_215] : memref<1x4x4x16xf32, #tpu.memory_space<vmem>>, vector<1x1x1x16xf32>
    %132 = vector.shape_cast %131 : vector<1x1x1x16xf32> to vector<1x16xf32>
    %c0_216 = arith.constant 0 : index
    %c208 = arith.constant 208 : index
    %133 = vector.load %arg17[%c0_216, %c208] : memref<1x256xf32, #tpu.memory_space<vmem>>, vector<1x16xf32>
    tpu.vector_store %arg17[%c0_216, %c208], %132 {strides = array<i32>} : memref<1x256xf32, #tpu.memory_space<vmem>>, vector<1x16xf32>,
    %c0_217 = arith.constant 0 : index
    %c3_218 = arith.constant 3 : index
    %c2_219 = arith.constant 2 : index
    %c0_220 = arith.constant 0 : index
    %134 = vector.load %arg16[%c0_217, %c3_218, %c2_219, %c0_220] : memref<1x4x4x16xf32, #tpu.memory_space<vmem>>, vector<1x1x1x16xf32>
    %135 = vector.shape_cast %134 : vector<1x1x1x16xf32> to vector<1x16xf32>
    %c0_221 = arith.constant 0 : index
    %c224 = arith.constant 224 : index
    %136 = vector.load %arg17[%c0_221, %c224] : memref<1x256xf32, #tpu.memory_space<vmem>>, vector<1x16xf32>
    tpu.vector_store %arg17[%c0_221, %c224], %135 {strides = array<i32>} : memref<1x256xf32, #tpu.memory_space<vmem>>, vector<1x16xf32>,
    %c0_222 = arith.constant 0 : index
    %c3_223 = arith.constant 3 : index
    %c3_224 = arith.constant 3 : index
    %c0_225 = arith.constant 0 : index
    %137 = vector.load %arg16[%c0_222, %c3_223, %c3_224, %c0_225] : memref<1x4x4x16xf32, #tpu.memory_space<vmem>>, vector<1x1x1x16xf32>
    %138 = vector.shape_cast %137 : vector<1x1x1x16xf32> to vector<1x16xf32>
    %c0_226 = arith.constant 0 : index
    %c240 = arith.constant 240 : index
    %139 = vector.load %arg17[%c0_226, %c240] : memref<1x256xf32, #tpu.memory_space<vmem>>, vector<1x16xf32>
    tpu.vector_store %arg17[%c0_226, %c240], %138 {strides = array<i32>} : memref<1x256xf32, #tpu.memory_space<vmem>>, vector<1x16xf32>,
    %c0_227 = arith.constant 0 : index
    %c0_228 = arith.constant 0 : index
    %140 = vector.load %arg17[%c0_227, %c0_228] : memref<1x256xf32, #tpu.memory_space<vmem>>, vector<1x256xf32>
    %c0_229 = arith.constant 0 : index
    %c0_230 = arith.constant 0 : index
    %141 = vector.load %arg6[%c0_229, %c0_230] : memref<256x32xf32, #tpu.memory_space<vmem>>, vector<256x32xf32>
    %cst_231 = arith.constant dense<0.000000e+00> : vector<1x32xf32>
    %142 = tpu.matmul %140, %141, %cst_231 {dimension_numbers = #tpu.dot_dimension_numbers<[1], [0], [0], [1], [0, 0, 1, 1], [], []>} : vector<1x256xf32>, vector<256x32xf32>, vector<1x32xf32> -> vector<1x32xf32>
    %c0_232 = arith.constant 0 : index
    %c0_233 = arith.constant 0 : index
    %143 = vector.load %arg7[%c0_232, %c0_233] : memref<1x32xf32, #tpu.memory_space<vmem>>, vector<1x32xf32>
    %144 = arith.addf %142, %143 : vector<1x32xf32>
    %cst_234 = arith.constant 0.000000e+00 : f32
    %145 = vector.broadcast %cst_234 : f32 to vector<1x32xf32>
    %146 = arith.maximumf %144, %145 : vector<1x32xf32>
    %c0_235 = arith.constant 0 : index
    %c0_236 = arith.constant 0 : index
    %147 = vector.load %arg8[%c0_235, %c0_236] : memref<32x10xf32, #tpu.memory_space<vmem>>, vector<32x10xf32>
    %cst_237 = arith.constant dense<0.000000e+00> : vector<1x10xf32>
    %148 = tpu.matmul %146, %147, %cst_237 {dimension_numbers = #tpu.dot_dimension_numbers<[1], [0], [0], [1], [0, 0, 1, 1], [], []>} : vector<1x32xf32>, vector<32x10xf32>, vector<1x10xf32> -> vector<1x10xf32>
    %c0_238 = arith.constant 0 : index
    %c0_239 = arith.constant 0 : index
    %149 = vector.load %arg9[%c0_238, %c0_239] : memref<1x10xf32, #tpu.memory_space<vmem>>, vector<1x10xf32>
    %150 = arith.addf %148, %149 : vector<1x10xf32>
    %cst_240 = arith.constant dense<0xFF800000> : vector<1xf32>
    %151 = vector.multi_reduction <maximumf>, %150, %cst_240 [1] : vector<1x10xf32> to vector<1xf32>
    %152 = vector.shape_cast %151 : vector<1xf32> to vector<1x1xf32>
    %153 = vector.broadcast %152 : vector<1x1xf32> to vector<1x10xf32>
    %154 = arith.subf %150, %153 : vector<1x10xf32>
    %155 = math.exp %154 : vector<1x10xf32>
    %cst_241 = arith.constant dense<0.000000e+00> : vector<1xf32>
    %156 = vector.multi_reduction <add>, %155, %cst_241 [1] : vector<1x10xf32> to vector<1xf32>
    %157 = vector.shape_cast %156 : vector<1xf32> to vector<1x1xf32>
    %158 = math.log %157 : vector<1x1xf32>
    %159 = vector.broadcast %158 : vector<1x1xf32> to vector<1x10xf32>
    %160 = arith.subf %154, %159 : vector<1x10xf32>
    %c0_242 = arith.constant 0 : index
    %c0_243 = arith.constant 0 : index
    %c0_244 = arith.constant 0 : index
    %161 = vector.load %arg10[%c0_242, %c0_243, %c0_244] : memref<1x1x10xf32, #tpu.memory_space<vmem>>, vector<1x1x10xf32>
    %162 = vector.shape_cast %161 : vector<1x1x10xf32> to vector<1x10xf32>
    %163 = vector.shape_cast %160 : vector<1x10xf32> to vector<1x1x10xf32>
    tpu.vector_store %arg10[%c0_242, %c0_243, %c0_244], %163 {strides = array<i32>} : memref<1x1x10xf32, #tpu.memory_space<vmem>>, vector<1x1x10xf32>,
    return
  }
  func.func @transform_0(%arg0: i32) -> (i32, i32, i32, i32) {
    %c0_i32 = arith.constant 0 : i32
    %c0_i32_0 = arith.constant 0 : i32
    %c0_i32_1 = arith.constant 0 : i32
    %c0_i32_2 = arith.constant 0 : i32
    return %arg0, %c0_i32, %c0_i32_0, %c0_i32_1 : i32, i32, i32, i32
  }
  func.func @transform_1(%arg0: i32) -> (i32, i32) {
    %c0_i32 = arith.constant 0 : i32
    %c0_i32_0 = arith.constant 0 : i32
    %c0_i32_1 = arith.constant 0 : i32
    return %c0_i32, %c0_i32_0 : i32, i32
  }
  func.func @transform_2(%arg0: i32) -> (i32, i32) {
    %c0_i32 = arith.constant 0 : i32
    %c0_i32_0 = arith.constant 0 : i32
    %c0_i32_1 = arith.constant 0 : i32
    return %c0_i32, %c0_i32_0 : i32, i32
  }
  func.func @transform_3(%arg0: i32) -> (i32, i32) {
    %c0_i32 = arith.constant 0 : i32
    %c0_i32_0 = arith.constant 0 : i32
    %c0_i32_1 = arith.constant 0 : i32
    return %c0_i32, %c0_i32_0 : i32, i32
  }
  func.func @transform_4(%arg0: i32) -> (i32, i32) {
    %c0_i32 = arith.constant 0 : i32
    %c0_i32_0 = arith.constant 0 : i32
    %c0_i32_1 = arith.constant 0 : i32
    return %c0_i32, %c0_i32_0 : i32, i32
  }
  func.func @transform_5(%arg0: i32) -> (i32, i32) {
    %c0_i32 = arith.constant 0 : i32
    %c0_i32_0 = arith.constant 0 : i32
    %c0_i32_1 = arith.constant 0 : i32
    return %c0_i32, %c0_i32_0 : i32, i32
  }
  func.func @transform_6(%arg0: i32) -> (i32, i32) {
    %c0_i32 = arith.constant 0 : i32
    %c0_i32_0 = arith.constant 0 : i32
    %c0_i32_1 = arith.constant 0 : i32
    return %c0_i32, %c0_i32_0 : i32, i32
  }
  func.func @transform_7(%arg0: i32) -> (i32, i32) {
    %c0_i32 = arith.constant 0 : i32
    %c0_i32_0 = arith.constant 0 : i32
    %c0_i32_1 = arith.constant 0 : i32
    return %c0_i32, %c0_i32_0 : i32, i32
  }
  func.func @transform_8(%arg0: i32) -> (i32, i32) {
    %c0_i32 = arith.constant 0 : i32
    %c0_i32_0 = arith.constant 0 : i32
    %c0_i32_1 = arith.constant 0 : i32
    return %c0_i32, %c0_i32_0 : i32, i32
  }
  func.func @transform_9(%arg0: i32) -> (i32, i32, i32) {
    %c0_i32 = arith.constant 0 : i32
    %c0_i32_0 = arith.constant 0 : i32
    %c0_i32_1 = arith.constant 0 : i32
    return %arg0, %c0_i32, %c0_i32_0 : i32, i32, i32
  }
}

</mosaic_0001>

<bundles_post_ra>
// kernel: forward.1
= control target key start
LH: loop header
LB: loop body
LE: loop exit
PB: predicated region body
PF: predicated region fallthrough
CT: control target
= control target key end

     0   :  { %14 = vsyncpa [#allocation10], 0  ;;  %s5478_s0 = inlined_call_operand.vmem [shape: f32[2,18,18,4], index: 0, kind: input, shape index: {}]   ;;  %s5479_s1 = inlined_call_operand.vmem [shape: f32[36,8], index: 1, kind: input, shape index: {}]   ;;  %s5480_s2 = inlined_call_operand.vmem [shape: f32[1,8], index: 2, kind: input, shape index: {}]   ;;  %s5481_s3 = inlined_call_operand.vmem [shape: f32[72,16], index: 3, kind: input, shape index: {}]   ;;  %s5482_s4 = inlined_call_operand.vmem [shape: f32[1,16], index: 4, kind: input, shape index: {}]   ;;  %s5483_s5 = inlined_call_operand.vmem [shape: f32[256,32], index: 5, kind: input, shape index: {}]   ;;  %s5484_s6 = inlined_call_operand.vmem [shape: f32[1,32], index: 6, kind: input, shape index: {}]   ;;  %s5485_s7 = inlined_call_operand.vmem [shape: f32[32,10], index: 7, kind: input, shape index: {}]   ;;  %s5486_s8 = inlined_call_operand.vmem [shape: f32[1,10], index: 8, kind: input, shape index: {}]   ;;  %s5487_s9 = inlined_call_operand.hbm [shape: f32[2,1,10], index: 9, kind: output, shape index: {}]  }
   0x1   :  { %16 = vsyncpa [#allocation10 + $0x1], 0  ;;  %s3648_s30 = smov 0   ;;  %s3650_s10 = smov 0  }
   0x2   :  { %s3652_s11 = smov 0   ;;  %s3654_s12 = smov 0  }
   0x3 LB: > { %s3669_s13 = sadd.s32 4294967295, %s3580_s12   ;;  %s3204_s14 = sadd.s32 4294967294, %s3580_s12   ;;  %s3580_s12 = sphi %s3654_s12, %s5536_s12   ;;  %s3576_s11 = sphi %s3652_s11, %s5535_s11   ;;  %s3572_s10 = sphi %s3650_s10, %s5534_s10   ;;  %s3568_s30 = sphi %s3648_s30, %s5533_s30  }
   0x4   : > { %s3673_s15 = sadd.s32 1, %s3580_s12   ;;  %s223_s16 = sadd.s32 1, %s3576_s11 }
   0x5   : > { %s220_s17 = ssub.s32 %s3580_s12, %s3673_s15  ;;  %p233_p0 = scmp.ne.s32.totalorder %s3576_s11, %s3572_s10 }
   0x6   : > { %p221_p1 = scmp.eq.s32.totalorder %s220_s17, 0  ;;  %p234_p2 = scmp.eq.s32.totalorder %s3669_s13, 1 }
   0x7   : > { %p239_p3 = scmp.ne.s32.totalorder %s3572_s10, %s3568_s30  ;;  %p240_p4 = scmp.eq.s32.totalorder %s3204_s14, 1 }
   0x8   : > { %s3684_s18 = scalar_select %p221_p1, %s3576_s11, %s223_s16  }
   0x9   : > { %p3686_p5 = por %p234_p2, %p233_p0  ;;  %p3690_p6 = por %p240_p4, %p239_p3 }
   0xa   : > { %p3207_p7 = scmp.ge.s32.totalorder %s3580_s12, 1  ;;  %p290_p8 = scmp.lt.s32.totalorder %s3580_s12, 3 }
   0xc   : > { %p291_p9 = pnand %p3207_p7, %p290_p8 }
   0xd   : > { %p325_p10 = scmp.lt.s32.totalorder (!%p291_p9), %s3669_s13, 1  ;;  %s5488_s26 = smov (!%p291_p9), 4  }
   0xe   : > { %294 = sbr.rel (%p291_p9) target bundleno = 1957 (0x7a5), region = 56  ;;  %s5492_s27 = smov (!%p291_p9), 16  }
   0xf   : > { %s3584_s28 = smov (!%p291_p9), 12   ;;  %s3585_s29 = smov (!%p291_p9), 8  }
  0x10   : > { %s3586_s14 = smov (!%p291_p9), 28   ;;  %s5490_s16 = smov (!%p291_p9), 24  }
  0x11   : > { %s3588_s17 = smov (!%p291_p9), 20   ;;  %s5507_s24 = smov (!%p291_p9), 32  }
  0x12   : > { %s5508_s23 = smov (!%p291_p9), 40  }
  0x13   : > { %s326_s21 = scalar_select %p325_p10, %s3669_s13, 1  ;;  %vm362_vm0 = vcmask 31744   ;;  %vm555_vm1 = vcmask 64544   ;;  %v1977_v61 = vld [vmem:[%s5479_s1 + $0x20] sm:$0xf]  ;;  %vm2079_vm2 = vcmask 1043456  }
  0x14   : > { %3401 = vmatpush.msk.msra.mxu0 %vm2079_vm2, %v1977_v61  ;;  %3445 = vmatpush.msk.msra.mxu2 %vm2079_vm2, %v1977_v61  ;;  %vm748_vm3 = vcmask 97344   ;;  %vm942_vm4 = vcmask 130144   ;;  %vm1135_vm5 = vcmask 162944   ;;  %vm1328_vm6 = vcmask 195744  }
  0x15   : > { %s3455_s22 = smul.u32 432, %s326_s21  ;;  %s5496_s21 = smov 32   ;;  %3446 = vmatpush.msk.msra.mxu3 %vm2079_vm2, %v1977_v61  ;;  %vm1522_vm7 = vcmask 228544   ;;  %vm1715_vm8 = vcmask 261344   ;;  %vm1908_vm9 = vcmask 294144   ;;  %vm1982_vm10 = vcmask 293888  }
  0x16   : > { %vm2196_vm11 = vcmask 64512   ;;  %vm2322_vm12 = vcmask 57344   ;;  %vm2317_vm13 = vcmask 58368   ;;  %vm2408_vm14 = vcmask 130112  }
  0x17   : > { %s3701_s25 = scalar_lea.vmem %s5478_s0, %s3455_s22  ;;  %s5506_s22 = smov 4   ;;  %vm2457_vm15 = vcmask 195712   ;;  %vm2604_vm2 = vcmask 392512  }
  0x18   : > { %v3704_v0 = vld [vmem:[%s3701_s25 + $0x31] sm:$0xff]  ;;  %v397_v1 = vld [vmem:[%s3701_s25 + $0x19] sm:$0xff]  ;;  %v395_v2 = vld [vmem:[%s3701_s25 + $0x1] sm:$0xff] }
  0x19   : > { %467 = vrot.lane.b32.xlu2 %v3704_v0, %s5488_s26  ;;  %463 = vrot.lane.b32.xlu1 %v397_v1, %s5488_s26  ;;  %v3713_v3 = vld [vmem:[%s3701_s25 + $0x39] sm:$0xff]  ;;  %v398_v4 = vld [vmem:[%s3701_s25 + $0x21] sm:$0xff] }
  0x1a   : > { %459 = vrot.lane.b32.xlu0 %v395_v2, %s5488_s26  ;;  %v396_v5 = vld [vmem:[%s3701_s25 + $0x9] sm:$0xff]  ;;  %v3722_v6 = vld [vmem:[%s3701_s25 + $0x61] sm:$0xff]  ;;  %v3725_v7 = vld [vmem:[%s3701_s25 + $0x51] sm:$0xff] }
  0x1b   : > { %v3728_v8 = vld [vmem:[%s3701_s25 + $0x49] sm:$0xff]  ;;  %v3737_v9 = vld [vmem:[%s3701_s25 + $0x81] sm:$0xff]  ;;  %v3740_v10 = vld [vmem:[%s3701_s25 + $0x79] sm:$0xff] }
  0x1c   : > { %v3743_v11 = vld [vmem:[%s3701_s25 + $0x69] sm:$0xff]  ;;  %v408_v13 = vld [vmem:[%s3701_s25 + $0x99] sm:$0xff]  ;;  %v407_v14 = vld [vmem:[%s3701_s25 + $0x91] sm:$0xff] }
  0x1d   : > { %v3752_v12 = vld [vmem:[%s3701_s25 + $0xa9] sm:$0xff]  ;;  %v3764_v16 = vld [vmem:[%s3701_s25 + $0xc1] sm:$0xff]  ;;  %v3767_v17 = vld [vmem:[%s3701_s25 + $0xb1] sm:$0xff] }
  0x1e   : > { %v3761_v15 = vld [vmem:[%s3701_s25 + $0xc9] sm:$0xff]  ;;  %v3209_v18 = vld [vmem:[%s3701_s25 + $0x18] sm:$0xff]  ;;  %v3210_v23 = vld [vmem:[%s3701_s25 + $0x20] sm:$0xff] }
  0x1f   : > { %v588_v19 = vld [vmem:[%s3701_s25 + $0x2] sm:$0xff]  ;;  %v3305_v20 = vld [vmem:[%s3701_s25 + $0x30] sm:$0xff]  ;;  %v3273_v21 = vld [vmem:[%s3701_s25 + $0x1a] sm:$0xff]  ;;  %365 = vst.msk [vmem:[#allocation2 + $0x10] sm:$0xff] %vm362_vm0, %v3209_v18 }
  0x20   : > { %v3306_v22 = vld [vmem:[%s3701_s25 + $0x38] sm:$0xff]  ;;  %367 = vst.msk [vmem:[#allocation2 + $0x20] sm:$0xff] %vm362_vm0, %v3305_v20  ;;  %v589_v24 = vld [vmem:[%s3701_s25 + $0xa] sm:$0xff]  ;;  %v3274_v27 = vld [vmem:[%s3701_s25 + $0x22] sm:$0xff] }
  0x21   : > { %469 = vrot.lane.b32.xlu2 %v3713_v3, %s5488_s26  ;;  %465 = vrot.lane.b32.xlu1 %v398_v4, %s5488_s26  ;;  %368 = vst.msk [vmem:[#allocation2 + $0x28] sm:$0xff] %vm362_vm0, %v3306_v22  ;;  %v3794_v25 = vld [vmem:[%s3701_s25 + $0x32] sm:$0xff]  ;;  %v3799_v26 = vld [vmem:[%s3701_s25 + $0x48] sm:$0xff] }
  0x22   : > { %461 = vrot.lane.b32.xlu0 %v396_v5, %s5488_s26  ;;  %366 = vst.msk [vmem:[#allocation2 + $0x18] sm:$0xff] %vm362_vm0, %v3210_v23  ;;  %v3810_v28 = vld [vmem:[%s3701_s25 + $0x60] sm:$0xff]  ;;  %v3821_v30 = vld [vmem:[%s3701_s25 + $0x50] sm:$0xff]  ;;  %v344_v34 = vld [vmem:[%s3701_s25 + $0xa8] sm:$0xff] }
  0x23   : > { %369 = vst.msk [vmem:[#allocation2 + $0x30] sm:$0xff] %vm362_vm0, %v3799_v26  ;;  %v3815_v29 = vld [vmem:[%s3701_s25 + $0x3a] sm:$0xff]  ;;  %v331_v35 = vld [vmem:[%s3701_s25 + $0x8] sm:$0xff]  ;;  %v3891_v47 = vld [vmem:[%s3701_s25 + $0x90] sm:$0xff] }
  0x24   : > { %371 = vst.msk [vmem:[#allocation2 + $0x40] sm:$0xff] %vm362_vm0, %v3810_v28  ;;  %v3828_v31 = vld [vmem:[%s3701_s25 + $0x80] sm:$0xff]  ;;  %v3844_v36 = vld [vmem:[%s3701_s25 + $0x4a] sm:$0xff]  ;;  %v3864_v40 = vld [vmem:[%s3701_s25 + $0x78] sm:$0xff] }
  0x25   : > { %370 = vst.msk [vmem:[#allocation2 + $0x38] sm:$0xff] %vm362_vm0, %v3821_v30  ;;  %v330_v32 = vld [vmem:[%s3701_s25] sm:$0xff]  ;;  %v3854_v38 = vld [vmem:[%s3701_s25 + $0xc8] sm:$0xff]  ;;  %v3887_v46 = vld [vmem:[%s3701_s25 + $0x98] sm:$0xff] }
  0x26   : > { %374 = vst.msk [vmem:[#allocation2 + $0x58] sm:$0xff] %vm362_vm0, %v3828_v31  ;;  %v3868_v41 = vld [vmem:[%s3701_s25 + $0x68] sm:$0xff]  ;;  %v3875_v42 = vld [vmem:[%s3701_s25 + $0xc0] sm:$0xff]  ;;  %v3895_v48 = vld [vmem:[%s3701_s25 + $0x52] sm:$0xff] }
  0x27   : > { %363 = vst.msk [vmem:[#allocation2] sm:$0xff] %vm362_vm0, %v330_v32  ;;  %v3909_v52 = vld [vmem:[%s3701_s25 + $0xb0] sm:$0xff]  ;;  %v3952_v2 = vld [vmem:[%s3701_s25 + $0x62] sm:$0xff] }
  0x28   : > { %377 = vst.msk [vmem:[#allocation2 + $0x70] sm:$0xff] %vm362_vm0, %v344_v34  ;;  %v3914_v53 = vld [vmem:[%s3701_s25 + $0x92] sm:$0xff]  ;;  %v3935_v60 = vld [vmem:[%s3701_s25 + $0xaa] sm:$0xff]  ;;  %v4084_v61 = vld [vmem:[%s3701_s25 + $0x122] sm:$0xff] }
  0x29   : > { %475 = vrot.lane.b32.xlu2 %v3722_v6, %s5488_s26  ;;  %473 = vrot.lane.b32.xlu1 %v3725_v7, %s5488_s26  ;;  %364 = vst.msk [vmem:[#allocation2 + $0x8] sm:$0xff] %vm362_vm0, %v331_v35  ;;  %v4023_v35 = vld [vmem:[%s3701_s25 + $0xca] sm:$0xff] }
  0x2a   : > { %471 = vrot.lane.b32.xlu0 %v3728_v8, %s5488_s26  ;;  %380 = vst.msk [vmem:[#allocation2 + $0x88] sm:$0xff] %vm362_vm0, %v3854_v38 }
  0x2b   : > { %373 = vst.msk [vmem:[#allocation2 + $0x50] sm:$0xff] %vm362_vm0, %v3864_v40 }
  0x2c   : > { %372 = vst.msk [vmem:[#allocation2 + $0x48] sm:$0xff] %vm362_vm0, %v3868_v41 }
  0x2d   : > { %379 = vst.msk [vmem:[#allocation2 + $0x80] sm:$0xff] %vm362_vm0, %v3875_v42 }
  0x2e   : > { %376 = vst.msk [vmem:[#allocation2 + $0x68] sm:$0xff] %vm362_vm0, %v3887_v46 }
  0x2f   : > { %375 = vst.msk [vmem:[#allocation2 + $0x60] sm:$0xff] %vm362_vm0, %v3891_v47 }
  0x30   : > { %378 = vst.msk [vmem:[#allocation2 + $0x78] sm:$0xff] %vm362_vm0, %v3909_v52 }
  0x31   : > { %481 = vrot.lane.b32.xlu2 %v3737_v9, %s5488_s26  ;;  %479 = vrot.lane.b32.xlu1 %v3740_v10, %s5488_s26 }
  0x32   : > { %477 = vrot.lane.b32.xlu0 %v3743_v11, %s5488_s26 }
  0x39   : > { %487 = vrot.lane.b32.xlu2 %v3752_v12, %s5488_s26  ;;  %485 = vrot.lane.b32.xlu1 %v408_v13, %s5488_s26 }
  0x3a   : > { %483 = vrot.lane.b32.xlu0 %v407_v14, %s5488_s26  ;;  %v3972_v14 = vld [vmem:[%s3701_s25 + $0x9a] sm:$0xff] }
  0x41   : > { %493 = vrot.lane.b32.xlu2 %v3761_v15, %s5488_s26  ;;  %491 = vrot.lane.b32.xlu1 %v3764_v16, %s5488_s26 }
  0x42   : > { %489 = vrot.lane.b32.xlu0 %v3767_v17, %s5488_s26 }
  0x49   : > { %1039 = vrot.lane.b32.xlu2 %v397_v1, %s5492_s27  ;;  %846 = vrot.lane.b32.xlu1 %v3209_v18, %s3584_s28  ;;  %v1976_v1 = vld [vmem:[%s5479_s1 + $0x18] sm:$0xff]  ;;  %v3975_v18 = vld [vmem:[%s3701_s25 + $0xc2] sm:$0xff] }
  0x4a   : > { %652 = vrot.lane.b32.xlu0 %v588_v19, %s3585_s29  ;;  %2095 = vmatpush.msra.mxu0 %v1976_v1 }
  0x4b   : > { %3447 = vmatpush.msra.mxu2 %v1976_v1  ;;  %3448 = vmatpush.msra.mxu3 %v1976_v1  ;;  %v4096_v1 = vld [vmem:[%s3701_s25 + $0xd9] sm:$0xff] }
  0x51   : > { %1619 = vrot.lane.b32.xlu2 %v3704_v0, %s3586_s14  ;;  %1426 = vrot.lane.b32.xlu1 %v3305_v20, %s5490_s16 }
  0x52   : > { %1232 = vrot.lane.b32.xlu0 %v3273_v21, %s3588_s17 }
  0x59   : > { %848 = vrot.lane.b32.xlu2 %v3210_v23, %s3584_s28  ;;  %654 = vrot.lane.b32.xlu1 %v589_v24, %s3585_s29 }
  0x5a   : > { %1812 = vrot.lane.b32.xlu0 %v3794_v25, %s5496_s21 }
  0x61   : > { %1428 = vrot.lane.b32.xlu2 %v3306_v22, %s5490_s16  ;;  %1234 = vrot.lane.b32.xlu1 %v3274_v27, %s3588_s17 }
  0x62   : > { %1041 = vrot.lane.b32.xlu0 %v398_v4, %s5492_s27  ;;  %v1974_v4 = vld [vmem:[%s5479_s1 + $0x8] sm:$0xff] }
  0x69   : > { %656 = vrot.lane.b32.xlu2 %v3273_v21, %s3585_s29  ;;  %1814 = vrot.lane.b32.xlu1 %v3815_v29, %s5496_s21 }
  0x6a   : > { %1621 = vrot.lane.b32.xlu0 %v3713_v3, %s3586_s14 }
  0x71   : > { %1236 = vrot.lane.b32.xlu2 %v3794_v25, %s3588_s17  ;;  %1043 = vrot.lane.b32.xlu1 %v3704_v0, %s5492_s27 }
  0x72   : > { %850 = vrot.lane.b32.xlu0 %v3305_v20, %s3584_s28 }
  0x73   : > { %v468_v33 = vpop.permute.xlu2 %467 }
  0x74   : > { %560 = vst.msk [vmem:[#allocation2 + $0x20] sm:$0xff] %vm555_vm1, %v468_v33 }
  0x79   : > { %1816 = vrot.lane.b32.xlu2 %v3844_v36, %s5496_s21  ;;  %1623 = vrot.lane.b32.xlu1 %v3728_v8, %s3586_s14 }
  0x7a   : > { %1430 = vrot.lane.b32.xlu0 %v3799_v26, %s5490_s16 }
  0x7b   : > { %v470_v37 = vpop.permute.xlu2 %469 }
  0x7c   : > { %561 = vst.msk [vmem:[#allocation2 + $0x28] sm:$0xff] %vm555_vm1, %v470_v37 }
  0x81   : > { %1045 = vrot.lane.b32.xlu2 %v3713_v3, %s5492_s27  ;;  %852 = vrot.lane.b32.xlu1 %v3306_v22, %s3584_s28  ;;  %v1975_v3 = vld [vmem:[%s5479_s1 + $0x10] sm:$0xff] }
  0x82   : > { %658 = vrot.lane.b32.xlu0 %v3274_v27, %s3585_s29  ;;  %2096 = vmatpush.msra.mxu0 %v1975_v3 }
  0x83   : > { %v476_v39 = vpop.permute.xlu2 %475  ;;  %3449 = vmatpush.msra.mxu2 %v1975_v3  ;;  %3450 = vmatpush.msra.mxu3 %v1975_v3  ;;  %v4099_v3 = vld [vmem:[%s3701_s25 + $0x7a] sm:$0xff] }
  0x84   : > { %564 = vst.msk [vmem:[#allocation2 + $0x40] sm:$0xff] %vm555_vm1, %v476_v39  ;;  %2097 = vmatpush.msra.mxu0 %v1974_v4 }
  0x85   : > { %3451 = vmatpush.msra.mxu2 %v1974_v4  ;;  %3452 = vmatpush.msra.mxu3 %v1974_v4  ;;  %v4102_v4 = vld [vmem:[%s3701_s25 + $0x138] sm:$0xff] }
  0x89   : > { %1625 = vrot.lane.b32.xlu2 %v3725_v7, %s3586_s14  ;;  %1432 = vrot.lane.b32.xlu1 %v3821_v30, %s5490_s16 }
  0x8a   : > { %1238 = vrot.lane.b32.xlu0 %v3815_v29, %s3588_s17 }
  0x8b   : > { %v482_v43 = vpop.permute.xlu2 %481  ;;  %v464_v44 = vpop.permute.xlu1 %463 }
  0x8c   : > { %567 = vst.msk [vmem:[#allocation2 + $0x58] sm:$0xff] %vm555_vm1, %v482_v43  ;;  %v460_v45 = vpop.permute.xlu0 %459 }
  0x8d   : > { %558 = vst.msk [vmem:[#allocation2 + $0x10] sm:$0xff] %vm555_vm1, %v464_v44  ;;  %v4035_v44 = vld [vmem:[%s3701_s25 + $0x109] sm:$0xff] }
  0x8e   : > { %556 = vst.msk [vmem:[#allocation2] sm:$0xff] %vm555_vm1, %v460_v45 }
  0x91   : > { %854 = vrot.lane.b32.xlu2 %v3799_v26, %s3584_s28  ;;  %660 = vrot.lane.b32.xlu1 %v3794_v25, %s3585_s29  ;;  %v3996_v25 = vld [vmem:[%s3701_s25 + $0xb2] sm:$0xff] }
  0x92   : > { %1818 = vrot.lane.b32.xlu0 %v3895_v48, %s5496_s21 }
  0x93   : > { %v488_v49 = vpop.permute.xlu2 %487  ;;  %v466_v50 = vpop.permute.xlu1 %465 }
  0x94   : > { %570 = vst.msk [vmem:[#allocation2 + $0x70] sm:$0xff] %vm555_vm1, %v488_v49  ;;  %v462_v51 = vpop.permute.xlu0 %461 }
  0x95   : > { %559 = vst.msk [vmem:[#allocation2 + $0x18] sm:$0xff] %vm555_vm1, %v466_v50 }
  0x96   : > { %557 = vst.msk [vmem:[#allocation2 + $0x8] sm:$0xff] %vm555_vm1, %v462_v51  ;;  %v4048_v51 = vld [vmem:[%s3701_s25 + $0x10a] sm:$0xff] }
  0x99   : > { %870 = vrot.lane.b32.xlu2 %v344_v34, %s3584_s28  ;;  %1047 = vrot.lane.b32.xlu1 %v3728_v8, %s5492_s27 }
  0x9a   : > { %676 = vrot.lane.b32.xlu0 %v3914_v53, %s3585_s29 }
  0x9b   : > { %v494_v54 = vpop.permute.xlu2 %493  ;;  %v474_v55 = vpop.permute.xlu1 %473 }
  0x9c   : > { %573 = vst.msk [vmem:[#allocation2 + $0x88] sm:$0xff] %vm555_vm1, %v494_v54  ;;  %v472_v56 = vpop.permute.xlu0 %471 }
  0x9d   : > { %563 = vst.msk [vmem:[#allocation2 + $0x38] sm:$0xff] %vm555_vm1, %v474_v55 }
  0x9e   : > { %562 = vst.msk [vmem:[#allocation2 + $0x30] sm:$0xff] %vm555_vm1, %v472_v56 }
  0xa1   : > { %1434 = vrot.lane.b32.xlu2 %v3810_v28, %s5490_s16  ;;  %1063 = vrot.lane.b32.xlu1 %v3752_v12, %s5492_s27  ;;  %v1973_v12 = vld [vmem:[%s5479_s1] sm:$0xff]  ;;  %s5504_s27 = smov 16  }
  0xa2   : > { %1240 = vrot.lane.b32.xlu0 %v3844_v36, %s3588_s17  ;;  %2098 = vmatpush.msra.mxu0 %v1973_v12 }
  0xa3   : > { %v1040_v57 = vpop.permute.xlu2 %1039  ;;  %v480_v58 = vpop.permute.xlu1 %479  ;;  %3453 = vmatpush.msra.mxu2 %v1973_v12  ;;  %3454 = vmatpush.msra.mxu3 %v1973_v12 }
  0xa4   : > { %566 = vst.msk [vmem:[#allocation2 + $0x50] sm:$0xff] %vm555_vm1, %v480_v58  ;;  %v478_v59 = vpop.permute.xlu0 %477 }
  0xa5   : > { %565 = vst.msk [vmem:[#allocation2 + $0x48] sm:$0xff] %vm555_vm1, %v478_v59 }
  0xa9   : > { %1450 = vrot.lane.b32.xlu2 %v3875_v42, %s5490_s16  ;;  %1627 = vrot.lane.b32.xlu1 %v3722_v6, %s3586_s14  ;;  %s5505_s16 = smov 24  }
  0xaa   : > { %1256 = vrot.lane.b32.xlu0 %v3935_v60, %s3588_s17 }
  0xab   : > { %v1620_v62 = vpop.permute.xlu2 %1619  ;;  %v486_v63 = vpop.permute.xlu1 %485 }
  0xac   : > { %569 = vst.msk [vmem:[#allocation2 + $0x68] sm:$0xff] %vm555_vm1, %v486_v63  ;;  %v484_v0 = vpop.permute.xlu0 %483 }
  0xad   : > { %568 = vst.msk [vmem:[#allocation2 + $0x60] sm:$0xff] %vm555_vm1, %v484_v0 }
  0xb1   : > { %662 = vrot.lane.b32.xlu2 %v3815_v29, %s3585_s29  ;;  %1643 = vrot.lane.b32.xlu1 %v3764_v16, %s3586_s14  ;;  %v4009_v29 = vld [vmem:[%s3701_s25 + $0x6a] sm:$0xff] }
  0xb2   : > { %1820 = vrot.lane.b32.xlu0 %v3952_v2, %s5496_s21 }
  0xb3   : > { %v849_v5 = vpop.permute.xlu2 %848  ;;  %v492_v8 = vpop.permute.xlu1 %491 }
  0xb4   : > { %572 = vst.msk [vmem:[#allocation2 + $0x80] sm:$0xff] %vm555_vm1, %v492_v8  ;;  %v490_v13 = vpop.permute.xlu0 %489 }
  0xb5   : > { %571 = vst.msk [vmem:[#allocation2 + $0x78] sm:$0xff] %vm555_vm1, %v490_v13 }
  0xb9   : > { %678 = vrot.lane.b32.xlu2 %v3972_v14, %s3585_s29  ;;  %856 = vrot.lane.b32.xlu1 %v3821_v30, %s3584_s28 }
  0xba   : > { %1836 = vrot.lane.b32.xlu0 %v3975_v18, %s5496_s21 }
  0xbb   : > { %v1429_v19 = vpop.permute.xlu2 %1428  ;;  %v847_v20 = vpop.permute.xlu1 %846 }
  0xbc   : > { %v653_v21 = vpop.permute.xlu0 %652 }
  0xbd   : > { %749 = vst.msk [vmem:[#allocation2] sm:$0xff] %vm748_vm3, %v653_v21  ;;  %v4121_v21 = vld [vmem:[%s3701_s25 + $0x139] sm:$0xff] }
  0xbe   : > { %943 = vst.msk [vmem:[#allocation2] sm:$0xff] %vm942_vm4, %v847_v20  ;;  %v4117_v20 = vld [vmem:[%s3701_s25 + $0xda] sm:$0xff] }
  0xbf   : > { %1136 = vst.msk [vmem:[#allocation2] sm:$0xff] %vm1135_vm5, %v1040_v57  ;;  %v4068_v57 = vld [vmem:[%s3701_s25 + $0x121] sm:$0xff] }
  0xc1   : > { %1242 = vrot.lane.b32.xlu2 %v3895_v48, %s3588_s17  ;;  %872 = vrot.lane.b32.xlu1 %v3909_v52, %s3584_s28 }
  0xc2   : > { %1049 = vrot.lane.b32.xlu0 %v3725_v7, %s5504_s27 }
  0xc3   : > { %v657_v22 = vpop.permute.xlu2 %656  ;;  %v1427_v23 = vpop.permute.xlu1 %1426 }
  0xc4   : > { %751 = vst.msk [vmem:[#allocation2 + $0x10] sm:$0xff] %vm748_vm3, %v657_v22  ;;  %v1233_v24 = vpop.permute.xlu0 %1232 }
  0xc5   : > { %1329 = vst.msk [vmem:[#allocation2] sm:$0xff] %vm1328_vm6, %v1233_v24 }
  0xc6   : > { %1523 = vst.msk [vmem:[#allocation2] sm:$0xff] %vm1522_vm7, %v1427_v23 }
  0xc7   : > { %1716 = vst.msk [vmem:[#allocation2] sm:$0xff] %vm1715_vm8, %v1620_v62 }
  0xc9   : > { %1258 = vrot.lane.b32.xlu2 %v3996_v25, %s3588_s17  ;;  %1436 = vrot.lane.b32.xlu1 %v3868_v41, %s5505_s16 }
  0xca   : > { %1065 = vrot.lane.b32.xlu0 %v3767_v17, %s5504_s27  ;;  %v3231_v17 = vld [vmem:[%s3701_s25 + $0x120] sm:$0xff] }
  0xcb   : > { %v1237_v7 = vpop.permute.xlu2 %1236  ;;  %v655_v26 = vpop.permute.xlu1 %654  ;;  %387 = vst.msk [vmem:[#allocation2 + $0xc0] sm:$0xff] %vm362_vm0, %v3231_v17 }
  0xcc   : > { %750 = vst.msk [vmem:[#allocation2 + $0x8] sm:$0xff] %vm748_vm3, %v655_v26  ;;  %v1813_v27 = vpop.permute.xlu0 %1812  ;;  %v4135_v26 = vld [vmem:[%s3701_s25 + $0x13a] sm:$0xff] }
  0xcd   : > { %944 = vst.msk [vmem:[#allocation2 + $0x8] sm:$0xff] %vm942_vm4, %v849_v5  ;;  %v3232_v5 = vld [vmem:[%s3701_s25 + $0x128] sm:$0xff] }
  0xce   : > { %1909 = vst.msk [vmem:[#allocation2] sm:$0xff] %vm1908_vm9, %v1813_v27 }
  0xcf   : > { %388 = vst.msk [vmem:[#allocation2 + $0xc8] sm:$0xff] %vm362_vm0, %v3232_v5 }
  0xd1   : > { %1822 = vrot.lane.b32.xlu2 %v4009_v29, %s5496_s21  ;;  %1452 = vrot.lane.b32.xlu1 %v3854_v38, %s5505_s16 }
  0xd2   : > { %1629 = vrot.lane.b32.xlu0 %v3743_v11, %s3586_s14 }
  0xd3   : > { %v1817_v30 = vpop.permute.xlu2 %1816  ;;  %v1235_v32 = vpop.permute.xlu1 %1234 }
  0xd4   : > { %v1042_v33 = vpop.permute.xlu0 %1041 }
  0xd5   : > { %1137 = vst.msk [vmem:[#allocation2 + $0x8] sm:$0xff] %vm1135_vm5, %v1042_v33  ;;  %v1941_v34 = vld [vmem:[#allocation2] sm:$0xff] }
  0xd6   : > { %1330 = vst.msk [vmem:[#allocation2 + $0x8] sm:$0xff] %vm1328_vm6, %v1235_v32  ;;  %3402 = vmatmul.msk.f32.vlgmr.msra.gmra.mxu0 %vm1982_vm10, %v1941_v34 }
  0xd7   : > { %1524 = vst.msk [vmem:[#allocation2 + $0x8] sm:$0xff] %vm1522_vm7, %v1429_v19 }
  0xd9   : > { %1838 = vrot.lane.b32.xlu2 %v4023_v35, %s5496_s21  ;;  %664 = vrot.lane.b32.xlu1 %v3844_v36, %s3585_s29 }
  0xda   : > { %1645 = vrot.lane.b32.xlu0 %v3761_v15, %s3586_s14 }
  0xdb   : > { %v1046_v37 = vpop.permute.xlu2 %1045  ;;  %v1815_v39 = vpop.permute.xlu1 %1814 }
  0xdc   : > { %v1622_v43 = vpop.permute.xlu0 %1621 }
  0xdd   : > { %1717 = vst.msk [vmem:[#allocation2 + $0x8] sm:$0xff] %vm1715_vm8, %v1622_v43 }
  0xde   : > { %1910 = vst.msk [vmem:[#allocation2 + $0x8] sm:$0xff] %vm1908_vm9, %v1815_v39  ;;  %v4162_v39 = vld [vmem:[%s3701_s25 + $0x129] sm:$0xff] }
  0xe1   : > { %680 = vrot.lane.b32.xlu2 %v3935_v60, %s3585_s29  ;;  %858 = vrot.lane.b32.xlu1 %v3810_v28, %s3584_s28  ;;  %v4080_v60 = vld [vmem:[%s3701_s25 + $0xd8] sm:$0xff] }
  0xe2   : > { %503 = vrot.lane.b32.xlu0 %v4035_v44, %s5506_s22 }
  0xe3   : > { %v1626_v36 = vpop.permute.xlu2 %1625  ;;  %v1044_v45 = vpop.permute.xlu1 %1043 }
  0xe4   : > { %v851_v49 = vpop.permute.xlu0 %850 }
  0xe5   : > { %945 = vst.msk [vmem:[#allocation2 + $0x10] sm:$0xff] %vm942_vm4, %v851_v49  ;;  %v1942_v50 = vld [vmem:[#allocation2 + $0x8] sm:$0xff] }
  0xe6   : > { %1138 = vst.msk [vmem:[#allocation2 + $0x10] sm:$0xff] %vm1135_vm5, %v1044_v45  ;;  %3403 = vmatmul.msk.f32.gmra.mxu0 %vm1982_vm10, %v1942_v50  ;;  %v4172_v49 = vld [vmem:[%s3701_s25 + $0x108] sm:$0xff] }
  0xe7   : > { %1331 = vst.msk [vmem:[#allocation2 + $0x10] sm:$0xff] %vm1328_vm6, %v1237_v7  ;;  %v418_v7 = vld [vmem:[%s3701_s25 + $0x111] sm:$0xff] }
  0xe8   : > { %v4178_v50 = vld [vmem:[%s3701_s25 + $0x12a] sm:$0xff]  ;;  %385 = vst.msk [vmem:[#allocation2 + $0xb0] sm:$0xff] %vm362_vm0, %v4172_v49 }
  0xe9   : > { %874 = vrot.lane.b32.xlu2 %v3875_v42, %s3584_s28  ;;  %1051 = vrot.lane.b32.xlu1 %v3722_v6, %s5504_s27 }
  0xea   : > { %696 = vrot.lane.b32.xlu0 %v4048_v51, %s3585_s29 }
  0xeb   : > { %v855_v28 = vpop.permute.xlu2 %854  ;;  %v1624_v52 = vpop.permute.xlu1 %1623 }
  0xec   : > { %v1431_v54 = vpop.permute.xlu0 %1430 }
  0xed   : > { %1525 = vst.msk [vmem:[#allocation2 + $0x10] sm:$0xff] %vm1522_vm7, %v1431_v54  ;;  %v4192_v54 = vld [vmem:[%s3701_s25 + $0x82] sm:$0xff] }
  0xee   : > { %1718 = vst.msk [vmem:[#allocation2 + $0x10] sm:$0xff] %vm1715_vm8, %v1624_v52 }
  0xef   : > { %1911 = vst.msk [vmem:[#allocation2 + $0x10] sm:$0xff] %vm1908_vm9, %v1817_v30  ;;  %v611_v30 = vld [vmem:[%s3701_s25 + $0x112] sm:$0xff] }
  0xf1   : > { %1067 = vrot.lane.b32.xlu2 %v3764_v16, %s5504_s27  ;;  %1244 = vrot.lane.b32.xlu1 %v3952_v2, %s3588_s17 }
  0xf2   : > { %890 = vrot.lane.b32.xlu0 %v3231_v17, %s3584_s28 }
  0xf3   : > { %v871_v6 = vpop.permute.xlu2 %870  ;;  %v853_v42 = vpop.permute.xlu1 %852 }
  0xf4   : > { %v659_v55 = vpop.permute.xlu0 %658 }
  0xf5   : > { %752 = vst.msk [vmem:[#allocation2 + $0x18] sm:$0xff] %vm748_vm3, %v659_v55 }
  0xf6   : > { %946 = vst.msk [vmem:[#allocation2 + $0x18] sm:$0xff] %vm942_vm4, %v853_v42  ;;  %v1943_v56 = vld [vmem:[#allocation2 + $0x10] sm:$0xff] }
  0xf7   : > { %1139 = vst.msk [vmem:[#allocation2 + $0x18] sm:$0xff] %vm1135_vm5, %v1046_v37  ;;  %3404 = vmatmul.msk.f32.gmra.mxu0 %vm1982_vm10, %v1943_v56 }
  0xf9   : > { %1260 = vrot.lane.b32.xlu2 %v3975_v18, %s3588_s17  ;;  %1438 = vrot.lane.b32.xlu1 %v3864_v40, %s5505_s16 }
  0xfa   : > { %1083 = vrot.lane.b32.xlu0 %v4068_v57, %s5504_s27 }
  0xfb   : > { %v1435_v16 = vpop.permute.xlu2 %1434  ;;  %v1433_v58 = vpop.permute.xlu1 %1432 }
  0xfc   : > { %v1239_v59 = vpop.permute.xlu0 %1238 }
  0xfd   : > { %1332 = vst.msk [vmem:[#allocation2 + $0x18] sm:$0xff] %vm1328_vm6, %v1239_v59 }
  0xfe   : > { %1526 = vst.msk [vmem:[#allocation2 + $0x18] sm:$0xff] %vm1522_vm7, %v1433_v58  ;;  %v4215_v58 = vld [vmem:[%s3701_s25 + $0xe1] sm:$0xff] }
  0xff   : > { %1719 = vst.msk [vmem:[#allocation2 + $0x18] sm:$0xff] %vm1715_vm8, %v1626_v36 }
 0x101   : > { %1454 = vrot.lane.b32.xlu2 %v4080_v60, %s5505_s16  ;;  %1631 = vrot.lane.b32.xlu1 %v3740_v10, %s3586_s14 }
 0x102   : > { %1276 = vrot.lane.b32.xlu0 %v4084_v61, %s3588_s17 }
 0x103   : > { %v1451_v62 = vpop.permute.xlu2 %1450  ;;  %v661_v63 = vpop.permute.xlu1 %660 }
 0x104   : > { %753 = vst.msk [vmem:[#allocation2 + $0x20] sm:$0xff] %vm748_vm3, %v661_v63  ;;  %v1819_v0 = vpop.permute.xlu0 %1818 }
 0x105   : > { %947 = vst.msk [vmem:[#allocation2 + $0x20] sm:$0xff] %vm942_vm4, %v855_v28 }
 0x106   : > { %1912 = vst.msk [vmem:[#allocation2 + $0x18] sm:$0xff] %vm1908_vm9, %v1819_v0 }
 0x109   : > { %1647 = vrot.lane.b32.xlu2 %v4096_v1, %s3586_s14  ;;  %1824 = vrot.lane.b32.xlu1 %v4099_v3, %s5496_s21 }
 0x10a   : > { %1470 = vrot.lane.b32.xlu0 %v4102_v4, %s5505_s16 }
 0x10b   : > { %v663_v8 = vpop.permute.xlu2 %662  ;;  %v1048_v12 = vpop.permute.xlu1 %1047 }
 0x10c   : > { %754 = vst.msk [vmem:[#allocation2 + $0x28] sm:$0xff] %vm748_vm3, %v663_v8  ;;  %v677_v13 = vpop.permute.xlu0 %676  ;;  %v4237_v8 = vld [vmem:[%s5480_s2] ss:$0 sm:$0xff] }
 0x10d   : > { %1140 = vst.msk [vmem:[#allocation2 + $0x20] sm:$0xff] %vm1135_vm5, %v1048_v12  ;;  %v1944_v19 = vld [vmem:[#allocation2 + $0x18] sm:$0xff] }
 0x10e   : > { %761 = vst.msk [vmem:[#allocation2 + $0x60] sm:$0xff] %vm748_vm3, %v677_v13  ;;  %3405 = vmatmul.msk.f32.gmra.mxu0 %vm1982_vm10, %v1944_v19 }
 0x10f   : > { %955 = vst.msk [vmem:[#allocation2 + $0x60] sm:$0xff] %vm942_vm4, %v871_v6  ;;  %v4199_v6 = vld [vmem:[%s3701_s25 + $0xe0] sm:$0xff] }
 0x111   : > { %1840 = vrot.lane.b32.xlu2 %v4117_v20, %s5496_s21  ;;  %666 = vrot.lane.b32.xlu1 %v3895_v48, %s3585_s29 }
 0x112   : > { %1663 = vrot.lane.b32.xlu0 %v4121_v21, %s3586_s14 }
 0x113   : > { %v679_v22 = vpop.permute.xlu2 %678  ;;  %v1064_v23 = vpop.permute.xlu1 %1063 }
 0x114   : > { %762 = vst.msk [vmem:[#allocation2 + $0x68] sm:$0xff] %vm748_vm3, %v679_v22  ;;  %v1241_v24 = vpop.permute.xlu0 %1240 }
 0x115   : > { %1148 = vst.msk [vmem:[#allocation2 + $0x60] sm:$0xff] %vm1135_vm5, %v1064_v23 }
 0x116   : > { %1333 = vst.msk [vmem:[#allocation2 + $0x20] sm:$0xff] %vm1328_vm6, %v1241_v24 }
 0x117   : > { %1527 = vst.msk [vmem:[#allocation2 + $0x20] sm:$0xff] %vm1522_vm7, %v1435_v16  ;;  %v4211_v16 = vld [vmem:[%s3701_s25 + $0x141] sm:$0xff] }
 0x119   : > { %860 = vrot.lane.b32.xlu2 %v3868_v41, %s3584_s28  ;;  %505 = vrot.lane.b32.xlu1 %v418_v7, %s5506_s22 }
 0x11a   : > { %1856 = vrot.lane.b32.xlu0 %v4135_v26, %s5496_s21 }
 0x11b   : > { %v1243_v48 = vpop.permute.xlu2 %1242  ;;  %v1628_v27 = vpop.permute.xlu1 %1627 }
 0x11c   : > { %1720 = vst.msk [vmem:[#allocation2 + $0x20] sm:$0xff] %vm1715_vm8, %v1628_v27  ;;  %v1257_v17 = vpop.permute.xlu0 %1256 }
 0x11d   : > { %1341 = vst.msk [vmem:[#allocation2 + $0x60] sm:$0xff] %vm1328_vm6, %v1257_v17 }
 0x11e   : > { %1535 = vst.msk [vmem:[#allocation2 + $0x60] sm:$0xff] %vm1522_vm7, %v1451_v62 }
 0x121   : > { %1053 = vrot.lane.b32.xlu2 %v3743_v11, %s5504_s27  ;;  %698 = vrot.lane.b32.xlu1 %v611_v30, %s3585_s29 }
 0x122   : > { %682 = vrot.lane.b32.xlu0 %v3996_v25, %s3585_s29 }
 0x123   : > { %v1259_v41 = vpop.permute.xlu2 %1258  ;;  %v1644_v32 = vpop.permute.xlu1 %1643 }
 0x124   : > { %1728 = vst.msk [vmem:[#allocation2 + $0x60] sm:$0xff] %vm1715_vm8, %v1644_v32  ;;  %v1821_v33 = vpop.permute.xlu0 %1820 }
 0x125   : > { %1913 = vst.msk [vmem:[#allocation2 + $0x20] sm:$0xff] %vm1908_vm9, %v1821_v33  ;;  %v4287_v33 = vld [vmem:[%s3701_s25 + $0x110] sm:$0xff] }
 0x126   : > { %386 = vst.msk [vmem:[#allocation2 + $0xb8] sm:$0xff] %vm362_vm0, %v4287_v33 }
 0x129   : > { %1246 = vrot.lane.b32.xlu2 %v4009_v29, %s3588_s17  ;;  %892 = vrot.lane.b32.xlu1 %v3232_v5, %s3584_s28  ;;  %v4227_v5 = vld [vmem:[%s3701_s25 + $0x142] sm:$0xff] }
 0x12a   : > { %876 = vrot.lane.b32.xlu0 %v3854_v38, %s3584_s28 }
 0x12b   : > { %v1823_v11 = vpop.permute.xlu2 %1822  ;;  %v857_v34 = vpop.permute.xlu1 %856 }
 0x12c   : > { %948 = vst.msk [vmem:[#allocation2 + $0x28] sm:$0xff] %vm942_vm4, %v857_v34  ;;  %v1837_v25 = vpop.permute.xlu0 %1836  ;;  %v1945_v37 = vld [vmem:[#allocation2 + $0x20] sm:$0xff] }
 0x12d   : > { %1921 = vst.msk [vmem:[#allocation2 + $0x60] sm:$0xff] %vm1908_vm9, %v1837_v25  ;;  %3406 = vmatmul.msk.f32.gmra.mxu0 %vm1982_vm10, %v1945_v37  ;;  %v4293_v25 = vld [vmem:[%s3701_s25 + $0x150] sm:$0xff] }
 0x12e   : > { %v4296_v37 = vld [vmem:[%s3701_s25 + $0xf0] sm:$0xff] }
 0x131   : > { %1440 = vrot.lane.b32.xlu2 %v3828_v31, %s5505_s16  ;;  %1085 = vrot.lane.b32.xlu1 %v4162_v39, %s5504_s27 }
 0x132   : > { %1069 = vrot.lane.b32.xlu0 %v3761_v15, %s5504_s27 }
 0x133   : > { %v1839_v38 = vpop.permute.xlu2 %1838  ;;  %v873_v43 = vpop.permute.xlu1 %872 }
 0x134   : > { %956 = vst.msk [vmem:[#allocation2 + $0x68] sm:$0xff] %vm942_vm4, %v873_v43  ;;  %v1050_v36 = vpop.permute.xlu0 %1049  ;;  %v1953_v45 = vld [vmem:[#allocation2 + $0x60] sm:$0xff] }
 0x135   : > { %1141 = vst.msk [vmem:[#allocation2 + $0x28] sm:$0xff] %vm1135_vm5, %v1050_v36  ;;  %3414 = vmatmul.msk.f32.vlgmr.msra.gmra.mxu2 %vm1982_vm10, %v1953_v45 }
 0x136   : > { %1334 = vst.msk [vmem:[#allocation2 + $0x28] sm:$0xff] %vm1328_vm6, %v1243_v48 }
 0x139   : > { %1633 = vrot.lane.b32.xlu2 %v3737_v9, %s3586_s14  ;;  %1278 = vrot.lane.b32.xlu1 %v4178_v50, %s3588_s17  ;;  %v4195_v9 = vld [vmem:[%s3701_s25 + $0x140] sm:$0xff] }
 0x13a   : > { %1262 = vrot.lane.b32.xlu0 %v4023_v35, %s3588_s17 }
 0x13b   : > { %v681_v15 = vpop.permute.xlu2 %680  ;;  %v1437_v28 = vpop.permute.xlu1 %1436 }
 0x13c   : > { %763 = vst.msk [vmem:[#allocation2 + $0x70] sm:$0xff] %vm748_vm3, %v681_v15  ;;  %v1066_v52 = vpop.permute.xlu0 %1065  ;;  %v3590_v15 = vmov 0.0  }
 0x13d   : > { %1528 = vst.msk [vmem:[#allocation2 + $0x28] sm:$0xff] %vm1522_vm7, %v1437_v28  ;;  %v4316_v28 = vld [vmem:[%s3701_s25 + $0x151] sm:$0xff] }
 0x13e   : > { %1149 = vst.msk [vmem:[#allocation2 + $0x68] sm:$0xff] %vm1135_vm5, %v1066_v52  ;;  %v4319_v52 = vld [vmem:[%s3701_s25 + $0xf1] sm:$0xff] }
 0x13f   : > { %1342 = vst.msk [vmem:[#allocation2 + $0x68] sm:$0xff] %vm1328_vm6, %v1259_v41 }
 0x140   : > { %2316 = vst.msk [vmem:[#allocation6] sm:$0xff] %vm2196_vm11, %v3590_v15 }
 0x141   : > { %1826 = vrot.lane.b32.xlu2 %v4192_v54, %s5496_s21  ;;  %1472 = vrot.lane.b32.xlu1 %v4195_v9, %s5505_s16  ;;  %2320 = vst.msk [vmem:[#allocation6 + $0x90] sm:$0xff] %vm2196_vm11, %v3590_v15 }
 0x142   : > { %1456 = vrot.lane.b32.xlu0 %v4199_v6, %s5505_s16  ;;  %2323 = vst.msk [vmem:[#allocation6] sm:$0x1] %vm2322_vm12, %v3590_v15 }
 0x143   : > { %v875_v42 = vpop.permute.xlu2 %874  ;;  %v1453_v55 = vpop.permute.xlu1 %1452  ;;  %2324 = vst.msk [vmem:[#allocation6 + $0x10] sm:$0x1] %vm2322_vm12, %v3590_v15 }
 0x144   : > { %957 = vst.msk [vmem:[#allocation2 + $0x70] sm:$0xff] %vm942_vm4, %v875_v42  ;;  %v1630_v56 = vpop.permute.xlu0 %1629 }
 0x145   : > { %1536 = vst.msk [vmem:[#allocation2 + $0x68] sm:$0xff] %vm1522_vm7, %v1453_v55 }
 0x146   : > { %1721 = vst.msk [vmem:[#allocation2 + $0x28] sm:$0xff] %vm1715_vm8, %v1630_v56 }
 0x147   : > { %1914 = vst.msk [vmem:[#allocation2 + $0x28] sm:$0xff] %vm1908_vm9, %v1823_v11 }
 0x148   : > { %2325 = vst.msk [vmem:[#allocation6 + $0x20] sm:$0x1] %vm2322_vm12, %v3590_v15 }
 0x149   : > { %668 = vrot.lane.b32.xlu2 %v3952_v2, %s3585_s29  ;;  %1665 = vrot.lane.b32.xlu1 %v4211_v16, %s3586_s14  ;;  %v4232_v2 = vld [vmem:[%s3701_s25 + $0xe2] sm:$0xff]  ;;  %2326 = vst.msk [vmem:[#allocation6 + $0x30] sm:$0x1] %vm2322_vm12, %v3590_v15 }
 0x14a   : > { %1649 = vrot.lane.b32.xlu0 %v4215_v58, %s3586_s14  ;;  %2327 = vst.msk [vmem:[#allocation6 + $0x40] sm:$0x1] %vm2322_vm12, %v3590_v15 }
 0x14b   : > { %v1068_v59 = vpop.permute.xlu2 %1067  ;;  %v665_v62 = vpop.permute.xlu1 %664  ;;  %2328 = vst.msk [vmem:[#allocation6 + $0x50] sm:$0x1] %vm2322_vm12, %v3590_v15 }
 0x14c   : > { %1150 = vst.msk [vmem:[#allocation2 + $0x70] sm:$0xff] %vm1135_vm5, %v1068_v59  ;;  %v1646_v63 = vpop.permute.xlu0 %1645 }
 0x14d   : > { %755 = vst.msk [vmem:[#allocation2 + $0x30] sm:$0xff] %vm748_vm3, %v665_v62  ;;  %v4346_v62 = vld [vmem:[%s3701_s25 + $0xf2] sm:$0xff] }
 0x14e   : > { %1729 = vst.msk [vmem:[#allocation2 + $0x68] sm:$0xff] %vm1715_vm8, %v1646_v63  ;;  %v1946_v0 = vld [vmem:[#allocation2 + $0x28] sm:$0xff] }
 0x14f   : > { %1922 = vst.msk [vmem:[#allocation2 + $0x68] sm:$0xff] %vm1908_vm9, %v1839_v38  ;;  %3407 = vmatmul.msk.f32.gmra.mxu0 %vm1982_vm10, %v1946_v0 }
 0x150   : > { %2329 = vst.msk [vmem:[#allocation6 + $0x60] sm:$0x1] %vm2322_vm12, %v3590_v15 }
 0x151   : > { %507 = vrot.lane.b32.xlu2 %v4068_v57, %s5506_s22  ;;  %1858 = vrot.lane.b32.xlu1 %v4227_v5, %s5496_s21  ;;  %2330 = vst.msk [vmem:[#allocation6 + $0x70] sm:$0x1] %vm2322_vm12, %v3590_v15 }
 0x152   : > { %1842 = vrot.lane.b32.xlu0 %v4232_v2, %s5496_s21  ;;  %2331 = vst.msk [vmem:[#allocation6 + $0x80] sm:$0x1] %vm2322_vm12, %v3590_v15 }
 0x153   : > { %v2100_v12 = vpop.f32.mrf.mxu0  ;;  %v1261_v13 = vpop.permute.xlu2 %1260  ;;  %2334 = vst.msk [vmem:[#allocation6 + $0x19] sm:$0x1] %vm2322_vm12, %v3590_v15 }
 0x154   : > { %v2101_v19 = vadd.f32 %v4237_v8, %v2100_v12  ;;  %1343 = vst.msk [vmem:[#allocation2 + $0x70] sm:$0xff] %vm1328_vm6, %v1261_v13  ;;  %v859_v22 = vpop.permute.xlu1 %858  ;;  %v504_v23 = vpop.permute.xlu0 %503 }
 0x155   : > { %949 = vst.msk [vmem:[#allocation2 + $0x30] sm:$0xff] %vm942_vm4, %v859_v22 }
 0x156   : > { %2197 = vst.msk [vmem:[#allocation4] sm:$0xff] %vm2196_vm11, %v2101_v19  ;;  %v1954_v57 = vld [vmem:[#allocation2 + $0x68] sm:$0xff] }
 0x157   : > { %578 = vst.msk [vmem:[#allocation2 + $0xb0] sm:$0xff] %vm555_vm1, %v504_v23  ;;  %3415 = vmatmul.msk.f32.gmra.mxu2 %vm1982_vm10, %v1954_v57 }
 0x158   : > { %2335 = vst.msk [vmem:[#allocation6 + $0x29] sm:$0x1] %vm2322_vm12, %v3590_v15 }
 0x159   : > { %700 = vrot.lane.b32.xlu2 %v4084_v61, %s3585_s29  ;;  %684 = vrot.lane.b32.xlu1 %v3975_v18, %s3585_s29  ;;  %2336 = vst.msk [vmem:[#allocation6 + $0x39] sm:$0x1] %vm2322_vm12, %v3590_v15 }
 0x15a   : > { %862 = vrot.lane.b32.xlu0 %v3864_v40, %s3584_s28  ;;  %2337 = vst.msk [vmem:[#allocation6 + $0x49] sm:$0x1] %vm2322_vm12, %v3590_v15 }
 0x15b   : > { %v1455_v24 = vpop.permute.xlu2 %1454  ;;  %2338 = vst.msk [vmem:[#allocation6 + $0x59] sm:$0x1] %vm2322_vm12, %v3590_v15 }
 0x15c   : > { %1537 = vst.msk [vmem:[#allocation2 + $0x70] sm:$0xff] %vm1522_vm7, %v1455_v24  ;;  %v1052_v7 = vpop.permute.xlu1 %1051  ;;  %v697_v48 = vpop.permute.xlu0 %696 }
 0x15d   : > { %1142 = vst.msk [vmem:[#allocation2 + $0x30] sm:$0xff] %vm1135_vm5, %v1052_v7 }
 0x15e   : > { %771 = vst.msk [vmem:[#allocation2 + $0xb0] sm:$0xff] %vm748_vm3, %v697_v48 }
 0x15f   : > { %2339 = vst.msk [vmem:[#allocation6 + $0x69] sm:$0x1] %vm2322_vm12, %v3590_v15 }
 0x160   : > { %2340 = vst.msk [vmem:[#allocation6 + $0x79] sm:$0x1] %vm2322_vm12, %v3590_v15 }
 0x161   : > { %894 = vrot.lane.b32.xlu2 %v4102_v4, %s3584_s28  ;;  %878 = vrot.lane.b32.xlu1 %v4080_v60, %s3584_s28  ;;  %2341 = vst.msk [vmem:[#allocation6 + $0x89] sm:$0x1] %vm2322_vm12, %v3590_v15 }
 0x162   : > { %1055 = vrot.lane.b32.xlu0 %v3740_v10, %s5504_s27  ;;  %2332 = vst.msk [vmem:[#allocation6 + $0x90] sm:$0x1] %vm2322_vm12, %v3590_v15 }
 0x163   : > { %v2103_v18 = vpop.f32.mrf.mxu0  ;;  %v1648_v40 = vpop.permute.xlu2 %1647  ;;  %2318 = vst.msk [vmem:[#allocation6 + $0x8] sm:$0x3] %vm2317_vm13, %v3590_v15 }
 0x164   : > { %v2104_v61 = vadd.f32 %v4237_v8, %v2103_v18  ;;  %1730 = vst.msk [vmem:[#allocation2 + $0x70] sm:$0xff] %vm1715_vm8, %v1648_v40  ;;  %v1245_v27 = vpop.permute.xlu1 %1244  ;;  %v891_v17 = vpop.permute.xlu0 %890 }
 0x165   : > { %1335 = vst.msk [vmem:[#allocation2 + $0x30] sm:$0xff] %vm1328_vm6, %v1245_v27 }
 0x166   : > { %2198 = vst.msk [vmem:[#allocation4 + $0x8] sm:$0xff] %vm2196_vm11, %v2104_v61 }
 0x167   : > { %965 = vst.msk [vmem:[#allocation2 + $0xb0] sm:$0xff] %vm942_vm4, %v891_v17 }
 0x168   : > { %2333 = vst.msk [vmem:[#allocation6 + $0x9] sm:$0x1] %vm2322_vm12, %v3590_v15 }
 0x169   : > { %1087 = vrot.lane.b32.xlu2 %v4121_v21, %s5504_s27  ;;  %1071 = vrot.lane.b32.xlu1 %v4096_v1, %s5504_s27  ;;  %2321 = vst.msk [vmem:[#allocation6 + $0x98] sm:$0x3] %vm2317_vm13, %v3590_v15 }
 0x16a   : > { %1248 = vrot.lane.b32.xlu0 %v4099_v3, %s3588_s17  ;;  %2342 = vst.msk [vmem:[#allocation6 + $0x99] sm:$0x1] %vm2322_vm12, %v3590_v15 }
 0x16b   : > { %v1841_v10 = vpop.permute.xlu2 %1840 }
 0x16c   : > { %1923 = vst.msk [vmem:[#allocation2 + $0x70] sm:$0xff] %vm1908_vm9, %v1841_v10  ;;  %v1439_v60 = vpop.permute.xlu1 %1438  ;;  %v1084_v4 = vpop.permute.xlu0 %1083 }
 0x16d   : > { %1529 = vst.msk [vmem:[#allocation2 + $0x30] sm:$0xff] %vm1522_vm7, %v1439_v60  ;;  %v2261_v7 = vld [vmem:[#allocation4 + $0x1] ss:$2 sm:$0xff] }
 0x16e   : > { %1158 = vst.msk [vmem:[#allocation2 + $0xb0] sm:$0xff] %vm1135_vm5, %v1084_v4 }
 0x171   : > { %1280 = vrot.lane.b32.xlu2 %v4135_v26, %s3588_s17  ;;  %1264 = vrot.lane.b32.xlu1 %v4117_v20, %s3588_s17 }
 0x172   : > { %1442 = vrot.lane.b32.xlu0 %v3891_v47, %s5505_s16  ;;  %v4299_v47 = vld [vmem:[%s3701_s25 + $0x91] sm:$0xff] }
 0x173   : > { %v861_v30 = vpop.permute.xlu2 %860  ;;  %v1955_v38 = vld [vmem:[#allocation2 + $0x70] sm:$0xff] }
 0x174   : > { %v1632_v41 = vpop.permute.xlu1 %1631  ;;  %v1277_v32 = vpop.permute.xlu0 %1276  ;;  %3416 = vmatmul.msk.f32.gmra.mxu2 %vm1982_vm10, %v1955_v38 }
 0x175   : > { %1722 = vst.msk [vmem:[#allocation2 + $0x30] sm:$0xff] %vm1715_vm8, %v1632_v41  ;;  %v2106_v11 = vpop.f32.mrf.mxu0 }
 0x176   : > { %1351 = vst.msk [vmem:[#allocation2 + $0xb0] sm:$0xff] %vm1328_vm6, %v1277_v32  ;;  %v2107_v34 = vadd.f32 %v4237_v8, %v2106_v11 }
 0x178   : > { %2199 = vst.msk [vmem:[#allocation4 + $0x10] sm:$0xff] %vm2196_vm11, %v2107_v34  ;;  %v4436_v34 = vld [vmem:[%s3701_s25 + $0x99] sm:$0xff] }
 0x179   : > { %1474 = vrot.lane.b32.xlu2 %v4293_v25, %s5505_s16  ;;  %1458 = vrot.lane.b32.xlu1 %v4296_v37, %s5505_s16 }
 0x17a   : > { %1635 = vrot.lane.b32.xlu0 %v4299_v47, %s3586_s14 }
 0x17b   : > { %v1054_v43 = vpop.permute.xlu2 %1053 }
 0x17c   : > { %v1825_v36 = vpop.permute.xlu1 %1824  ;;  %v1471_v45 = vpop.permute.xlu0 %1470 }
 0x17d   : > { %1915 = vst.msk [vmem:[#allocation2 + $0x30] sm:$0xff] %vm1908_vm9, %v1825_v36 }
 0x17e   : > { %1545 = vst.msk [vmem:[#allocation2 + $0xb0] sm:$0xff] %vm1522_vm7, %v1471_v45  ;;  %v4449_v45 = vld [vmem:[%s3701_s25 + $0xf9] sm:$0xff] }
 0x181   : > { %1667 = vrot.lane.b32.xlu2 %v4316_v28, %s3586_s14  ;;  %1651 = vrot.lane.b32.xlu1 %v4319_v52, %s3586_s14 }
 0x182   : > { %1828 = vrot.lane.b32.xlu0 %v3914_v53, %s5496_s21  ;;  %v4343_v53 = vld [vmem:[%s3701_s25 + $0x152] sm:$0xff] }
 0x183   : > { %v1247_v42 = vpop.permute.xlu2 %1246 }
 0x184   : > { %v667_v55 = vpop.permute.xlu1 %666  ;;  %v1664_v56 = vpop.permute.xlu0 %1663  ;;  %v1947_v59 = vld [vmem:[#allocation2 + $0x30] sm:$0xff] }
 0x185   : > { %756 = vst.msk [vmem:[#allocation2 + $0x38] sm:$0xff] %vm748_vm3, %v667_v55  ;;  %3408 = vmatmul.msk.f32.gmra.mxu0 %vm1982_vm10, %v1947_v59 }
 0x186   : > { %950 = vst.msk [vmem:[#allocation2 + $0x38] sm:$0xff] %vm942_vm4, %v861_v30 }
 0x187   : > { %1143 = vst.msk [vmem:[#allocation2 + $0x38] sm:$0xff] %vm1135_vm5, %v1054_v43 }
 0x188   : > { %1738 = vst.msk [vmem:[#allocation2 + $0xb0] sm:$0xff] %vm1715_vm8, %v1664_v56 }
 0x189   : > { %1336 = vst.msk [vmem:[#allocation2 + $0x38] sm:$0xff] %vm1328_vm6, %v1247_v42  ;;  %1860 = vrot.lane.b32.xlu2 %v4343_v53, %s5496_s21  ;;  %1844 = vrot.lane.b32.xlu1 %v4346_v62, %s5496_s21  ;;  %v4452_v42 = vld [vmem:[%s3701_s25 + $0x158] sm:$0xff] }
 0x18a   : > { %670 = vrot.lane.b32.xlu0 %v4009_v29, %s3585_s29 }
 0x18b   : > { %v2109_v63 = vpop.f32.mrf.mxu0  ;;  %v1441_v0 = vpop.permute.xlu2 %1440 }
 0x18c   : > { %v2110_v12 = vadd.f32 %v4237_v8, %v2109_v63  ;;  %1530 = vst.msk [vmem:[#allocation2 + $0x38] sm:$0xff] %vm1522_vm7, %v1441_v0  ;;  %v506_v13 = vpop.permute.xlu1 %505  ;;  %v1857_v19 = vpop.permute.xlu0 %1856 }
 0x18d   : > { %579 = vst.msk [vmem:[#allocation2 + $0xb8] sm:$0xff] %vm555_vm1, %v506_v13  ;;  %v4469_v13 = vld [vmem:[%s3701_s25 + $0x159] sm:$0xff] }
 0x18e   : > { %2200 = vst.msk [vmem:[#allocation4 + $0x18] sm:$0xff] %vm2196_vm11, %v2110_v12  ;;  %v4466_v12 = vld [vmem:[%s3701_s25 + $0xfa] sm:$0xff] }
 0x18f   : > { %1931 = vst.msk [vmem:[#allocation2 + $0xb0] sm:$0xff] %vm1908_vm9, %v1857_v19 }
 0x191   : > { %686 = vrot.lane.b32.xlu2 %v4023_v35, %s3585_s29  ;;  %864 = vrot.lane.b32.xlu1 %v3828_v31, %s3584_s28  ;;  %v3250_v31 = vld [vmem:[%s3701_s25 + $0x81] sm:$0xff] }
 0x192   : > { %509 = vrot.lane.b32.xlu0 %v4162_v39, %s5506_s22  ;;  %v2229_v39 = vld [vmem:[#allocation4] ss:$2 sm:$0xff] }
 0x193   : > { %v1634_v29 = vpop.permute.xlu2 %1633  ;;  %v2292_v18 = vmax.f32 %v2229_v39, %v2261_v7 }
 0x194   : > { %1723 = vst.msk [vmem:[#allocation2 + $0x38] sm:$0xff] %vm1715_vm8, %v1634_v29  ;;  %v699_v22 = vpop.permute.xlu1 %698  ;;  %v683_v35 = vpop.permute.xlu0 %682 }
 0x195   : > { %772 = vst.msk [vmem:[#allocation2 + $0xb8] sm:$0xff] %vm748_vm3, %v699_v22  ;;  %v2231_v23 = vld [vmem:[#allocation4 + $0x10] ss:$2 sm:$0xff]  ;;  %v2263_v57 = vld [vmem:[#allocation4 + $0x11] ss:$2 sm:$0xff] }
 0x196   : > { %764 = vst.msk [vmem:[#allocation2 + $0x78] sm:$0xff] %vm748_vm3, %v683_v35  ;;  %v1963_v24 = vld [vmem:[#allocation2 + $0xb0] sm:$0xff]  ;;  %v2293_v48 = vmax.f32 %v2231_v23, %v2263_v57  ;;  %v4481_v22 = vld [vmem:[%s3701_s25 + $0x15a] sm:$0xff] }
 0x197   : > { %3424 = vmatmul.msk.f32.vlgmr.msra.gmra.mxu3 %vm1982_vm10, %v1963_v24 }
 0x198   : > { %v2308_v27 = vmax.f32 %v2292_v18, %v2293_v48 }
 0x199   : > { %880 = vrot.lane.b32.xlu2 %v4199_v6, %s3584_s28  ;;  %1057 = vrot.lane.b32.xlu1 %v3250_v31, %s5504_s27 }
 0x19a   : > { %702 = vrot.lane.b32.xlu0 %v4178_v50, %s3585_s29  ;;  %2344 = vst.msk [vmem:[#allocation6 + $0x11] sm:$0xff] %vm2196_vm11, %v2308_v27  ;;  %v3315_v27 = vld [vmem:[%s3701_s25 + $0xa8] sm:$0xff] }
 0x19b   : > { %v1827_v40 = vpop.permute.xlu2 %1826 }
 0x19c   : > { %1916 = vst.msk [vmem:[#allocation2 + $0x38] sm:$0xff] %vm1908_vm9, %v1827_v40  ;;  %v893_v61 = vpop.permute.xlu1 %892  ;;  %v877_v6 = vpop.permute.xlu0 %876 }
 0x19d   : > { %966 = vst.msk [vmem:[#allocation2 + $0xb8] sm:$0xff] %vm942_vm4, %v893_v61 }
 0x19e   : > { %958 = vst.msk [vmem:[#allocation2 + $0x78] sm:$0xff] %vm942_vm4, %v877_v6 }
 0x1a1   : > { %1073 = vrot.lane.b32.xlu2 %v4215_v58, %s5504_s27  ;;  %1250 = vrot.lane.b32.xlu1 %v4192_v54, %s3588_s17  ;;  %v4418_v4 = vld [vmem:[#allocation6 + $0x10] sm:$0xff] }
 0x1a2   : > { %896 = vrot.lane.b32.xlu0 %v4195_v9, %s3584_s28  ;;  %2361 = vst.msk [vmem:[#allocation3 + $0x8] sm:$0xff] %vm2196_vm11, %v4418_v4 }
 0x1a3   : > { %v669_v50 = vpop.permute.xlu2 %668  ;;  %v1948_v17 = vld [vmem:[#allocation2 + $0x38] sm:$0xff] }
 0x1a4   : > { %757 = vst.msk [vmem:[#allocation2 + $0x40] sm:$0xff] %vm748_vm3, %v669_v50  ;;  %v1086_v10 = vpop.permute.xlu1 %1085  ;;  %v1070_v60 = vpop.permute.xlu0 %1069  ;;  %3409 = vmatmul.msk.f32.gmra.mxu0 %vm1982_vm10, %v1948_v17 }
 0x1a5   : > { %1159 = vst.msk [vmem:[#allocation2 + $0xb8] sm:$0xff] %vm1135_vm5, %v1086_v10 }
 0x1a6   : > { %1151 = vst.msk [vmem:[#allocation2 + $0x78] sm:$0xff] %vm1135_vm5, %v1070_v60  ;;  %v4535_v60 = vld [vmem:[%s3701_s25 + $0x168] sm:$0xff] }
 0x1a9   : > { %1266 = vrot.lane.b32.xlu2 %v4232_v2, %s3588_s17  ;;  %1444 = vrot.lane.b32.xlu1 %v3887_v46, %s5505_s16  ;;  %v4433_v46 = vld [vmem:[%s3701_s25 + $0xf8] sm:$0xff] }
 0x1aa   : > { %1089 = vrot.lane.b32.xlu0 %v4211_v16, %s5504_s27  ;;  %v2112_v9 = vpop.f32.mrf.mxu0 }
 0x1ab   : > { %v2113_v30 = vadd.f32 %v4237_v8, %v2112_v9  ;;  %v508_v41 = vpop.permute.xlu2 %507 }
 0x1ac   : > { %580 = vst.msk [vmem:[#allocation2 + $0xc0] sm:$0xff] %vm555_vm1, %v508_v41  ;;  %v1279_v32 = vpop.permute.xlu1 %1278  ;;  %v1263_v11 = vpop.permute.xlu0 %1262 }
 0x1ad   : > { %2201 = vst.msk [vmem:[#allocation4 + $0x20] sm:$0xff] %vm2196_vm11, %v2113_v30  ;;  %v3347_v30 = vld [vmem:[%s3701_s25 + $0xa9] sm:$0xff] }
 0x1ae   : > { %1352 = vst.msk [vmem:[#allocation2 + $0xb8] sm:$0xff] %vm1328_vm6, %v1279_v32 }
 0x1af   : > { %1344 = vst.msk [vmem:[#allocation2 + $0x78] sm:$0xff] %vm1328_vm6, %v1263_v11 }
 0x1b1   : > { %1460 = vrot.lane.b32.xlu2 %v4433_v46, %s5505_s16  ;;  %1637 = vrot.lane.b32.xlu1 %v4436_v34, %s3586_s14 }
 0x1b2   : > { %1282 = vrot.lane.b32.xlu0 %v4227_v5, %s3588_s17 }
 0x1b3   : > { %v701_v38 = vpop.permute.xlu2 %700 }
 0x1b4   : > { %773 = vst.msk [vmem:[#allocation2 + $0xc0] sm:$0xff] %vm748_vm3, %v701_v38  ;;  %v1473_v43 = vpop.permute.xlu1 %1472  ;;  %v1457_v36 = vpop.permute.xlu0 %1456  ;;  %v4548_v38 = vld [vmem:[%s3701_s25 + $0x169] sm:$0xff] }
 0x1b5   : > { %1546 = vst.msk [vmem:[#allocation2 + $0xb8] sm:$0xff] %vm1522_vm7, %v1473_v43  ;;  %v3379_v43 = vld [vmem:[%s3701_s25 + $0xaa] sm:$0xff] }
 0x1b6   : > { %1538 = vst.msk [vmem:[#allocation2 + $0x78] sm:$0xff] %vm1522_vm7, %v1457_v36 }
 0x1b8   : > { %v2136_v55 = vpop.f32.mrf.mxu2 }
 0x1b9   : > { %v2137_v56 = vadd.f32 %v4237_v8, %v2136_v55  ;;  %1653 = vrot.lane.b32.xlu2 %v4449_v45, %s3586_s14  ;;  %1830 = vrot.lane.b32.xlu1 %v3972_v14, %s5496_s21 }
 0x1ba   : > { %1476 = vrot.lane.b32.xlu0 %v4452_v42, %s5505_s16 }
 0x1bb   : > { %2209 = vst.msk [vmem:[#allocation4 + $0x60] sm:$0xff] %vm2196_vm11, %v2137_v56  ;;  %v895_v59 = vpop.permute.xlu2 %894 }
 0x1bc   : > { %967 = vst.msk [vmem:[#allocation2 + $0xc0] sm:$0xff] %vm942_vm4, %v895_v59  ;;  %v1666_v63 = vpop.permute.xlu1 %1665  ;;  %v1650_v0 = vpop.permute.xlu0 %1649 }
 0x1bd   : > { %1739 = vst.msk [vmem:[#allocation2 + $0xb8] sm:$0xff] %vm1715_vm8, %v1666_v63 }
 0x1be   : > { %1731 = vst.msk [vmem:[#allocation2 + $0x78] sm:$0xff] %vm1715_vm8, %v1650_v0 }
 0x1c1   : > { %1846 = vrot.lane.b32.xlu2 %v4466_v12, %s5496_s21  ;;  %672 = vrot.lane.b32.xlu1 %v4099_v3, %s3585_s29 }
 0x1c2   : > { %1669 = vrot.lane.b32.xlu0 %v4469_v13, %s3586_s14 }
 0x1c3   : > { %v1088_v14 = vpop.permute.xlu2 %1087 }
 0x1c4   : > { %1160 = vst.msk [vmem:[#allocation2 + $0xc0] sm:$0xff] %vm1135_vm5, %v1088_v14  ;;  %v1859_v19 = vpop.permute.xlu1 %1858  ;;  %v1843_v29 = vpop.permute.xlu0 %1842  ;;  %v4562_v14 = vld [vmem:[%s3701_s25 + $0x16a] sm:$0xff] }
 0x1c5   : > { %1932 = vst.msk [vmem:[#allocation2 + $0xb8] sm:$0xff] %vm1908_vm9, %v1859_v19 }
 0x1c6   : > { %1924 = vst.msk [vmem:[#allocation2 + $0x78] sm:$0xff] %vm1908_vm9, %v1843_v29 }
 0x1c9   : > { %511 = vrot.lane.b32.xlu2 %v4121_v21, %s5506_s22  ;;  %495 = vrot.lane.b32.xlu1 %v4096_v1, %s5506_s22  ;;  %v3219_v1 = vld [vmem:[%s3701_s25 + $0x90] sm:$0xff] }
 0x1ca   : > { %1862 = vrot.lane.b32.xlu0 %v4481_v22, %s5496_s21 }
 0x1cb   : > { %v1281_v3 = vpop.permute.xlu2 %1280 }
 0x1cc   : > { %v2115_v35 = vpop.f32.mrf.mxu0  ;;  %1353 = vst.msk [vmem:[#allocation2 + $0xc0] sm:$0xff] %vm1328_vm6, %v1281_v3  ;;  %v685_v31 = vpop.permute.xlu1 %684  ;;  %v1964_v23 = vld [vmem:[#allocation2 + $0xb8] sm:$0xff] }
 0x1cd   : > { %v2116_v57 = vadd.f32 %v4237_v8, %v2115_v35  ;;  %765 = vst.msk [vmem:[#allocation2 + $0x80] sm:$0xff] %vm748_vm3, %v685_v31  ;;  %v863_v24 = vpop.permute.xlu0 %862  ;;  %v1956_v39 = vld [vmem:[#allocation2 + $0x78] sm:$0xff]  ;;  %3425 = vmatmul.msk.f32.gmra.mxu3 %vm1982_vm10, %v1964_v23 }
 0x1ce   : > { %951 = vst.msk [vmem:[#allocation2 + $0x40] sm:$0xff] %vm942_vm4, %v863_v24  ;;  %3417 = vmatmul.msk.f32.gmra.mxu2 %vm1982_vm10, %v1956_v39 }
 0x1cf   : > { %2202 = vst.msk [vmem:[#allocation4 + $0x28] sm:$0xff] %vm2196_vm11, %v2116_v57  ;;  %v356_v57 = vld [vmem:[%s3701_s25 + $0x138] sm:$0xff] }
 0x1d0   : > { %389 = vst.msk [vmem:[#allocation2 + $0xd0] sm:$0xff] %vm362_vm0, %v356_v57 }
 0x1d1   : > { %704 = vrot.lane.b32.xlu2 %v4135_v26, %s3585_s29  ;;  %688 = vrot.lane.b32.xlu1 %v4117_v20, %s3585_s29 }
 0x1d2   : > { %866 = vrot.lane.b32.xlu0 %v3219_v1, %s3584_s28 }
 0x1d3   : > { %v1475_v21 = vpop.permute.xlu2 %1474 }
 0x1d4   : > { %1547 = vst.msk [vmem:[#allocation2 + $0xc0] sm:$0xff] %vm1522_vm7, %v1475_v21  ;;  %v879_v7 = vpop.permute.xlu1 %878 }
 0x1d5   : > { %959 = vst.msk [vmem:[#allocation2 + $0x80] sm:$0xff] %vm942_vm4, %v879_v7  ;;  %v1056_v48 = vpop.permute.xlu0 %1055 }
 0x1d6   : > { %1144 = vst.msk [vmem:[#allocation2 + $0x40] sm:$0xff] %vm1135_vm5, %v1056_v48 }
 0x1d9   : > { %898 = vrot.lane.b32.xlu2 %v4293_v25, %s3584_s28  ;;  %882 = vrot.lane.b32.xlu1 %v4296_v37, %s3584_s28  ;;  %v3283_v25 = vld [vmem:[%s3701_s25 + $0x92] sm:$0xff] }
 0x1da   : > { %v2139_v26 = vpop.f32.mrf.mxu2  ;;  %1059 = vrot.lane.b32.xlu0 %v4299_v47, %s5504_s27 }
 0x1db   : > { %v2140_v20 = vadd.f32 %v4237_v8, %v2139_v26  ;;  %v1668_v18 = vpop.permute.xlu2 %1667  ;;  %v348_v26 = vld [vmem:[%s3701_s25 + $0xd8] sm:$0xff] }
 0x1dc   : > { %1740 = vst.msk [vmem:[#allocation2 + $0xc0] sm:$0xff] %vm1715_vm8, %v1668_v18  ;;  %v1072_v40 = vpop.permute.xlu1 %1071 }
 0x1dd   : > { %2210 = vst.msk [vmem:[#allocation4 + $0x68] sm:$0xff] %vm2196_vm11, %v2140_v20  ;;  %v1249_v61 = vpop.permute.xlu0 %1248  ;;  %v3316_v20 = vld [vmem:[%s3701_s25 + $0xb0] sm:$0xff] }
 0x1de   : > { %1152 = vst.msk [vmem:[#allocation2 + $0x80] sm:$0xff] %vm1135_vm5, %v1072_v40 }
 0x1df   : > { %1337 = vst.msk [vmem:[#allocation2 + $0x40] sm:$0xff] %vm1328_vm6, %v1249_v61 }
 0x1e0   : > { %381 = vst.msk [vmem:[#allocation2 + $0x90] sm:$0xff] %vm362_vm0, %v348_v26 }
 0x1e1   : > { %1091 = vrot.lane.b32.xlu2 %v4316_v28, %s5504_s27  ;;  %1075 = vrot.lane.b32.xlu1 %v4319_v52, %s5504_s27 }
 0x1e2   : > { %1252 = vrot.lane.b32.xlu0 %v3283_v25, %s3588_s17 }
 0x1e3   : > { %v1861_v37 = vpop.permute.xlu2 %1860 }
 0x1e4   : > { %1933 = vst.msk [vmem:[#allocation2 + $0xc0] sm:$0xff] %vm1908_vm9, %v1861_v37  ;;  %v1265_v47 = vpop.permute.xlu1 %1264  ;;  %v3348_v37 = vld [vmem:[%s3701_s25 + $0xb1] sm:$0xff] }
 0x1e5   : > { %1345 = vst.msk [vmem:[#allocation2 + $0x80] sm:$0xff] %vm1328_vm6, %v1265_v47  ;;  %v1443_v6 = vpop.permute.xlu0 %1442  ;;  %v2233_v47 = vld [vmem:[#allocation4 + $0x20] ss:$2 sm:$0xff] }
 0x1e6   : > { %1531 = vst.msk [vmem:[#allocation2 + $0x40] sm:$0xff] %vm1522_vm7, %v1443_v6  ;;  %v2265_v6 = vld [vmem:[#allocation4 + $0x21] ss:$2 sm:$0xff] }
 0x1e9   : > { %1284 = vrot.lane.b32.xlu2 %v4343_v53, %s3588_s17  ;;  %1268 = vrot.lane.b32.xlu1 %v4346_v62, %s3588_s17 }
 0x1ea   : > { %1446 = vrot.lane.b32.xlu0 %v3315_v27, %s5505_s16 }
 0x1eb   : > { %v687_v50 = vpop.permute.xlu2 %686  ;;  %v1965_v9 = vld [vmem:[#allocation2 + $0xc0] sm:$0xff] }
 0x1ec   : > { %766 = vst.msk [vmem:[#allocation2 + $0x88] sm:$0xff] %vm748_vm3, %v687_v50  ;;  %v1459_v17 = vpop.permute.xlu1 %1458  ;;  %3426 = vmatmul.msk.f32.gmra.mxu3 %vm1982_vm10, %v1965_v9 }
 0x1ed   : > { %1539 = vst.msk [vmem:[#allocation2 + $0x80] sm:$0xff] %vm1522_vm7, %v1459_v17  ;;  %v1636_v10 = vpop.permute.xlu0 %1635 }
 0x1ee   : > { %1724 = vst.msk [vmem:[#allocation2 + $0x40] sm:$0xff] %vm1715_vm8, %v1636_v10  ;;  %v2294_v10 = vmax.f32 %v2233_v47, %v2265_v6  ;;  %v4720_v6 = vld [vmem:[%s3701_s25 + $0x180] sm:$0xff] }
 0x1f1   : > { %1478 = vrot.lane.b32.xlu2 %v4535_v60, %s5505_s16  ;;  %1462 = vrot.lane.b32.xlu1 %v4172_v49, %s5505_s16 }
 0x1f2   : > { %1639 = vrot.lane.b32.xlu0 %v3347_v30, %s3586_s14 }
 0x1f3   : > { %v881_v41 = vpop.permute.xlu2 %880 }
 0x1f4   : > { %960 = vst.msk [vmem:[#allocation2 + $0x88] sm:$0xff] %vm942_vm4, %v881_v41  ;;  %v1652_v32 = vpop.permute.xlu1 %1651 }
 0x1f5   : > { %1732 = vst.msk [vmem:[#allocation2 + $0x80] sm:$0xff] %vm1715_vm8, %v1652_v32  ;;  %v1829_v11 = vpop.permute.xlu0 %1828  ;;  %v3380_v32 = vld [vmem:[%s3701_s25 + $0xb2] sm:$0xff] }
 0x1f6   : > { %1917 = vst.msk [vmem:[#allocation2 + $0x40] sm:$0xff] %vm1908_vm9, %v1829_v11 }
 0x1f7   : > { %v2142_v36 = vpop.f32.mrf.mxu2 }
 0x1f8   : > { %v2143_v56 = vadd.f32 %v4237_v8, %v2142_v36 }
 0x1f9   : > { %1671 = vrot.lane.b32.xlu2 %v4548_v38, %s3586_s14  ;;  %1655 = vrot.lane.b32.xlu1 %v4035_v44, %s3586_s14 }
 0x1fa   : > { %1832 = vrot.lane.b32.xlu0 %v3379_v43, %s5496_s21  ;;  %2211 = vst.msk [vmem:[#allocation4 + $0x70] sm:$0xff] %vm2196_vm11, %v2143_v56 }
 0x1fb   : > { %v1074_v55 = vpop.permute.xlu2 %1073 }
 0x1fc   : > { %1153 = vst.msk [vmem:[#allocation2 + $0x88] sm:$0xff] %vm1135_vm5, %v1074_v55  ;;  %v1845_v59 = vpop.permute.xlu1 %1844 }
 0x1fd   : > { %1925 = vst.msk [vmem:[#allocation2 + $0x80] sm:$0xff] %vm1908_vm9, %v1845_v59  ;;  %v671_v63 = vpop.permute.xlu0 %670  ;;  %v1949_v0 = vld [vmem:[#allocation2 + $0x40] sm:$0xff]  ;;  %v4648_v59 = vld [vmem:[%s3701_s25 + $0x112] sm:$0xff] }
 0x1fe   : > { %758 = vst.msk [vmem:[#allocation2 + $0x48] sm:$0xff] %vm748_vm3, %v671_v63  ;;  %3410 = vmatmul.msk.f32.gmra.mxu0 %vm1982_vm10, %v1949_v0  ;;  %v4651_v63 = vld [vmem:[%s3701_s25 + $0x171] sm:$0xff] }
 0x1ff   : > { %v4654_v0 = vld [vmem:[%s3701_s25 + $0x111] sm:$0xff] }
 0x201   : > { %1864 = vrot.lane.b32.xlu2 %v4562_v14, %s5496_s21  ;;  %1848 = vrot.lane.b32.xlu1 %v4048_v51, %s5496_s21  ;;  %v3220_v51 = vld [vmem:[%s3701_s25 + $0x98] sm:$0xff] }
 0x202   : > { %674 = vrot.lane.b32.xlu0 %v4192_v54, %s3585_s29  ;;  %v2118_v44 = vpop.f32.mrf.mxu0 }
 0x203   : > { %v1267_v19 = vpop.permute.xlu2 %1266  ;;  %v2119_v29 = vadd.f32 %v4237_v8, %v2118_v44 }
 0x204   : > { %1346 = vst.msk [vmem:[#allocation2 + $0x88] sm:$0xff] %vm1328_vm6, %v1267_v19  ;;  %v865_v3 = vpop.permute.xlu1 %864  ;;  %v1957_v35 = vld [vmem:[#allocation2 + $0x80] sm:$0xff] }
 0x205   : > { %952 = vst.msk [vmem:[#allocation2 + $0x48] sm:$0xff] %vm942_vm4, %v865_v3  ;;  %v510_v31 = vpop.permute.xlu0 %509  ;;  %3418 = vmatmul.msk.f32.gmra.mxu2 %vm1982_vm10, %v1957_v35  ;;  %v4670_v35 = vld [vmem:[%s3701_s25 + $0x172] sm:$0xff] }
 0x206   : > { %581 = vst.msk [vmem:[#allocation2 + $0xc8] sm:$0xff] %vm555_vm1, %v510_v31 }
 0x207   : > { %2203 = vst.msk [vmem:[#allocation4 + $0x30] sm:$0xff] %vm2196_vm11, %v2119_v29 }
 0x209   : > { %868 = vrot.lane.b32.xlu2 %v3220_v51, %s3584_s28  ;;  %513 = vrot.lane.b32.xlu1 %v4211_v16, %s5506_s22  ;;  %v4593_v16 = vld [vmem:[%s3701_s25 + $0x170] sm:$0xff] }
 0x20a   : > { %497 = vrot.lane.b32.xlu0 %v4215_v58, %s5506_s22  ;;  %394 = vst.msk [vmem:[#allocation2 + $0xf8] sm:$0xff] %vm362_vm0, %v4593_v16 }
 0x20b   : > { %v1461_v54 = vpop.permute.xlu2 %1460 }
 0x20c   : > { %1540 = vst.msk [vmem:[#allocation2 + $0x88] sm:$0xff] %vm1522_vm7, %v1461_v54  ;;  %v1058_v23 = vpop.permute.xlu1 %1057 }
 0x20d   : > { %1145 = vst.msk [vmem:[#allocation2 + $0x48] sm:$0xff] %vm1135_vm5, %v1058_v23  ;;  %v703_v24 = vpop.permute.xlu0 %702 }
 0x20e   : > { %774 = vst.msk [vmem:[#allocation2 + $0xc8] sm:$0xff] %vm748_vm3, %v703_v24  ;;  %v3261_v24 = vld [vmem:[%s3701_s25 + $0x109] sm:$0xff] }
 0x211   : > { %1061 = vrot.lane.b32.xlu2 %v4436_v34, %s5504_s27  ;;  %706 = vrot.lane.b32.xlu1 %v4227_v5, %s3585_s29  ;;  %v3284_v5 = vld [vmem:[%s3701_s25 + $0x9a] sm:$0xff] }
 0x212   : > { %690 = vrot.lane.b32.xlu0 %v4232_v2, %s3585_s29 }
 0x213   : > { %v1654_v58 = vpop.permute.xlu2 %1653 }
 0x214   : > { %1733 = vst.msk [vmem:[#allocation2 + $0x88] sm:$0xff] %vm1715_vm8, %v1654_v58  ;;  %v1251_v39 = vpop.permute.xlu1 %1250 }
 0x215   : > { %1338 = vst.msk [vmem:[#allocation2 + $0x48] sm:$0xff] %vm1328_vm6, %v1251_v39  ;;  %v897_v34 = vpop.permute.xlu0 %896 }
 0x216   : > { %968 = vst.msk [vmem:[#allocation2 + $0xc8] sm:$0xff] %vm942_vm4, %v897_v34 }
 0x219   : > { %1254 = vrot.lane.b32.xlu2 %v3284_v5, %s3588_s17  ;;  %900 = vrot.lane.b32.xlu1 %v4452_v42, %s3584_s28 }
 0x21a   : > { %v2166_v2 = vpop.f32.mrf.mxu3  ;;  %884 = vrot.lane.b32.xlu0 %v4433_v46, %s3584_s28 }
 0x21b   : > { %v2167_v1 = vadd.f32 %v4237_v8, %v2166_v2  ;;  %v1847_v21 = vpop.permute.xlu2 %1846  ;;  %v3325_v2 = vld [vmem:[%s3701_s25 + $0x120] sm:$0xff] }
 0x21c   : > { %1926 = vst.msk [vmem:[#allocation2 + $0x88] sm:$0xff] %vm1908_vm9, %v1847_v21  ;;  %v1445_v7 = vpop.permute.xlu1 %1444  ;;  %v2241_v21 = vld [vmem:[#allocation4 + $0x60] ss:$2 sm:$0xff] }
 0x21d   : > { %2219 = vst.msk [vmem:[#allocation4 + $0xb0] sm:$0xff] %vm2196_vm11, %v2167_v1  ;;  %v1090_v48 = vpop.permute.xlu0 %1089  ;;  %v3293_v1 = vld [vmem:[%s3701_s25 + $0x10a] sm:$0xff] }
 0x21e   : > { %1532 = vst.msk [vmem:[#allocation2 + $0x48] sm:$0xff] %vm1522_vm7, %v1445_v7  ;;  %v2273_v7 = vld [vmem:[#allocation4 + $0x61] ss:$2 sm:$0xff] }
 0x21f   : > { %1161 = vst.msk [vmem:[#allocation2 + $0xc8] sm:$0xff] %vm1135_vm5, %v1090_v48 }
 0x221   : > { %1448 = vrot.lane.b32.xlu2 %v3316_v20, %s5505_s16  ;;  %1093 = vrot.lane.b32.xlu1 %v4469_v13, %s5504_s27  ;;  %v2121_v46 = vpop.f32.mrf.mxu0  ;;  %v2298_v20 = vmax.f32 %v2241_v21, %v2273_v7 }
 0x222   : > { %1077 = vrot.lane.b32.xlu0 %v4449_v45, %s5504_s27  ;;  %v2122_v42 = vadd.f32 %v4237_v8, %v2121_v46 }
 0x223   : > { %v512_v18 = vpop.permute.xlu2 %511  ;;  %v1958_v40 = vld [vmem:[#allocation2 + $0x88] sm:$0xff] }
 0x224   : > { %2204 = vst.msk [vmem:[#allocation4 + $0x38] sm:$0xff] %vm2196_vm11, %v2122_v42  ;;  %v1638_v61 = vpop.permute.xlu1 %1637  ;;  %3419 = vmatmul.msk.f32.gmra.mxu2 %vm1982_vm10, %v1958_v40  ;;  %v4713_v40 = vld [vmem:[%s3701_s25 + $0x181] sm:$0xff] }
 0x225   : > { %582 = vst.msk [vmem:[#allocation2 + $0xd0] sm:$0xff] %vm555_vm1, %v512_v18  ;;  %v1283_v25 = vpop.permute.xlu0 %1282 }
 0x226   : > { %1725 = vst.msk [vmem:[#allocation2 + $0x48] sm:$0xff] %vm1715_vm8, %v1638_v61  ;;  %v3357_v61 = vld [vmem:[%s3701_s25 + $0x121] sm:$0xff] }
 0x227   : > { %1354 = vst.msk [vmem:[#allocation2 + $0xc8] sm:$0xff] %vm1328_vm6, %v1283_v25  ;;  %v357_v25 = vld [vmem:[%s3701_s25 + $0x140] sm:$0xff] }
 0x228   : > { %390 = vst.msk [vmem:[#allocation2 + $0xd8] sm:$0xff] %vm362_vm0, %v357_v25 }
 0x229   : > { %1641 = vrot.lane.b32.xlu2 %v3348_v37, %s3586_s14  ;;  %1286 = vrot.lane.b32.xlu1 %v4481_v22, %s3588_s17  ;;  %v349_v37 = vld [vmem:[%s3701_s25 + $0xe0] sm:$0xff] }
 0x22a   : > { %1270 = vrot.lane.b32.xlu0 %v4466_v12, %s3588_s17  ;;  %382 = vst.msk [vmem:[#allocation2 + $0x98] sm:$0xff] %vm362_vm0, %v349_v37 }
 0x22b   : > { %v2235_v27 = vld [vmem:[#allocation4 + $0x30] ss:$2 sm:$0xff]  ;;  %v2267_v50 = vld [vmem:[#allocation4 + $0x31] ss:$2 sm:$0xff]  ;;  %v705_v17 = vpop.permute.xlu2 %704 }
 0x22c   : > { %v2295_v9 = vmax.f32 %v2235_v27, %v2267_v50  ;;  %775 = vst.msk [vmem:[#allocation2 + $0xd0] sm:$0xff] %vm748_vm3, %v705_v17  ;;  %v1831_v30 = vpop.permute.xlu1 %1830 }
 0x22d   : > { %1918 = vst.msk [vmem:[#allocation2 + $0x48] sm:$0xff] %vm1908_vm9, %v1831_v30  ;;  %v1477_v41 = vpop.permute.xlu0 %1476  ;;  %v3389_v30 = vld [vmem:[%s3701_s25 + $0x122] sm:$0xff] }
 0x22e   : > { %1548 = vst.msk [vmem:[#allocation2 + $0xc8] sm:$0xff] %vm1522_vm7, %v1477_v41  ;;  %v2309_v11 = vmax.f32 %v2294_v10, %v2295_v9  ;;  %v4733_v10 = vld [vmem:[%s3701_s25 + $0x182] sm:$0xff] }
 0x230   : > { %2345 = vst.msk [vmem:[#allocation6 + $0x21] sm:$0xff] %vm2196_vm11, %v2309_v11 }
 0x231   : > { %1834 = vrot.lane.b32.xlu2 %v3380_v32, %s5496_s21  ;;  %1480 = vrot.lane.b32.xlu1 %v4593_v16, %s5505_s16 }
 0x232   : > { %1464 = vrot.lane.b32.xlu0 %v4287_v33, %s5505_s16 }
 0x233   : > { %v899_v43 = vpop.permute.xlu2 %898 }
 0x234   : > { %969 = vst.msk [vmem:[#allocation2 + $0xd0] sm:$0xff] %vm942_vm4, %v899_v43  ;;  %v673_v36 = vpop.permute.xlu1 %672  ;;  %v1950_v55 = vld [vmem:[#allocation2 + $0x48] sm:$0xff] }
 0x235   : > { %759 = vst.msk [vmem:[#allocation2 + $0x50] sm:$0xff] %vm748_vm3, %v673_v36  ;;  %v1670_v56 = vpop.permute.xlu0 %1669  ;;  %3411 = vmatmul.msk.f32.gmra.mxu0 %vm1982_vm10, %v1950_v55 }
 0x236   : > { %1741 = vst.msk [vmem:[#allocation2 + $0xc8] sm:$0xff] %vm1715_vm8, %v1670_v56 }
 0x237   : > { %v4656_v44 = vld [vmem:[#allocation6 + $0x20] sm:$0xff] }
 0x238   : > { %2362 = vst.msk [vmem:[#allocation3 + $0x10] sm:$0xff] %vm2196_vm11, %v4656_v44 }
 0x239   : > { %1850 = vrot.lane.b32.xlu2 %v4648_v59, %s5496_s21  ;;  %1673 = vrot.lane.b32.xlu1 %v4651_v63, %s3586_s14 }
 0x23a   : > { %1657 = vrot.lane.b32.xlu0 %v4654_v0, %s3586_s14 }
 0x23b   : > { %v1092_v19 = vpop.permute.xlu2 %1091 }
 0x23c   : > { %1162 = vst.msk [vmem:[#allocation2 + $0xd0] sm:$0xff] %vm1135_vm5, %v1092_v19  ;;  %v496_v29 = vpop.permute.xlu1 %495 }
 0x23d   : > { %574 = vst.msk [vmem:[#allocation2 + $0x90] sm:$0xff] %vm555_vm1, %v496_v29  ;;  %v1863_v3 = vpop.permute.xlu0 %1862 }
 0x23e   : > { %1934 = vst.msk [vmem:[#allocation2 + $0xc8] sm:$0xff] %vm1908_vm9, %v1863_v3 }
 0x241   : > { %515 = vrot.lane.b32.xlu2 %v4316_v28, %s5506_s22  ;;  %499 = vrot.lane.b32.xlu1 %v4319_v52, %s5506_s22 }
 0x242   : > { %1866 = vrot.lane.b32.xlu0 %v4670_v35, %s5496_s21 }
 0x243   : > { %v1285_v31 = vpop.permute.xlu2 %1284 }
 0x244   : > { %1355 = vst.msk [vmem:[#allocation2 + $0xd0] sm:$0xff] %vm1328_vm6, %v1285_v31  ;;  %v689_v51 = vpop.permute.xlu1 %688 }
 0x245   : > { %767 = vst.msk [vmem:[#allocation2 + $0x90] sm:$0xff] %vm748_vm3, %v689_v51  ;;  %v867_v54 = vpop.permute.xlu0 %866  ;;  %v1966_v23 = vld [vmem:[#allocation2 + $0xc8] sm:$0xff] }
 0x246   : > { %953 = vst.msk [vmem:[#allocation2 + $0x50] sm:$0xff] %vm942_vm4, %v867_v54  ;;  %3427 = vmatmul.msk.f32.gmra.mxu3 %vm1982_vm10, %v1966_v23  ;;  %v3358_v23 = vld [vmem:[%s3701_s25 + $0x129] sm:$0xff] }
 0x249   : > { %886 = vrot.lane.b32.xlu2 %v4172_v49, %s3584_s28  ;;  %708 = vrot.lane.b32.xlu1 %v4343_v53, %s3585_s29 }
 0x24a   : > { %692 = vrot.lane.b32.xlu0 %v4346_v62, %s3585_s29 }
 0x24b   : > { %v1479_v28 = vpop.permute.xlu2 %1478 }
 0x24c   : > { %1549 = vst.msk [vmem:[#allocation2 + $0xd0] sm:$0xff] %vm1522_vm7, %v1479_v28  ;;  %v883_v52 = vpop.permute.xlu1 %882  ;;  %v4792_v28 = vld [vmem:[%s3701_s25 + $0x188] sm:$0xff] }
 0x24d   : > { %961 = vst.msk [vmem:[#allocation2 + $0x90] sm:$0xff] %vm942_vm4, %v883_v52  ;;  %v1060_v57 = vpop.permute.xlu0 %1059  ;;  %v3326_v52 = vld [vmem:[%s3701_s25 + $0x128] sm:$0xff] }
 0x24e   : > { %1146 = vst.msk [vmem:[#allocation2 + $0x50] sm:$0xff] %vm1135_vm5, %v1060_v57 }
 0x250   : > { %v2169_v58 = vpop.f32.mrf.mxu3 }
 0x251   : > { %v2145_v49 = vpop.f32.mrf.mxu2  ;;  %v2170_v39 = vadd.f32 %v4237_v8, %v2169_v58  ;;  %1095 = vrot.lane.b32.xlu2 %v4548_v38, %s5504_s27  ;;  %1079 = vrot.lane.b32.xlu1 %v3261_v24, %s5504_s27 }
 0x252   : > { %v2146_v53 = vadd.f32 %v4237_v8, %v2145_v49  ;;  %902 = vrot.lane.b32.xlu0 %v4535_v60, %s3584_s28 }
 0x253   : > { %2220 = vst.msk [vmem:[#allocation4 + $0xb8] sm:$0xff] %vm2196_vm11, %v2170_v39  ;;  %v1672_v62 = vpop.permute.xlu2 %1671  ;;  %v4805_v39 = vld [vmem:[%s3701_s25 + $0x18a] sm:$0xff] }
 0x254   : > { %2212 = vst.msk [vmem:[#allocation4 + $0x78] sm:$0xff] %vm2196_vm11, %v2146_v53  ;;  %v1076_v34 = vpop.permute.xlu1 %1075  ;;  %v3390_v53 = vld [vmem:[%s3701_s25 + $0x12a] sm:$0xff] }
 0x255   : > { %1742 = vst.msk [vmem:[#allocation2 + $0xd0] sm:$0xff] %vm1715_vm8, %v1672_v62  ;;  %v1253_v5 = vpop.permute.xlu0 %1252  ;;  %v3366_v62 = vld [vmem:[%s3701_s25 + $0x189] sm:$0xff] }
 0x256   : > { %1154 = vst.msk [vmem:[#allocation2 + $0x90] sm:$0xff] %vm1135_vm5, %v1076_v34 }
 0x257   : > { %1339 = vst.msk [vmem:[#allocation2 + $0x50] sm:$0xff] %vm1328_vm6, %v1253_v5 }
 0x259   : > { %1466 = vrot.lane.b32.xlu2 %v3325_v2, %s5505_s16  ;;  %1288 = vrot.lane.b32.xlu1 %v4562_v14, %s3588_s17 }
 0x25a   : > { %1272 = vrot.lane.b32.xlu0 %v3293_v1, %s3588_s17 }
 0x25b   : > { %v2243_v60 = vld [vmem:[#allocation4 + $0x70] ss:$2 sm:$0xff]  ;;  %v2275_v48 = vld [vmem:[#allocation4 + $0x71] ss:$2 sm:$0xff]  ;;  %v1865_v26 = vpop.permute.xlu2 %1864 }
 0x25c   : > { %v2299_v46 = vmax.f32 %v2243_v60, %v2275_v48  ;;  %1935 = vst.msk [vmem:[#allocation2 + $0xd0] sm:$0xff] %vm1908_vm9, %v1865_v26  ;;  %v1269_v42 = vpop.permute.xlu1 %1268  ;;  %v350_v60 = vld [vmem:[%s3701_s25 + $0xf0] sm:$0xff]  ;;  %v3335_v26 = vld [vmem:[%s3701_s25 + $0x198] sm:$0xff] }
 0x25d   : > { %1347 = vst.msk [vmem:[#allocation2 + $0x90] sm:$0xff] %vm1328_vm6, %v1269_v42  ;;  %v1447_v18 = vpop.permute.xlu0 %1446  ;;  %v3399_v42 = vld [vmem:[%s3701_s25 + $0x19a] sm:$0xff] }
 0x25e   : > { %1533 = vst.msk [vmem:[#allocation2 + $0x50] sm:$0xff] %vm1522_vm7, %v1447_v18  ;;  %v2311_v47 = vmax.f32 %v2298_v20, %v2299_v46 }
 0x25f   : > { %383 = vst.msk [vmem:[#allocation2 + $0xa0] sm:$0xff] %vm362_vm0, %v350_v60 }
 0x260   : > { %2347 = vst.msk [vmem:[#allocation6 + $0x41] sm:$0xff] %vm2196_vm11, %v2311_v47 }
 0x261   : > { %1675 = vrot.lane.b32.xlu2 %v4713_v40, %s3586_s14  ;;  %1659 = vrot.lane.b32.xlu1 %v3357_v61, %s3586_s14  ;;  %v3367_v61 = vld [vmem:[%s3701_s25 + $0x199] sm:$0xff] }
 0x262   : > { %1482 = vrot.lane.b32.xlu0 %v4720_v6, %s5505_s16 }
 0x263   : > { %v869_v27 = vpop.permute.xlu2 %868  ;;  %v1967_v9 = vld [vmem:[#allocation2 + $0xd0] sm:$0xff] }
 0x264   : > { %v1463_v50 = vpop.permute.xlu1 %1462  ;;  %3428 = vmatmul.msk.f32.gmra.mxu3 %vm1982_vm10, %v1967_v9  ;;  %v3336_v9 = vld [vmem:[%s3701_s25 + $0x1a0] sm:$0xff] }
 0x265   : > { %1541 = vst.msk [vmem:[#allocation2 + $0x90] sm:$0xff] %vm1522_vm7, %v1463_v50  ;;  %v1640_v17 = vpop.permute.xlu0 %1639 }
 0x266   : > { %1726 = vst.msk [vmem:[#allocation2 + $0x50] sm:$0xff] %vm1715_vm8, %v1640_v17 }
 0x267   : > { %v4737_v41 = vld [vmem:[#allocation6 + $0x40] sm:$0xff] }
 0x268   : > { %2364 = vst.msk [vmem:[#allocation3 + $0x20] sm:$0xff] %vm2196_vm11, %v4737_v41 }
 0x269   : > { %501 = vrot.lane.b32.xlu2 %v4449_v45, %s5506_s22  ;;  %1868 = vrot.lane.b32.xlu1 %v4733_v10, %s5496_s21 }
 0x26a   : > { %1852 = vrot.lane.b32.xlu0 %v3389_v30, %s5496_s21 }
 0x26b   : > { %v1062_v32 = vpop.permute.xlu2 %1061 }
 0x26c   : > { %v1656_v11 = vpop.permute.xlu1 %1655 }
 0x26d   : > { %1734 = vst.msk [vmem:[#allocation2 + $0x90] sm:$0xff] %vm1715_vm8, %v1656_v11  ;;  %v1833_v43 = vpop.permute.xlu0 %1832 }
 0x26e   : > { %1919 = vst.msk [vmem:[#allocation2 + $0x50] sm:$0xff] %vm1908_vm9, %v1833_v43  ;;  %v2417_v43 = vld [vmem:[#allocation6 + $0x2] sm:$0xff] }
 0x26f   : > { %v2172_v36 = vpop.f32.mrf.mxu3 }
 0x270   : > { %v2173_v29 = vadd.f32 %v4237_v8, %v2172_v36  ;;  %v3400_v36 = vld [vmem:[%s3701_s25 + $0x1a2] sm:$0xff] }
 0x271   : > { %710 = vrot.lane.b32.xlu2 %v4481_v22, %s3585_s29  ;;  %694 = vrot.lane.b32.xlu1 %v4466_v12, %s3585_s29 }
 0x272   : > { %517 = vrot.lane.b32.xlu0 %v4469_v13, %s5506_s22  ;;  %2221 = vst.msk [vmem:[#allocation4 + $0xc0] sm:$0xff] %vm2196_vm11, %v2173_v29  ;;  %v4771_v13 = vld [vmem:[%s5480_s2] ss:$0 sm:$0xff]  ;;  %v359_v29 = vld [vmem:[%s3701_s25 + $0x158] sm:$0xff] }
 0x273   : > { %v1255_v45 = vpop.permute.xlu2 %1254  ;;  %392 = vst.msk [vmem:[#allocation2 + $0xe8] sm:$0xff] %vm362_vm0, %v359_v29 }
 0x274   : > { %v1849_v55 = vpop.permute.xlu1 %1848 }
 0x275   : > { %1927 = vst.msk [vmem:[#allocation2 + $0x90] sm:$0xff] %vm1908_vm9, %v1849_v55  ;;  %v675_v56 = vpop.permute.xlu0 %674  ;;  %v1951_v19 = vld [vmem:[#allocation2 + $0x50] sm:$0xff] }
 0x276   : > { %760 = vst.msk [vmem:[#allocation2 + $0x58] sm:$0xff] %vm748_vm3, %v675_v56  ;;  %3412 = vmatmul.msk.f32.gmra.mxu0 %vm1982_vm10, %v1951_v19 }
 0x277   : > { %954 = vst.msk [vmem:[#allocation2 + $0x58] sm:$0xff] %vm942_vm4, %v869_v27 }
 0x278   : > { %1147 = vst.msk [vmem:[#allocation2 + $0x58] sm:$0xff] %vm1135_vm5, %v1062_v32 }
 0x279   : > { %1340 = vst.msk [vmem:[#allocation2 + $0x58] sm:$0xff] %vm1328_vm6, %v1255_v45  ;;  %1081 = vrot.lane.b32.xlu2 %v4654_v0, %s5504_s27  ;;  %904 = vrot.lane.b32.xlu1 %v4593_v16, %s3584_s28  ;;  %v2368_v45 = vld [vmem:[#allocation6 + $0x1] sm:$0xff] }
 0x27a   : > { %888 = vrot.lane.b32.xlu0 %v4287_v33, %s3584_s28  ;;  %v358_v33 = vld [vmem:[%s3701_s25 + $0x150] sm:$0xff] }
 0x27b   : > { %v2124_v12 = vpop.f32.mrf.mxu0  ;;  %v1449_v8 = vpop.permute.xlu2 %1448  ;;  %391 = vst.msk [vmem:[#allocation2 + $0xe0] sm:$0xff] %vm362_vm0, %v358_v33 }
 0x27c   : > { %v2125_v22 = vadd.f32 %v4771_v13, %v2124_v12  ;;  %1534 = vst.msk [vmem:[#allocation2 + $0x58] sm:$0xff] %vm1522_vm7, %v1449_v8  ;;  %v514_v0 = vpop.permute.xlu1 %513  ;;  %v1959_v3 = vld [vmem:[#allocation2 + $0x90] sm:$0xff] }
 0x27d   : > { %583 = vst.msk [vmem:[#allocation2 + $0xd8] sm:$0xff] %vm555_vm1, %v514_v0  ;;  %v498_v16 = vpop.permute.xlu0 %497  ;;  %3420 = vmatmul.msk.f32.gmra.mxu2 %vm1982_vm10, %v1959_v3  ;;  %v2564_v12 = vld [vmem:[#allocation6 + $0x12] sm:$0xff] }
 0x27e   : > { %2205 = vst.msk [vmem:[#allocation4 + $0x40] sm:$0xff] %vm2196_vm11, %v2125_v22  ;;  %v2515_v8 = vld [vmem:[#allocation6 + $0x11] sm:$0xff] }
 0x27f   : > { %575 = vst.msk [vmem:[#allocation2 + $0x98] sm:$0xff] %vm555_vm1, %v498_v16 }
 0x281   : > { %1290 = vrot.lane.b32.xlu2 %v4670_v35, %s3588_s17  ;;  %1274 = vrot.lane.b32.xlu1 %v4648_v59, %s3588_s17 }
 0x282   : > { %1097 = vrot.lane.b32.xlu0 %v4651_v63, %s5504_s27 }
 0x283   : > { %v1642_v31 = vpop.permute.xlu2 %1641 }
 0x284   : > { %1727 = vst.msk [vmem:[#allocation2 + $0x58] sm:$0xff] %vm1715_vm8, %v1642_v31  ;;  %v707_v51 = vpop.permute.xlu1 %706  ;;  %v4893_v31 = vld [vmem:[#allocation6 + $0x22] sm:$0xff] }
 0x285   : > { %776 = vst.msk [vmem:[#allocation2 + $0xd8] sm:$0xff] %vm748_vm3, %v707_v51  ;;  %v691_v54 = vpop.permute.xlu0 %690  ;;  %v4895_v51 = vld [vmem:[#allocation6 + $0x21] sm:$0xff] }
 0x286   : > { %768 = vst.msk [vmem:[#allocation2 + $0x98] sm:$0xff] %vm748_vm3, %v691_v54 }
 0x288   : > { %v2148_v59 = vpop.f32.mrf.mxu2 }
 0x289   : > { %1661 = vrot.lane.b32.xlu2 %v3358_v23, %s3586_s14  ;;  %1484 = vrot.lane.b32.xlu1 %v4792_v28, %s5505_s16  ;;  %v2149_v57 = vadd.f32 %v4771_v13, %v2148_v59 }
 0x28a   : > { %1468 = vrot.lane.b32.xlu0 %v3326_v52, %s5505_s16 }
 0x28b   : > { %v1835_v24 = vpop.permute.xlu2 %1834  ;;  %2213 = vst.msk [vmem:[#allocation4 + $0x80] sm:$0xff] %vm2196_vm11, %v2149_v57 }
 0x28c   : > { %1920 = vst.msk [vmem:[#allocation2 + $0x58] sm:$0xff] %vm1908_vm9, %v1835_v24  ;;  %v901_v58 = vpop.permute.xlu1 %900 }
 0x28d   : > { %970 = vst.msk [vmem:[#allocation2 + $0xd8] sm:$0xff] %vm942_vm4, %v901_v58  ;;  %v885_v49 = vpop.permute.xlu0 %884 }
 0x28e   : > { %962 = vst.msk [vmem:[#allocation2 + $0x98] sm:$0xff] %vm942_vm4, %v885_v49 }
 0x291   : > { %1870 = vrot.lane.b32.xlu2 %v4805_v39, %s5496_s21  ;;  %1854 = vrot.lane.b32.xlu1 %v3390_v53, %s5496_s21 }
 0x292   : > { %1677 = vrot.lane.b32.xlu0 %v3366_v62, %s3586_s14 }
 0x293   : > { %v1851_v34 = vpop.permute.xlu2 %1850  ;;  %v1952_v5 = vld [vmem:[#allocation2 + $0x58] sm:$0xff] }
 0x294   : > { %v1094_v2 = vpop.permute.xlu1 %1093  ;;  %3413 = vmatmul.msk.f32.gmra.mxu0 %vm1982_vm10, %v1952_v5 }
 0x295   : > { %1163 = vst.msk [vmem:[#allocation2 + $0xd8] sm:$0xff] %vm1135_vm5, %v1094_v2  ;;  %v1078_v1 = vpop.permute.xlu0 %1077  ;;  %v360_v2 = vld [vmem:[%s3701_s25 + $0x168] sm:$0xff] }
 0x296   : > { %1155 = vst.msk [vmem:[#allocation2 + $0x98] sm:$0xff] %vm1135_vm5, %v1078_v1 }
 0x297   : > { %393 = vst.msk [vmem:[#allocation2 + $0xf0] sm:$0xff] %vm362_vm0, %v360_v2 }
 0x299   : > { %906 = vrot.lane.b32.xlu2 %v4720_v6, %s3584_s28  ;;  %712 = vrot.lane.b32.xlu1 %v4562_v14, %s3585_s29  ;;  %v351_v14 = vld [vmem:[%s3701_s25 + $0xf8] sm:$0xff] }
 0x29a   : > { %519 = vrot.lane.b32.xlu0 %v4548_v38, %s5506_s22  ;;  %384 = vst.msk [vmem:[#allocation2 + $0xa8] sm:$0xff] %vm362_vm0, %v351_v14  ;;  %vm2506_vm0 = vcmask 261312  }
 0x29b   : > { %v516_v21 = vpop.permute.xlu2 %515 }
 0x29c   : > { %584 = vst.msk [vmem:[#allocation2 + $0xe0] sm:$0xff] %vm555_vm1, %v516_v21  ;;  %v1287_v7 = vpop.permute.xlu1 %1286 }
 0x29d   : > { %1356 = vst.msk [vmem:[#allocation2 + $0xd8] sm:$0xff] %vm1328_vm6, %v1287_v7  ;;  %v1271_v48 = vpop.permute.xlu0 %1270 }
 0x29e   : > { %1348 = vst.msk [vmem:[#allocation2 + $0x98] sm:$0xff] %vm1328_vm6, %v1271_v48 }
 0x2a1   : > { %1486 = vrot.lane.b32.xlu2 %v3335_v26, %s5505_s16  ;;  %1292 = vrot.lane.b32.xlu1 %v4733_v10, %s3588_s17  ;;  %v3368_v10 = vld [vmem:[%s3701_s25 + $0x1a1] sm:$0xff] }
 0x2a2   : > { %1099 = vrot.lane.b32.xlu0 %v4713_v40, %s5504_s27 }
 0x2a3   : > { %v887_v38 = vpop.permute.xlu2 %886 }
 0x2a4   : > { %v1481_v20 = vpop.permute.xlu1 %1480 }
 0x2a5   : > { %1550 = vst.msk [vmem:[#allocation2 + $0xd8] sm:$0xff] %vm1522_vm7, %v1481_v20  ;;  %v1465_v46 = vpop.permute.xlu0 %1464 }
 0x2a6   : > { %1542 = vst.msk [vmem:[#allocation2 + $0x98] sm:$0xff] %vm1522_vm7, %v1465_v46 }
 0x2a7   : > { %v2151_v18 = vpop.f32.mrf.mxu2 }
 0x2a8   : > { %v2152_v40 = vadd.f32 %v4771_v13, %v2151_v18 }
 0x2a9   : > { %521 = vrot.lane.b32.xlu2 %v4651_v63, %s5506_s22  ;;  %1872 = vrot.lane.b32.xlu1 %v3399_v42, %s5496_s21  ;;  %s3594_s22 = smov 48  }
 0x2aa   : > { %2214 = vst.msk [vmem:[#allocation4 + $0x88] sm:$0xff] %vm2196_vm11, %v2152_v40  ;;  %1679 = vrot.lane.b32.xlu0 %v3367_v61, %s3586_s14 }
 0x2ab   : > { %v1096_v15 = vpop.permute.xlu2 %1095 }
 0x2ac   : > { %v1674_v25 = vpop.permute.xlu1 %1673 }
 0x2ad   : > { %1743 = vst.msk [vmem:[#allocation2 + $0xd8] sm:$0xff] %vm1715_vm8, %v1674_v25  ;;  %v1658_v37 = vpop.permute.xlu0 %1657 }
 0x2ae   : > { %1735 = vst.msk [vmem:[#allocation2 + $0x98] sm:$0xff] %vm1715_vm8, %v1658_v37 }
 0x2af   : > { %1928 = vst.msk [vmem:[#allocation2 + $0x98] sm:$0xff] %vm1908_vm9, %v1851_v34 }
 0x2b1   : > { %1101 = vrot.lane.b32.xlu2 %v3366_v62, %s5504_s27  ;;  %908 = vrot.lane.b32.xlu1 %v4792_v28, %s3584_s28  ;;  %s5494_s28 = smov 40   ;;  %v2245_v2 = vld [vmem:[#allocation4 + $0x80] ss:$2 sm:$0xff] }
 0x2b2   : > { %714 = vrot.lane.b32.xlu0 %v4670_v35, %s3585_s29  ;;  %v2127_v63 = vpop.f32.mrf.mxu0 }
 0x2b3   : > { %v2128_v47 = vadd.f32 %v4771_v13, %v2127_v63  ;;  %v1467_v6 = vpop.permute.xlu2 %1466 }
 0x2b4   : > { %v500_v27 = vpop.permute.xlu1 %499 }
 0x2b5   : > { %2206 = vst.msk [vmem:[#allocation4 + $0x48] sm:$0xff] %vm2196_vm11, %v2128_v47  ;;  %v1867_v50 = vpop.permute.xlu0 %1866  ;;  %v2352_v47 = vld [vmem:[#allocation6] sm:$0xff] }
 0x2b6   : > { %576 = vst.msk [vmem:[#allocation2 + $0xa0] sm:$0xff] %vm555_vm1, %v500_v27  ;;  %v1960_v17 = vld [vmem:[#allocation2 + $0x98] sm:$0xff] }
 0x2b7   : > { %1936 = vst.msk [vmem:[#allocation2 + $0xd8] sm:$0xff] %vm1908_vm9, %v1867_v50  ;;  %3421 = vmatmul.msk.f32.gmra.mxu2 %vm1982_vm10, %v1960_v17 }
 0x2b8   : > { %2360 = vst.msk [vmem:[#allocation3] sm:$0xff] %vm2196_vm11, %v2352_v47 }
 0x2b9   : > { %1681 = vrot.lane.b32.xlu2 %v3368_v10, %s3586_s14  ;;  %1488 = vrot.lane.b32.xlu1 %v3336_v9, %s5505_s16  ;;  %s5498_s14 = smov 64  }
 0x2ba   : > { %1294 = vrot.lane.b32.xlu0 %v4805_v39, %s3588_s17  ;;  %s5500_s17 = smov 56  }
 0x2bb   : > { %v1676_v35 = vpop.permute.xlu2 %1675 }
 0x2bc   : > { %v709_v30 = vpop.permute.xlu1 %708  ;;  %v2237_v17 = vld [vmem:[#allocation4 + $0x40] ss:$2 sm:$0xff]  ;;  %v2269_v10 = vld [vmem:[#allocation4 + $0x41] ss:$2 sm:$0xff] }
 0x2bd   : > { %777 = vst.msk [vmem:[#allocation2 + $0xe0] sm:$0xff] %vm748_vm3, %v709_v30  ;;  %v693_v32 = vpop.permute.xlu0 %692  ;;  %v2296_v30 = vmax.f32 %v2237_v17, %v2269_v10 }
 0x2be   : > { %769 = vst.msk [vmem:[#allocation2 + $0xa0] sm:$0xff] %vm748_vm3, %v693_v32  ;;  %v1968_v11 = vld [vmem:[#allocation2 + $0xd8] sm:$0xff] }
 0x2bf   : > { %963 = vst.msk [vmem:[#allocation2 + $0xa0] sm:$0xff] %vm942_vm4, %v887_v38  ;;  %3429 = vmatmul.msk.f32.gmra.mxu3 %vm1982_vm10, %v1968_v11 }
 0x2c1   : > { %2433 = vrot.lane.b32.xlu2 %v2417_v43, %s5504_s27  ;;  %2384 = vrot.lane.b32.xlu1 %v2368_v45, %s3585_s29 }
 0x2c2   : > { %1874 = vrot.lane.b32.xlu0 %v3400_v36, %s5496_s21 }
 0x2c3   : > { %v502_v55 = vpop.permute.xlu2 %501 }
 0x2c4   : > { %577 = vst.msk [vmem:[#allocation2 + $0xa8] sm:$0xff] %vm555_vm1, %v502_v55  ;;  %v1080_v56 = vpop.permute.xlu1 %1079 }
 0x2c5   : > { %1156 = vst.msk [vmem:[#allocation2 + $0xa0] sm:$0xff] %vm1135_vm5, %v1080_v56  ;;  %v903_v19 = vpop.permute.xlu0 %902 }
 0x2c6   : > { %971 = vst.msk [vmem:[#allocation2 + $0xe0] sm:$0xff] %vm942_vm4, %v903_v19  ;;  %v2777_v19 = vld [vmem:[%s5481_s3 + $0x40] sm:$0xff] }
 0x2c7   : > { %1164 = vst.msk [vmem:[#allocation2 + $0xe0] sm:$0xff] %vm1135_vm5, %v1096_v15  ;;  %2814 = vmatpush.msra.mxu1 %v2777_v19 }
 0x2c9   : > { %v2175_v22 = vpop.f32.mrf.mxu3  ;;  %2580 = vrot.lane.b32.xlu2 %v2564_v12, %s5494_s28  ;;  %2531 = vrot.lane.b32.xlu1 %v2515_v8, %s5496_s21 }
 0x2ca   : > { %v2176_v0 = vadd.f32 %v4771_v13, %v2175_v22  ;;  %2482 = vrot.lane.b32.xlu0 %v4418_v4, %s5505_s16 }
 0x2cb   : > { %v711_v3 = vpop.permute.xlu2 %710 }
 0x2cc   : > { %2222 = vst.msk [vmem:[#allocation4 + $0xc8] sm:$0xff] %vm2196_vm11, %v2176_v0  ;;  %v1289_v16 = vpop.permute.xlu1 %1288 }
 0x2cd   : > { %1357 = vst.msk [vmem:[#allocation2 + $0xe0] sm:$0xff] %vm1328_vm6, %v1289_v16  ;;  %v1273_v33 = vpop.permute.xlu0 %1272  ;;  %v2775_v16 = vld [vmem:[%s5481_s3 + $0x30] sm:$0xff] }
 0x2ce   : > { %1349 = vst.msk [vmem:[#allocation2 + $0xa0] sm:$0xff] %vm1328_vm6, %v1273_v33  ;;  %v2774_v33 = vld [vmem:[%s5481_s3 + $0x28] sm:$0xff] }
 0x2cf   : > { %1543 = vst.msk [vmem:[#allocation2 + $0xa0] sm:$0xff] %vm1522_vm7, %v1467_v6 }
 0x2d1   : > { %2728 = vrot.lane.b32.xlu2 %v4893_v31, %s5498_s14  ;;  %2679 = vrot.lane.b32.xlu1 %v4895_v51, %s5500_s17 }
 0x2d2   : > { %2630 = vrot.lane.b32.xlu0 %v4656_v44, %s3594_s22 }
 0x2d3   : > { %v1082_v4 = vpop.permute.xlu2 %1081 }
 0x2d4   : > { %v1660_v54 = vpop.permute.xlu1 %1659 }
 0x2d5   : > { %1736 = vst.msk [vmem:[#allocation2 + $0xa0] sm:$0xff] %vm1715_vm8, %v1660_v54  ;;  %v1483_v23 = vpop.permute.xlu0 %1482 }
 0x2d6   : > { %1551 = vst.msk [vmem:[#allocation2 + $0xe0] sm:$0xff] %vm1522_vm7, %v1483_v23  ;;  %v2773_v23 = vld [vmem:[%s5481_s3 + $0x20] sm:$0xff] }
 0x2d7   : > { %1744 = vst.msk [vmem:[#allocation2 + $0xe0] sm:$0xff] %vm1715_vm8, %v1676_v35 }
 0x2d9   : > { %2484 = vrot.lane.b32.xlu2 %v4656_v44, %s5505_s16  ;;  %2435 = vrot.lane.b32.xlu1 %v2564_v12, %s5504_s27 }
 0x2da   : > { %2386 = vrot.lane.b32.xlu0 %v2515_v8, %s3585_s29 }
 0x2db   : > { %v1291_v28 = vpop.permute.xlu2 %1290 }
 0x2dc   : > { %v1869_v52 = vpop.permute.xlu1 %1868 }
 0x2dd   : > { %1937 = vst.msk [vmem:[#allocation2 + $0xe0] sm:$0xff] %vm1908_vm9, %v1869_v52  ;;  %v1853_v59 = vpop.permute.xlu0 %1852  ;;  %v2771_v52 = vld [vmem:[%s5481_s3 + $0x10] sm:$0xff] }
 0x2de   : > { %1929 = vst.msk [vmem:[#allocation2 + $0xa0] sm:$0xff] %vm1908_vm9, %v1853_v59 }
 0x2e1   : > { %2582 = vrot.lane.b32.xlu1 %v4893_v31, %s5494_s28  ;;  %s5510_s28 = smov 64  }
 0x2e2   : > { %2533 = vrot.lane.b32.xlu0 %v4895_v51, %s5496_s21  ;;  %s5509_s21 = smov 56  }
 0x2e3   : > { %v1662_v57 = vpop.permute.xlu2 %1661 }
 0x2e4   : > { %v695_v24 = vpop.permute.xlu1 %694  ;;  %v1969_v44 = vld [vmem:[#allocation2 + $0xe0] sm:$0xff] }
 0x2e5   : > { %770 = vst.msk [vmem:[#allocation2 + $0xa8] sm:$0xff] %vm748_vm3, %v695_v24  ;;  %v518_v58 = vpop.permute.xlu0 %517  ;;  %v1961_v49 = vld [vmem:[#allocation2 + $0xa0] sm:$0xff]  ;;  %3430 = vmatmul.msk.f32.gmra.mxu3 %vm1982_vm10, %v1969_v44 }
 0x2e6   : > { %585 = vst.msk [vmem:[#allocation2 + $0xe8] sm:$0xff] %vm555_vm1, %v518_v58  ;;  %3422 = vmatmul.msk.f32.gmra.mxu2 %vm1982_vm10, %v1961_v49 }
 0x2e7   : > { %778 = vst.msk [vmem:[#allocation2 + $0xe8] sm:$0xff] %vm748_vm3, %v711_v3  ;;  %v2178_v39 = vpop.f32.mrf.mxu3  ;;  %v2776_v3 = vld [vmem:[%s5481_s3 + $0x38] sm:$0xff] }
 0x2e8   : > { %v2179_v34 = vadd.f32 %v4771_v13, %v2178_v39  ;;  %2815 = vmatpush.msra.mxu1 %v2776_v3 }
 0x2ea   : > { %2223 = vst.msk [vmem:[#allocation4 + $0xd0] sm:$0xff] %vm2196_vm11, %v2179_v34  ;;  %2816 = vmatpush.msra.mxu1 %v2775_v16  ;;  %v2665_v34 = vld [vmem:[#allocation6 + $0x41] sm:$0xff] }
 0x2eb   : > { %v1871_v53 = vpop.permute.xlu2 %1870 }
 0x2ec   : > { %v905_v62 = vpop.permute.xlu1 %904  ;;  %2817 = vmatpush.msra.mxu1 %v2774_v33 }
 0x2ed   : > { %972 = vst.msk [vmem:[#allocation2 + $0xe8] sm:$0xff] %vm942_vm4, %v905_v62  ;;  %v889_v5 = vpop.permute.xlu0 %888 }
 0x2ee   : > { %964 = vst.msk [vmem:[#allocation2 + $0xa8] sm:$0xff] %vm942_vm4, %v889_v5  ;;  %2818 = vmatpush.msra.mxu1 %v2773_v23  ;;  %v2714_v5 = vld [vmem:[#allocation6 + $0x42] sm:$0xff] }
 0x2ef   : > { %1157 = vst.msk [vmem:[#allocation2 + $0xa8] sm:$0xff] %vm1135_vm5, %v1082_v4 }
 0x2f3   : > { %v2130_v1 = vpop.f32.mrf.mxu0  ;;  %v907_v21 = vpop.permute.xlu2 %906 }
 0x2f4   : > { %v2131_v7 = vadd.f32 %v4771_v13, %v2130_v1  ;;  %v1275_v60 = vpop.permute.xlu1 %1274  ;;  %v2277_v1 = vld [vmem:[#allocation4 + $0x81] ss:$2 sm:$0xff] }
 0x2f5   : > { %1350 = vst.msk [vmem:[#allocation2 + $0xa8] sm:$0xff] %vm1328_vm6, %v1275_v60  ;;  %v1098_v48 = vpop.permute.xlu0 %1097 }
 0x2f6   : > { %2207 = vst.msk [vmem:[#allocation4 + $0x50] sm:$0xff] %vm2196_vm11, %v2131_v7 }
 0x2f7   : > { %1165 = vst.msk [vmem:[#allocation2 + $0xe8] sm:$0xff] %vm1135_vm5, %v1098_v48 }
 0x2f8   : > { %1358 = vst.msk [vmem:[#allocation2 + $0xe8] sm:$0xff] %vm1328_vm6, %v1291_v28  ;;  %v2772_v28 = vld [vmem:[%s5481_s3 + $0x18] sm:$0xff] }
 0x2f9   : > { %2819 = vmatpush.msra.mxu1 %v2772_v28 }
 0x2fb   : > { %v1487_v26 = vpop.permute.xlu2 %1486  ;;  %2820 = vmatpush.msra.mxu1 %v2771_v52 }
 0x2fc   : > { %v1485_v38 = vpop.permute.xlu1 %1484 }
 0x2fd   : > { %1552 = vst.msk [vmem:[#allocation2 + $0xe8] sm:$0xff] %vm1522_vm7, %v1485_v38  ;;  %v1469_v14 = vpop.permute.xlu0 %1468  ;;  %v2300_v38 = vmax.f32 %v2245_v2, %v2277_v1 }
 0x2fe   : > { %1544 = vst.msk [vmem:[#allocation2 + $0xa8] sm:$0xff] %vm1522_vm7, %v1469_v14 }
 0x2ff   : > { %1737 = vst.msk [vmem:[#allocation2 + $0xa8] sm:$0xff] %vm1715_vm8, %v1662_v57  ;;  %v2770_v57 = vld [vmem:[%s5481_s3 + $0x8] sm:$0xff] }
 0x300   : > { %v2154_v20 = vpop.f32.mrf.mxu2  ;;  %2821 = vmatpush.msra.mxu1 %v2770_v57 }
 0x301   : > { %v2155_v46 = vadd.f32 %v4771_v13, %v2154_v20 }
 0x303   : > { %v522_v42 = vpop.permute.xlu2 %521  ;;  %2215 = vst.msk [vmem:[#allocation4 + $0x90] sm:$0xff] %vm2196_vm11, %v2155_v46 }
 0x304   : > { %587 = vst.msk [vmem:[#allocation2 + $0xf8] sm:$0xff] %vm555_vm1, %v522_v42  ;;  %v1855_v18 = vpop.permute.xlu1 %1854 }
 0x305   : > { %1930 = vst.msk [vmem:[#allocation2 + $0xa8] sm:$0xff] %vm1908_vm9, %v1855_v18  ;;  %v1678_v61 = vpop.permute.xlu0 %1677  ;;  %v2253_v18 = vld [vmem:[#allocation4 + $0xc0] ss:$2 sm:$0xff] }
 0x306   : > { %1745 = vst.msk [vmem:[#allocation2 + $0xe8] sm:$0xff] %vm1715_vm8, %v1678_v61  ;;  %v2285_v61 = vld [vmem:[#allocation4 + $0xc1] ss:$2 sm:$0xff] }
 0x307   : > { %1938 = vst.msk [vmem:[#allocation2 + $0xe8] sm:$0xff] %vm1908_vm9, %v1871_v53 }
 0x30b   : > { %v1102_v43 = vpop.permute.xlu2 %1101 }
 0x30c   : > { %v713_v40 = vpop.permute.xlu1 %712  ;;  %v1962_v15 = vld [vmem:[#allocation2 + $0xa8] sm:$0xff] }
 0x30d   : > { %v520_v25 = vpop.permute.xlu0 %519  ;;  %3423 = vmatmul.msk.f32.gmra.mxu2 %vm1982_vm10, %v1962_v15 }
 0x30e   : > { %586 = vst.msk [vmem:[#allocation2 + $0xf0] sm:$0xff] %vm555_vm1, %v520_v25  ;;  %v1970_v37 = vld [vmem:[#allocation2 + $0xe8] sm:$0xff]  ;;  %vm2555_vm1 = vcmask 326912  }
 0x30f   : > { %779 = vst.msk [vmem:[#allocation2 + $0xf0] sm:$0xff] %vm748_vm3, %v713_v40  ;;  %3431 = vmatmul.msk.f32.gmra.mxu3 %vm1982_vm10, %v1970_v37  ;;  %v2304_v37 = vmax.f32 %v2253_v18, %v2285_v61 }
 0x310   : > { %973 = vst.msk [vmem:[#allocation2 + $0xf0] sm:$0xff] %vm942_vm4, %v907_v21 }
 0x311   : > { %v2133_v63 = vpop.f32.mrf.mxu0 }
 0x312   : > { %v2134_v6 = vadd.f32 %v4771_v13, %v2133_v63 }
 0x313   : > { %v1682_v12 = vpop.permute.xlu2 %1681 }
 0x314   : > { %2208 = vst.msk [vmem:[#allocation4 + $0x58] sm:$0xff] %vm2196_vm11, %v2134_v6  ;;  %v1293_v27 = vpop.permute.xlu1 %1292 }
 0x315   : > { %v1100_v50 = vpop.permute.xlu0 %1099 }
 0x316   : > { %1166 = vst.msk [vmem:[#allocation2 + $0xf0] sm:$0xff] %vm1135_vm5, %v1100_v50 }
 0x317   : > { %1359 = vst.msk [vmem:[#allocation2 + $0xf0] sm:$0xff] %vm1328_vm6, %v1293_v27 }
 0x318   : > { %1553 = vst.msk [vmem:[#allocation2 + $0xf0] sm:$0xff] %vm1522_vm7, %v1487_v26 }
 0x31b   : > { %v2239_v9 = vld [vmem:[#allocation4 + $0x50] ss:$2 sm:$0xff]  ;;  %v2271_v35 = vld [vmem:[#allocation4 + $0x51] ss:$2 sm:$0xff]  ;;  %v2434_v59 = vpop.permute.xlu2 %2433 }
 0x31c   : > { %v2297_v32 = vmax.f32 %v2239_v9, %v2271_v35  ;;  %v1873_v11 = vpop.permute.xlu1 %1872 }
 0x31d   : > { %v1680_v45 = vpop.permute.xlu0 %1679 }
 0x31e   : > { %1746 = vst.msk [vmem:[#allocation2 + $0xf0] sm:$0xff] %vm1715_vm8, %v1680_v45  ;;  %v2310_v36 = vmax.f32 %v2296_v30, %v2297_v32 }
 0x31f   : > { %1939 = vst.msk [vmem:[#allocation2 + $0xf0] sm:$0xff] %vm1908_vm9, %v1873_v11 }
 0x320   : > { %2346 = vst.msk [vmem:[#allocation6 + $0x31] sm:$0xff] %vm2196_vm11, %v2310_v36 }
 0x323   : > { %v2581_v58 = vpop.permute.xlu2 %2580 }
 0x324   : > { %v909_v55 = vpop.permute.xlu1 %908 }
 0x325   : > { %v715_v56 = vpop.permute.xlu0 %714 }
 0x326   : > { %780 = vst.msk [vmem:[#allocation2 + $0xf8] sm:$0xff] %vm748_vm3, %v715_v56  ;;  %v1971_v29 = vld [vmem:[#allocation2 + $0xf0] sm:$0xff]  ;;  %vm2654_vm3 = vcmask 458112  }
 0x327   : > { %974 = vst.msk [vmem:[#allocation2 + $0xf8] sm:$0xff] %vm942_vm4, %v909_v55  ;;  %v2615_v8 = vld [vmem:[#allocation6 + $0x30] sm:$0xff]  ;;  %3432 = vmatmul.msk.f32.gmra.mxu3 %vm1982_vm10, %v1971_v29  ;;  %vm2703_vm4 = vcmask 523712  }
 0x328   : > { %v4961_v22 = vld [vmem:[#allocation6 + $0x32] sm:$0xff]  ;;  %1167 = vst.msk [vmem:[#allocation2 + $0xf8] sm:$0xff] %vm1135_vm5, %v1102_v43  ;;  %2632 = vrot.lane.b32.xlu2 %v2615_v8, %s3594_s22  ;;  %vm2752_vm5 = vcmask 589312  }
 0x329   : > { %v2664_v0 = vld [vmem:[#allocation6 + $0x31] sm:$0xff]  ;;  %2730 = vrot.lane.b32.xlu1 %v4961_v22, %s5498_s14  ;;  %2363 = vst.msk [vmem:[#allocation3 + $0x18] sm:$0xff] %vm2196_vm11, %v2615_v8  ;;  %s3145_s14 = scalar_lea.hbm %s5487_s9, %s3669_s13 }
 0x32a   : > { %2681 = vrot.lane.b32.xlu0 %v2664_v0, %s5500_s17 }
 0x32b   : > { %v2729_v14 = vpop.permute.xlu2 %2728 }
 0x32c   : > { %v1489_v4 = vpop.permute.xlu1 %1488 }
 0x32d   : > { %v1295_v54 = vpop.permute.xlu0 %1294 }
 0x32e   : > { %1360 = vst.msk [vmem:[#allocation2 + $0xf8] sm:$0xff] %vm1328_vm6, %v1295_v54  ;;  %vm2782_vm6 = vcmask 588800  }
 0x32f   : > { %1554 = vst.msk [vmem:[#allocation2 + $0xf8] sm:$0xff] %vm1522_vm7, %v1489_v4  ;;  %vm2848_vm7 = vcmask 130048  }
 0x330   : > { %1747 = vst.msk [vmem:[#allocation2 + $0xf8] sm:$0xff] %vm1715_vm8, %v1682_v12  ;;  %2388 = vrot.lane.b32.xlu2 %v4895_v51, %s3585_s29  ;;  %v2769_v51 = vld [vmem:[%s5481_s3] sm:$0xff]  ;;  %vm2892_vm8 = vcmask 125952  }
 0x331   : > { %2486 = vrot.lane.b32.xlu1 %v2615_v8, %s5505_s16  ;;  %2822 = vmatpush.msra.mxu1 %v2769_v51  ;;  %v2251_v8 = vld [vmem:[#allocation4 + $0xb0] ss:$2 sm:$0xff] }
 0x332   : > { %2437 = vrot.lane.b32.xlu0 %v4893_v31, %s5504_s27 }
 0x333   : > { %v2485_v6 = vpop.permute.xlu2 %2484 }
 0x334   : > { %v2385_v24 = vpop.permute.xlu1 %2384 }
 0x335   : > { %2409 = vst.msk [vmem:[#allocation3] sm:$0xff] %vm2408_vm14, %v2385_v24  ;;  %v1875_v44 = vpop.permute.xlu0 %1874 }
 0x336   : > { %1940 = vst.msk [vmem:[#allocation2 + $0xf8] sm:$0xff] %vm1908_vm9, %v1875_v44 }
 0x337   : > { %2458 = vst.msk [vmem:[#allocation3] sm:$0xff] %vm2457_vm15, %v2434_v59 }
 0x338   : > { %2535 = vrot.lane.b32.xlu2 %v2664_v0, %s5507_s24 }
 0x339   : > { %2634 = vrot.lane.b32.xlu1 %v4737_v41, %s3594_s22 }
 0x33a   : > { %2584 = vrot.lane.b32.xlu0 %v4961_v22, %s5508_s23  ;;  %v2157_v31 = vpop.f32.mrf.mxu2 }
 0x33b   : > { %v2158_v49 = vadd.f32 %v4771_v13, %v2157_v31 }
 0x33c   : > { %v2532_v39 = vpop.permute.xlu1 %2531 }
 0x33d   : > { %2216 = vst.msk [vmem:[#allocation4 + $0x98] sm:$0xff] %vm2196_vm11, %v2158_v49  ;;  %v2483_v53 = vpop.permute.xlu0 %2482  ;;  %v1972_v62 = vld [vmem:[#allocation2 + $0xf8] sm:$0xff] }
 0x33e   : > { %2507 = vst.msk [vmem:[#allocation3] sm:$0xff] %vm2506_vm0, %v2483_v53  ;;  %3433 = vmatmul.msk.f32.gmra.mxu3 %vm1982_vm10, %v1972_v62 }
 0x33f   : > { %2556 = vst.msk [vmem:[#allocation3] sm:$0xff] %vm2555_vm1, %v2532_v39 }
 0x340   : > { %2683 = vrot.lane.b32.xlu2 %v2665_v34, %s5509_s21  ;;  %2605 = vst.msk [vmem:[#allocation3] sm:$0xff] %vm2604_vm2, %v2581_v58 }
 0x341   : > { %2390 = vrot.lane.b32.xlu1 %v2664_v0, %s3585_s29 }
 0x342   : > { %2732 = vrot.lane.b32.xlu0 %v2714_v5, %s5510_s28  ;;  %v2181_v21 = vpop.f32.mrf.mxu3 }
 0x343   : > { %v2182_v7 = vadd.f32 %v4771_v13, %v2181_v21 }
 0x344   : > { %v2247_v60 = vld [vmem:[#allocation4 + $0x90] ss:$2 sm:$0xff]  ;;  %v2279_v48 = vld [vmem:[#allocation4 + $0x91] ss:$2 sm:$0xff]  ;;  %v2680_v26 = vpop.permute.xlu1 %2679 }
 0x345   : > { %v2301_v20 = vmax.f32 %v2247_v60, %v2279_v48  ;;  %2224 = vst.msk [vmem:[#allocation4 + $0xd8] sm:$0xff] %vm2196_vm11, %v2182_v7  ;;  %v2631_v46 = vpop.permute.xlu0 %2630 }
 0x346   : > { %2655 = vst.msk [vmem:[#allocation3] sm:$0xff] %vm2654_vm3, %v2631_v46 }
 0x347   : > { %2704 = vst.msk [vmem:[#allocation3] sm:$0xff] %vm2703_vm4, %v2680_v26  ;;  %v2312_v42 = vmax.f32 %v2300_v38, %v2301_v20 }
 0x348   : > { %2753 = vst.msk [vmem:[#allocation3] sm:$0xff] %vm2752_vm5, %v2729_v14  ;;  %2439 = vrot.lane.b32.xlu2 %v4961_v22, %s5504_s27  ;;  %v2283_v22 = vld [vmem:[#allocation4 + $0xb1] ss:$2 sm:$0xff] }
 0x349   : > { %2537 = vrot.lane.b32.xlu1 %v2665_v34, %s5507_s24  ;;  %2348 = vst.msk [vmem:[#allocation6 + $0x51] sm:$0xff] %vm2196_vm11, %v2312_v42  ;;  %v2303_v4 = vmax.f32 %v2251_v8, %v2283_v22 }
 0x34a   : > { %2488 = vrot.lane.b32.xlu0 %v4737_v41, %s5505_s16 }
 0x34c   : > { %v2255_v40 = vld [vmem:[#allocation4 + $0xd0] ss:$2 sm:$0xff]  ;;  %v2287_v15 = vld [vmem:[#allocation4 + $0xd1] ss:$2 sm:$0xff]  ;;  %v2436_v25 = vpop.permute.xlu1 %2435 }
 0x34d   : > { %v2305_v63 = vmax.f32 %v2255_v40, %v2287_v15  ;;  %v2387_v47 = vpop.permute.xlu0 %2386 }
 0x34e   : > { %2410 = vst.msk [vmem:[#allocation3 + $0x8] sm:$0xff] %vm2408_vm14, %v2387_v47 }
 0x34f   : > { %2459 = vst.msk [vmem:[#allocation3 + $0x8] sm:$0xff] %vm2457_vm15, %v2436_v25  ;;  %v2761_v27 = vld [vmem:[#allocation3] sm:$0xff]  ;;  %v2314_v50 = vmax.f32 %v2304_v37, %v2305_v63 }
 0x350   : > { %2508 = vst.msk [vmem:[#allocation3 + $0x8] sm:$0xff] %vm2506_vm0, %v2485_v6  ;;  %3434 = vmatmul.msk.f32.vlgmr.msra.gmra.mxu1 %vm2782_vm6, %v2761_v27  ;;  %2586 = vrot.lane.b32.xlu2 %v2714_v5, %s5508_s23  ;;  %v5035_v41 = vld [vmem:[#allocation6 + $0x51] sm:$0xff] }
 0x351   : > { %v2617_v17 = vld [vmem:[#allocation6 + $0x50] sm:$0xff]  ;;  %2685 = vrot.lane.b32.xlu1 %v5035_v41, %s5509_s21  ;;  %2350 = vst.msk [vmem:[#allocation6 + $0x71] sm:$0xff] %vm2196_vm11, %v2314_v50 }
 0x352   : > { %2636 = vrot.lane.b32.xlu0 %v2617_v17, %s3594_s22  ;;  %2365 = vst.msk [vmem:[#allocation3 + $0x28] sm:$0xff] %vm2196_vm11, %v2617_v17  ;;  %v5044_v35 = vld [vmem:[#allocation6 + $0x52] sm:$0xff] }
 0x354   : > { %v2583_v10 = vpop.permute.xlu1 %2582 }
 0x355   : > { %v2534_v9 = vpop.permute.xlu0 %2533 }
 0x356   : > { %2557 = vst.msk [vmem:[#allocation3 + $0x8] sm:$0xff] %vm2555_vm1, %v2534_v9 }
 0x357   : > { %2606 = vst.msk [vmem:[#allocation3 + $0x8] sm:$0xff] %vm2604_vm2, %v2583_v10 }
 0x358   : > { %2734 = vrot.lane.b32.xlu2 %v5044_v35, %s5510_s28  ;;  %v5048_v30 = vld [vmem:[#allocation6 + $0x70] sm:$0xff] }
 0x359   : > { %2441 = vrot.lane.b32.xlu1 %v2714_v5, %s5504_s27  ;;  %2367 = vst.msk [vmem:[#allocation3 + $0x38] sm:$0xff] %vm2196_vm11, %v5048_v30  ;;  %v2668_v60 = vld [vmem:[#allocation6 + $0x71] sm:$0xff] }
 0x35a   : > { %2392 = vrot.lane.b32.xlu0 %v2665_v34, %s3585_s29  ;;  %v2717_v48 = vld [vmem:[#allocation6 + $0x72] sm:$0xff] }
 0x360   : > { %2490 = vrot.lane.b32.xlu2 %v2617_v17, %s5505_s16 }
 0x361   : > { %2588 = vrot.lane.b32.xlu1 %v5044_v35, %s5508_s23 }
 0x362   : > { %2539 = vrot.lane.b32.xlu0 %v5035_v41, %s5507_s24 }
 0x368   : > { %v2184_v32 = vpop.f32.mrf.mxu3 }
 0x369   : > { %v2160_v11 = vpop.f32.mrf.mxu2  ;;  %v2185_v43 = vadd.f32 %v4771_v13, %v2184_v32  ;;  %v2621_v32 = vld [vmem:[#allocation6 + $0x90] sm:$0xff] }
 0x36a   : > { %v2161_v45 = vadd.f32 %v4771_v13, %v2160_v11  ;;  %v2719_v11 = vld [vmem:[#allocation6 + $0x92] sm:$0xff] }
 0x36b   : > { %2225 = vst.msk [vmem:[#allocation4 + $0xe0] sm:$0xff] %vm2196_vm11, %v2185_v43  ;;  %v2670_v43 = vld [vmem:[#allocation6 + $0x91] sm:$0xff] }
 0x36c   : > { %2217 = vst.msk [vmem:[#allocation4 + $0xa0] sm:$0xff] %vm2196_vm11, %v2161_v45 }
 0x382   : > { %v2633_v36 = vpop.permute.xlu2 %2632 }
 0x383   : > { %2656 = vst.msk [vmem:[#allocation3 + $0x8] sm:$0xff] %vm2654_vm3, %v2633_v36 }
 0x38a   : > { %v2389_v55 = vpop.permute.xlu2 %2388 }
 0x38b   : > { %2411 = vst.msk [vmem:[#allocation3 + $0x10] sm:$0xff] %vm2408_vm14, %v2389_v55 }
 0x390   : > { %v2163_v56 = vpop.f32.mrf.mxu2 }
 0x391   : > { %v2164_v19 = vadd.f32 %v4771_v13, %v2163_v56 }
 0x392   : > { %v2187_v29 = vpop.f32.mrf.mxu3  ;;  %v2536_v16 = vpop.permute.xlu2 %2535 }
 0x393   : > { %2218 = vst.msk [vmem:[#allocation4 + $0xa8] sm:$0xff] %vm2196_vm11, %v2164_v19  ;;  %v2188_v12 = vadd.f32 %v4771_v13, %v2187_v29 }
 0x395   : > { %2226 = vst.msk [vmem:[#allocation4 + $0xe8] sm:$0xff] %vm2196_vm11, %v2188_v12 }
 0x39a   : > { %v2249_v0 = vld [vmem:[#allocation4 + $0xa0] ss:$2 sm:$0xff]  ;;  %v2281_v3 = vld [vmem:[#allocation4 + $0xa1] ss:$2 sm:$0xff]  ;;  %v2684_v57 = vpop.permute.xlu2 %2683 }
 0x39b   : > { %v2731_v33 = vpop.permute.xlu1 %2730  ;;  %v2302_v54 = vmax.f32 %v2249_v0, %v2281_v3 }
 0x39c   : > { %v2682_v23 = vpop.permute.xlu0 %2681  ;;  %v2257_v42 = vld [vmem:[#allocation4 + $0xe0] ss:$2 sm:$0xff]  ;;  %v2289_v18 = vld [vmem:[#allocation4 + $0xe1] ss:$2 sm:$0xff] }
 0x39d   : > { %2705 = vst.msk [vmem:[#allocation3 + $0x8] sm:$0xff] %vm2703_vm4, %v2682_v23  ;;  %v2313_v28 = vmax.f32 %v2302_v54, %v2303_v4  ;;  %v2306_v37 = vmax.f32 %v2257_v42, %v2289_v18 }
 0x39e   : > { %2754 = vst.msk [vmem:[#allocation3 + $0x8] sm:$0xff] %vm2752_vm5, %v2731_v33 }
 0x39f   : > { %2349 = vst.msk [vmem:[#allocation6 + $0x61] sm:$0xff] %vm2196_vm11, %v2313_v28 }
 0x3a2   : > { %v2440_v62 = vpop.permute.xlu2 %2439 }
 0x3a3   : > { %v2487_v52 = vpop.permute.xlu1 %2486 }
 0x3a4   : > { %v2438_v59 = vpop.permute.xlu0 %2437 }
 0x3a5   : > { %2460 = vst.msk [vmem:[#allocation3 + $0x10] sm:$0xff] %vm2457_vm15, %v2438_v59  ;;  %v2762_v24 = vld [vmem:[#allocation3 + $0x8] sm:$0xff] }
 0x3a6   : > { %2509 = vst.msk [vmem:[#allocation3 + $0x10] sm:$0xff] %vm2506_vm0, %v2487_v52  ;;  %3435 = vmatmul.msk.f32.gmra.mxu1 %vm2782_vm6, %v2762_v24  ;;  %v2618_v51 = vld [vmem:[#allocation6 + $0x60] sm:$0xff] }
 0x3a7   : > { %2558 = vst.msk [vmem:[#allocation3 + $0x10] sm:$0xff] %vm2555_vm1, %v2536_v16  ;;  %v2716_v44 = vld [vmem:[#allocation6 + $0x62] sm:$0xff]  ;;  %2638 = vrot.lane.b32.xlu2 %v2618_v51, %s3594_s22 }
 0x3a8   : > { %v2667_v31 = vld [vmem:[#allocation6 + $0x61] sm:$0xff]  ;;  %2736 = vrot.lane.b32.xlu1 %v2716_v44, %s5510_s28  ;;  %2366 = vst.msk [vmem:[#allocation3 + $0x30] sm:$0xff] %vm2196_vm11, %v2618_v51 }
 0x3a9   : > { %2687 = vrot.lane.b32.xlu0 %v2667_v31, %s5509_s21 }
 0x3aa   : > { %v2190_v39 = vpop.f32.mrf.mxu3  ;;  %v2587_v2 = vpop.permute.xlu2 %2586 }
 0x3ab   : > { %v2635_v58 = vpop.permute.xlu1 %2634  ;;  %v2191_v53 = vadd.f32 %v4771_v13, %v2190_v39 }
 0x3ac   : > { %v2585_v49 = vpop.permute.xlu0 %2584 }
 0x3ad   : > { %2607 = vst.msk [vmem:[#allocation3 + $0x10] sm:$0xff] %vm2604_vm2, %v2585_v49 }
 0x3ae   : > { %2657 = vst.msk [vmem:[#allocation3 + $0x10] sm:$0xff] %vm2654_vm3, %v2635_v58 }
 0x3af   : > { %2706 = vst.msk [vmem:[#allocation3 + $0x10] sm:$0xff] %vm2703_vm4, %v2684_v57  ;;  %2394 = vrot.lane.b32.xlu2 %v5035_v41, %s3585_s29 }
 0x3b0   : > { %2227 = vst.msk [vmem:[#allocation4 + $0xf0] sm:$0xff] %vm2196_vm11, %v2191_v53  ;;  %2492 = vrot.lane.b32.xlu1 %v2618_v51, %s5505_s16  ;;  %v2898_v51 = vlaneseq }
 0x3b1   : > { %2443 = vrot.lane.b32.xlu0 %v5044_v35, %s5504_s27 }
 0x3b2   : > { %v2735_v38 = vpop.permute.xlu2 %2734  ;;  %vm5161_vm9 = vcmp.lt.s32.totalorder %v2898_v51, 16  ;;  %vm5188_vm10 = vcmp.ge.s32.totalorder %v2898_v51, 16  ;;  %vm5209_vm13 = vcmp.ge.s32.totalorder %v2898_v51, 32 }
 0x3b3   : > { %v2391_v34 = vpop.permute.xlu1 %2390 }
 0x3b4   : > { %2412 = vst.msk [vmem:[#allocation3 + $0x18] sm:$0xff] %vm2408_vm14, %v2391_v34  ;;  %v2733_v5 = vpop.permute.xlu0 %2732 }
 0x3b5   : > { %2461 = vst.msk [vmem:[#allocation3 + $0x18] sm:$0xff] %vm2457_vm15, %v2440_v62 }
 0x3b6   : > { %2755 = vst.msk [vmem:[#allocation3 + $0x10] sm:$0xff] %vm2752_vm5, %v2733_v5  ;;  %v3027_v5 = vld [vmem:[%s5483_s5 + $0x68] sm:$0xff] }
 0x3b7   : > { %2541 = vrot.lane.b32.xlu2 %v2667_v31, %s5507_s24 }
 0x3b8   : > { %2640 = vrot.lane.b32.xlu1 %v5048_v30, %s3594_s22 }
 0x3b9   : > { %2590 = vrot.lane.b32.xlu0 %v2716_v44, %s5508_s23 }
 0x3ba   : > { %v2491_v47 = vpop.permute.xlu2 %2490 }
 0x3bb   : > { %v2538_v1 = vpop.permute.xlu1 %2537 }
 0x3bc   : > { %v2489_v21 = vpop.permute.xlu0 %2488 }
 0x3bd   : > { %2510 = vst.msk [vmem:[#allocation3 + $0x18] sm:$0xff] %vm2506_vm0, %v2489_v21  ;;  %v2763_v7 = vld [vmem:[#allocation3 + $0x10] sm:$0xff] }
 0x3be   : > { %2559 = vst.msk [vmem:[#allocation3 + $0x18] sm:$0xff] %vm2555_vm1, %v2538_v1  ;;  %3436 = vmatmul.msk.f32.gmra.mxu1 %vm2782_vm6, %v2763_v7 }
 0x3bf   : > { %2608 = vst.msk [vmem:[#allocation3 + $0x18] sm:$0xff] %vm2604_vm2, %v2587_v2  ;;  %2689 = vrot.lane.b32.xlu2 %v2668_v60, %s5509_s21 }
 0x3c0   : > { %2396 = vrot.lane.b32.xlu1 %v2667_v31, %s3585_s29 }
 0x3c1   : > { %2738 = vrot.lane.b32.xlu0 %v2717_v48, %s5510_s28  ;;  %v2193_v26 = vpop.f32.mrf.mxu3 }
 0x3c2   : > { %v2194_v14 = vadd.f32 %v4771_v13, %v2193_v26  ;;  %v5116_v13 = vld [vmem:[%s5482_s4] ss:$0 sm:$0xff] }
 0x3c3   : > { %v2686_v20 = vpop.permute.xlu1 %2685 }
 0x3c4   : > { %v2637_v46 = vpop.permute.xlu0 %2636  ;;  %2228 = vst.msk [vmem:[#allocation4 + $0xf8] sm:$0xff] %vm2196_vm11, %v2194_v14 }
 0x3c5   : > { %2658 = vst.msk [vmem:[#allocation3 + $0x18] sm:$0xff] %vm2654_vm3, %v2637_v46 }
 0x3c6   : > { %2707 = vst.msk [vmem:[#allocation3 + $0x18] sm:$0xff] %vm2703_vm4, %v2686_v20 }
 0x3c7   : > { %2756 = vst.msk [vmem:[#allocation3 + $0x18] sm:$0xff] %vm2752_vm5, %v2735_v38  ;;  %2445 = vrot.lane.b32.xlu2 %v2716_v44, %s5504_s27 }
 0x3c8   : > { %2543 = vrot.lane.b32.xlu1 %v2668_v60, %s5507_s24 }
 0x3c9   : > { %2494 = vrot.lane.b32.xlu0 %v5048_v30, %s5505_s16 }
 0x3cb   : > { %v2259_v61 = vld [vmem:[#allocation4 + $0xf0] ss:$2 sm:$0xff]  ;;  %v2291_v40 = vld [vmem:[#allocation4 + $0xf1] ss:$2 sm:$0xff]  ;;  %v2442_v15 = vpop.permute.xlu1 %2441 }
 0x3cc   : > { %v2393_v25 = vpop.permute.xlu0 %2392  ;;  %v2307_v63 = vmax.f32 %v2259_v61, %v2291_v40 }
 0x3cd   : > { %2413 = vst.msk [vmem:[#allocation3 + $0x20] sm:$0xff] %vm2408_vm14, %v2393_v25  ;;  %v2824_v6 = vpop.f32.mrf.mxu1 }
 0x3ce   : > { %2462 = vst.msk [vmem:[#allocation3 + $0x20] sm:$0xff] %vm2457_vm15, %v2442_v15  ;;  %v2825_v27 = vadd.f32 %v5116_v13, %v2824_v6  ;;  %v2764_v50 = vld [vmem:[#allocation3 + $0x18] sm:$0xff]  ;;  %v2315_v41 = vmax.f32 %v2306_v37, %v2307_v63 }
 0x3cf   : > { %2511 = vst.msk [vmem:[#allocation3 + $0x20] sm:$0xff] %vm2506_vm0, %v2491_v47  ;;  %3437 = vmatmul.msk.f32.gmra.mxu1 %vm2782_vm6, %v2764_v50  ;;  %2592 = vrot.lane.b32.xlu2 %v2717_v48, %s5508_s23 }
 0x3d0   : > { %2849 = vst.msk [vmem:[#allocation5] sm:$0xff] %vm2848_vm7, %v2825_v27  ;;  %v3036_v27 = vld [vmem:[%s5483_s5 + $0xb0] sm:$0xff] }
 0x3d1   : > { %2351 = vst.msk [vmem:[#allocation6 + $0x81] sm:$0xff] %vm2196_vm11, %v2315_v41  ;;  %vm5193_vm11 = vcmp.lt.s32.totalorder %v2898_v51, 32 }
 0x3d2   : > { %vm2910_vm12 = vmand %vm5188_vm10, %vm5193_vm11  ;;  %vm2955_vm10 = vcmp.lt.s32.totalorder %v2898_v51, 112 }
 0x3d3   : > { %v2589_v17 = vpop.permute.xlu1 %2588 }
 0x3d4   : > { %v2540_v10 = vpop.permute.xlu0 %2539 }
 0x3d5   : > { %2560 = vst.msk [vmem:[#allocation3 + $0x20] sm:$0xff] %vm2555_vm1, %v2540_v10 }
 0x3d6   : > { %2609 = vst.msk [vmem:[#allocation3 + $0x20] sm:$0xff] %vm2604_vm2, %v2589_v17 }
 0x3d8   : > { %v2718_v9 = vld [vmem:[#allocation6 + $0x82] sm:$0xff] }
 0x3d9   : > { %v2669_v35 = vld [vmem:[#allocation6 + $0x81] sm:$0xff]  ;;  %2740 = vrot.lane.b32.xlu2 %v2718_v9, %s5510_s28 }
 0x3da   : > { %v2620_v30 = vld [vmem:[#allocation6 + $0x80] sm:$0xff]  ;;  %2691 = vrot.lane.b32.xlu1 %v2669_v35, %s5509_s21 }
 0x3db   : > { %2642 = vrot.lane.b32.xlu0 %v2620_v30, %s3594_s22 }
 0x3e1   : > { %2496 = vrot.lane.b32.xlu2 %v2620_v30, %s5505_s16  ;;  %s3597_s16 = smov 112  }
 0x3e2   : > { %2447 = vrot.lane.b32.xlu1 %v2717_v48, %s5504_s27 }
 0x3e3   : > { %2398 = vrot.lane.b32.xlu0 %v2668_v60, %s3585_s29  ;;  %s3595_s29 = smov 80  }
 0x3e9   : > { %2644 = vrot.lane.b32.xlu2 %v2621_v32, %s3594_s22 }
 0x3ea   : > { %2594 = vrot.lane.b32.xlu1 %v2718_v9, %s5508_s23  ;;  %s323_s23 = sand.u32 1, %s3572_s10  }
 0x3eb   : > { %2545 = vrot.lane.b32.xlu0 %v2669_v35, %s5507_s24  ;;  %s324_s17 = scalar_lea.vmem [#allocation9], %s323_s23 }
 0x3f2   : > { %2742 = vrot.lane.b32.xlu1 %v2719_v11, %s5510_s28 }
 0x3f3   : > { %2693 = vrot.lane.b32.xlu0 %v2670_v43, %s5509_s21 }
 0x401   : > { %v2639_v45 = vpop.permute.xlu2 %2638 }
 0x402   : > { %2659 = vst.msk [vmem:[#allocation3 + $0x20] sm:$0xff] %vm2654_vm3, %v2639_v45 }
 0x409   : > { %v2395_v36 = vpop.permute.xlu2 %2394 }
 0x40a   : > { %2414 = vst.msk [vmem:[#allocation3 + $0x28] sm:$0xff] %vm2408_vm14, %v2395_v36 }
 0x411   : > { %v2542_v19 = vpop.permute.xlu2 %2541 }
 0x419   : > { %v2690_v3 = vpop.permute.xlu2 %2689 }
 0x41a   : > { %v2737_v55 = vpop.permute.xlu1 %2736 }
 0x41b   : > { %v2688_v56 = vpop.permute.xlu0 %2687 }
 0x41c   : > { %2708 = vst.msk [vmem:[#allocation3 + $0x20] sm:$0xff] %vm2703_vm4, %v2688_v56 }
 0x41d   : > { %2757 = vst.msk [vmem:[#allocation3 + $0x20] sm:$0xff] %vm2752_vm5, %v2737_v55 }
 0x421   : > { %v2446_v59 = vpop.permute.xlu2 %2445 }
 0x422   : > { %v2493_v29 = vpop.permute.xlu1 %2492 }
 0x423   : > { %v2444_v12 = vpop.permute.xlu0 %2443  ;;  %v2827_v8 = vpop.f32.mrf.mxu1 }
 0x424   : > { %2463 = vst.msk [vmem:[#allocation3 + $0x28] sm:$0xff] %vm2457_vm15, %v2444_v12  ;;  %v2828_v22 = vadd.f32 %v5116_v13, %v2827_v8  ;;  %v2765_v0 = vld [vmem:[#allocation3 + $0x20] sm:$0xff] }
 0x425   : > { %2512 = vst.msk [vmem:[#allocation3 + $0x28] sm:$0xff] %vm2506_vm0, %v2493_v29  ;;  %3438 = vmatmul.msk.f32.gmra.mxu1 %vm2782_vm6, %v2765_v0 }
 0x426   : > { %2561 = vst.msk [vmem:[#allocation3 + $0x28] sm:$0xff] %vm2555_vm1, %v2542_v19 }
 0x427   : > { %2850 = vst.msk [vmem:[#allocation5 + $0x8] sm:$0xff] %vm2848_vm7, %v2828_v22 }
 0x429   : > { %v2593_v53 = vpop.permute.xlu2 %2592 }
 0x42a   : > { %v2641_v16 = vpop.permute.xlu1 %2640 }
 0x42b   : > { %v2591_v33 = vpop.permute.xlu0 %2590 }
 0x42c   : > { %2610 = vst.msk [vmem:[#allocation3 + $0x28] sm:$0xff] %vm2604_vm2, %v2591_v33 }
 0x42d   : > { %2660 = vst.msk [vmem:[#allocation3 + $0x28] sm:$0xff] %vm2654_vm3, %v2641_v16 }
 0x42e   : > { %v2857_v4 = vld [vmem:[#allocation5] ss:$2 sm:$0xff]  ;;  %v2865_v54 = vld [vmem:[#allocation5 + $0x1] ss:$2 sm:$0xff]  ;;  %2709 = vst.msk [vmem:[#allocation3 + $0x28] sm:$0xff] %vm2703_vm4, %v2690_v3 }
 0x42f   : > { %v2872_v23 = vmax.f32 %v2857_v4, %v2865_v54 }
 0x431   : > { %v2880_v28 = vrot.slane %v2872_v23, 4 }
 0x432   : > { %v2397_v52 = vpop.permute.xlu1 %2396 }
 0x433   : > { %2415 = vst.msk [vmem:[#allocation3 + $0x30] sm:$0xff] %vm2408_vm14, %v2397_v52  ;;  %v2739_v57 = vpop.permute.xlu0 %2738  ;;  %v2888_v24 = vmax.f32 %v2872_v23, %v2880_v28  ;;  %v2741_v1 = vpop.permute.xlu2 %2740 }
 0x434   : > { %2464 = vst.msk [vmem:[#allocation3 + $0x30] sm:$0xff] %vm2457_vm15, %v2446_v59 }
 0x435   : > { %2758 = vst.msk [vmem:[#allocation3 + $0x28] sm:$0xff] %vm2752_vm5, %v2739_v57 }
 0x436   : > { %2893 = vst.msk [vmem:[#allocation7] sm:$0xf] %vm2892_vm8, %v2888_v24 }
 0x43a   : > { %v2544_v44 = vpop.permute.xlu1 %2543 }
 0x43b   : > { %v2495_v31 = vpop.permute.xlu0 %2494  ;;  %v2830_v58 = vpop.f32.mrf.mxu1 }
 0x43c   : > { %2513 = vst.msk [vmem:[#allocation3 + $0x30] sm:$0xff] %vm2506_vm0, %v2495_v31  ;;  %v2831_v49 = vadd.f32 %v5116_v13, %v2830_v58  ;;  %v2766_v39 = vld [vmem:[#allocation3 + $0x28] sm:$0xff]  ;;  %v2497_v38 = vpop.permute.xlu2 %2496 }
 0x43d   : > { %2562 = vst.msk [vmem:[#allocation3 + $0x30] sm:$0xff] %vm2555_vm1, %v2544_v44  ;;  %3439 = vmatmul.msk.f32.gmra.mxu1 %vm2782_vm6, %v2766_v39  ;;  %v2912_v62 = vld [vmem:[#allocation7 + $0x2] sm:$0x1]  ;;  %v2903_v34 = vld [vmem:[#allocation7 + $0x1] sm:$0x1]  ;;  %v3029_v39 = vld [vmem:[%s5483_s5 + $0x78] sm:$0xff] }
 0x43e   : > { %2611 = vst.msk [vmem:[#allocation3 + $0x30] sm:$0xff] %vm2604_vm2, %v2593_v53  ;;  %2914 = vrot.lane.b32.xlu1 %v2912_v62, %s5507_s24  ;;  %2905 = vrot.lane.b32.xlu2 %v2903_v34, %s5504_s27  ;;  %v2897_v2 = vld [vmem:[#allocation7] sm:$0x1]  ;;  %v2921_v3 = vld [vmem:[#allocation7 + $0x3] sm:$0x1]  ;;  %v3045_v53 = vld [vmem:[%s5483_s5 + $0xf8] sm:$0xff] }
 0x43f   : > { %2851 = vst.msk [vmem:[#allocation5 + $0x10] sm:$0xff] %vm2848_vm7, %v2831_v49  ;;  %3052 = vmatpush.msrb.mxu2 %v3029_v39  ;;  %3072 = vmatpush.msrb.mxu3 %v3045_v53  ;;  %v3028_v62 = vld [vmem:[%s5483_s5 + $0x70] sm:$0xff] }
 0x440   : > { %2902 = vst.msk [vmem:[#allocation8] sm:$0x1] %vm5161_vm9, %v2897_v2  ;;  %v3044_v34 = vld [vmem:[%s5483_s5 + $0xf0] sm:$0xff]  ;;  %v3043_v2 = vld [vmem:[%s5483_s5 + $0xe8] sm:$0xff] }
 0x441   : > { %3053 = vmatpush.msrb.mxu2 %v3028_v62  ;;  %3073 = vmatpush.msrb.mxu3 %v3044_v34 }
 0x443   : > { %3054 = vmatpush.msrb.mxu2 %v3027_v5  ;;  %3074 = vmatpush.msrb.mxu3 %v3043_v2 }
 0x444   : > { %v2645_v25 = vpop.permute.xlu2 %2644 }
 0x44c   : > { %v2692_v21 = vpop.permute.xlu1 %2691  ;;  %v2833_v60 = vpop.f32.mrf.mxu1 }
 0x44d   : > { %v2643_v7 = vpop.permute.xlu0 %2642  ;;  %v2834_v48 = vadd.f32 %v5116_v13, %v2833_v60  ;;  %v3041_v60 = vld [vmem:[%s5483_s5 + $0xd8] sm:$0xff] }
 0x44e   : > { %2661 = vst.msk [vmem:[#allocation3 + $0x30] sm:$0xff] %vm2654_vm3, %v2643_v7  ;;  %v3025_v7 = vld [vmem:[%s5483_s5 + $0x58] sm:$0xff] }
 0x44f   : > { %2710 = vst.msk [vmem:[#allocation3 + $0x30] sm:$0xff] %vm2703_vm4, %v2692_v21  ;;  %v3042_v21 = vld [vmem:[%s5483_s5 + $0xe0] sm:$0xff] }
 0x450   : > { %2759 = vst.msk [vmem:[#allocation3 + $0x30] sm:$0xff] %vm2752_vm5, %v2741_v1  ;;  %v3026_v1 = vld [vmem:[%s5483_s5 + $0x60] sm:$0xff]  ;;  %3075 = vmatpush.msrb.mxu3 %v3042_v21 }
 0x451   : > { %2852 = vst.msk [vmem:[#allocation5 + $0x18] sm:$0xff] %vm2848_vm7, %v2834_v48  ;;  %3055 = vmatpush.msrb.mxu2 %v3026_v1  ;;  %v3024_v48 = vld [vmem:[%s5483_s5 + $0x50] sm:$0xff] }
 0x452   : > { %3076 = vmatpush.msrb.mxu3 %v3041_v60 }
 0x453   : > { %3056 = vmatpush.msrb.mxu2 %v3025_v7 }
 0x454   : > { %v2448_v26 = vpop.permute.xlu1 %2447 }
 0x455   : > { %v2399_v14 = vpop.permute.xlu0 %2398  ;;  %3057 = vmatpush.msrb.mxu2 %v3024_v48 }
 0x456   : > { %2416 = vst.msk [vmem:[#allocation3 + $0x38] sm:$0xff] %vm2408_vm14, %v2399_v14  ;;  %vm5214_vm14 = vcmp.lt.s32.totalorder %v2898_v51, 48  ;;  %v3039_v14 = vld [vmem:[%s5483_s5 + $0xc8] sm:$0xff] }
 0x457   : > { %2465 = vst.msk [vmem:[#allocation3 + $0x38] sm:$0xff] %vm2457_vm15, %v2448_v26  ;;  %v2767_v20 = vld [vmem:[#allocation3 + $0x30] sm:$0xff]  ;;  %vm2919_vm15 = vmand %vm5209_vm13, %vm5214_vm14  ;;  %vm2964_vm13 = vcmp.lt.s32.totalorder %v2898_v51, 128 }
 0x458   : > { %v2859_v46 = vld [vmem:[#allocation5 + $0x10] ss:$2 sm:$0xff]  ;;  %v2867_v42 = vld [vmem:[#allocation5 + $0x11] ss:$2 sm:$0xff]  ;;  %2514 = vst.msk [vmem:[#allocation3 + $0x38] sm:$0xff] %vm2506_vm0, %v2497_v38  ;;  %3440 = vmatmul.msk.f32.gmra.mxu1 %vm2782_vm6, %v2767_v20  ;;  %v3023_v38 = vld [vmem:[%s5483_s5 + $0x48] sm:$0xff] }
 0x459   : > { %v2873_v18 = vmax.f32 %v2859_v46, %v2867_v42  ;;  %v3040_v26 = vld [vmem:[%s5483_s5 + $0xd0] sm:$0xff]  ;;  %v3022_v20 = vld [vmem:[%s5483_s5 + $0x40] sm:$0xff]  ;;  %3058 = vmatpush.msrb.mxu2 %v3023_v38  ;;  %vm5292_vm0 = vcmp.ge.s32.totalorder %v2898_v51, 48 }
 0x45a   : > { %3077 = vmatpush.msrb.mxu3 %v3040_v26  ;;  %v3038_v46 = vld [vmem:[%s5483_s5 + $0xc0] sm:$0xff] }
 0x45b   : > { %v2881_v61 = vrot.slane %v2873_v18, 4  ;;  %3059 = vmatpush.msrb.mxu2 %v3022_v20 }
 0x45c   : > { %v2595_v40 = vpop.permute.xlu1 %2594  ;;  %3078 = vmatpush.msrb.mxu3 %v3039_v14 }
 0x45d   : > { %v2546_v15 = vpop.permute.xlu0 %2545  ;;  %v2889_v37 = vmax.f32 %v2873_v18, %v2881_v61 }
 0x45e   : > { %2563 = vst.msk [vmem:[#allocation3 + $0x38] sm:$0xff] %vm2555_vm1, %v2546_v15  ;;  %vm5297_vm1 = vcmp.lt.s32.totalorder %v2898_v51, 64  ;;  %3079 = vmatpush.msrb.mxu3 %v3038_v46 }
 0x45f   : > { %2612 = vst.msk [vmem:[#allocation3 + $0x38] sm:$0xff] %vm2604_vm2, %v2595_v40  ;;  %vm2928_vm2 = vmand %vm5292_vm0, %vm5297_vm1  ;;  %vm3122_vm0 = vcmask 73728  }
 0x460   : > { %2662 = vst.msk [vmem:[#allocation3 + $0x38] sm:$0xff] %vm2654_vm3, %v2645_v25  ;;  %v3021_v25 = vld [vmem:[%s5483_s5 + $0x38] sm:$0xff]  ;;  %vm5330_vm3 = vcmp.ge.s32.totalorder %v2898_v51, 64 }
 0x461   : > { %2894 = vst.msk [vmem:[#allocation7 + $0x4] sm:$0xf] %vm2892_vm8, %v2889_v37  ;;  %v3037_v37 = vld [vmem:[%s5483_s5 + $0xb8] sm:$0xff]  ;;  %3060 = vmatpush.msrb.mxu2 %v3021_v25 }
 0x462   : > { %3080 = vmatpush.msrb.mxu3 %v3037_v37 }
 0x464   : > { %v2743_v63 = vpop.permute.xlu1 %2742  ;;  %3081 = vmatpush.msrb.mxu3 %v3036_v27 }
 0x465   : > { %v2694_v47 = vpop.permute.xlu0 %2693 }
 0x466   : > { %2711 = vst.msk [vmem:[#allocation3 + $0x38] sm:$0xff] %vm2703_vm4, %v2694_v47  ;;  %vm5335_vm4 = vcmp.lt.s32.totalorder %v2898_v51, 80 }
 0x467   : > { %2760 = vst.msk [vmem:[#allocation3 + $0x38] sm:$0xff] %vm2752_vm5, %v2743_v63  ;;  %v3020_v63 = vld [vmem:[%s5483_s5 + $0x30] sm:$0xff]  ;;  %vm5343_vm5 = vcmp.ge.s32.totalorder %v2898_v51, 80 }
 0x468   : > { %v2940_v16 = vld [vmem:[#allocation7 + $0x5] sm:$0x1]  ;;  %v2931_v33 = vld [vmem:[#allocation7 + $0x4] sm:$0x1]  ;;  %v2949_v58 = vld [vmem:[#allocation7 + $0x6] sm:$0x1]  ;;  %3061 = vmatpush.msrb.mxu2 %v3020_v63 }
 0x46e   : > { %v2768_v6 = vld [vmem:[#allocation3 + $0x38] sm:$0xff] }
 0x46f   : > { %3441 = vmatmul.msk.f32.gmra.mxu1 %vm2782_vm6, %v2768_v6  ;;  %vm5348_vm6 = vcmp.lt.s32.totalorder %v2898_v51, 96 }
 0x498   : > { %v2906_v41 = vpop.permute.xlu2 %2905 }
 0x499   : > { %2911 = vst.msk [vmem:[#allocation8] sm:$0x1] %vm2910_vm12, %v2906_v41 }
 0x4a2   : > { %v2836_v17 = vpop.f32.mrf.mxu1 }
 0x4a3   : > { %v2837_v10 = vadd.f32 %v5116_v13, %v2836_v17  ;;  %v3019_v17 = vld [vmem:[%s5483_s5 + $0x28] sm:$0xff] }
 0x4a4   : > { %3062 = vmatpush.msrb.mxu2 %v3019_v17 }
 0x4a5   : > { %2853 = vst.msk [vmem:[#allocation5 + $0x20] sm:$0xff] %vm2848_vm7, %v2837_v10  ;;  %v3035_v10 = vld [vmem:[%s5483_s5 + $0xa8] sm:$0xff] }
 0x4a6   : > { %3082 = vmatpush.msrb.mxu3 %v3035_v10 }
 0x4b0   : > { %v2915_v30 = vpop.permute.xlu1 %2914 }
 0x4b1   : > { %2920 = vst.msk [vmem:[#allocation8] sm:$0x1] %vm2919_vm15, %v2915_v30 }
 0x4ba   : > { %v2839_v32 = vpop.f32.mrf.mxu1 }
 0x4bb   : > { %v2840_v11 = vadd.f32 %v5116_v13, %v2839_v32  ;;  %v3018_v32 = vld [vmem:[%s5483_s5 + $0x20] sm:$0xff] }
 0x4bc   : > { %3063 = vmatpush.msrb.mxu2 %v3018_v32 }
 0x4bd   : > { %2854 = vst.msk [vmem:[#allocation5 + $0x28] sm:$0xff] %vm2848_vm7, %v2840_v11  ;;  %v3034_v11 = vld [vmem:[%s5483_s5 + $0xa0] sm:$0xff] }
 0x4be   : > { %3083 = vmatpush.msrb.mxu3 %v3034_v11 }
 0x4c4   : > { %v2861_v43 = vld [vmem:[#allocation5 + $0x20] ss:$2 sm:$0xff]  ;;  %v2869_v45 = vld [vmem:[#allocation5 + $0x21] ss:$2 sm:$0xff] }
 0x4c5   : > { %v2874_v36 = vmax.f32 %v2861_v43, %v2869_v45  ;;  %v3017_v43 = vld [vmem:[%s5483_s5 + $0x18] sm:$0xff] }
 0x4c6   : > { %3064 = vmatpush.msrb.mxu2 %v3017_v43  ;;  %v3033_v45 = vld [vmem:[%s5483_s5 + $0x98] sm:$0xff] }
 0x4c7   : > { %v2882_v55 = vrot.slane %v2874_v36, 4  ;;  %3084 = vmatpush.msrb.mxu3 %v3033_v45 }
 0x4c9   : > { %v2890_v56 = vmax.f32 %v2874_v36, %v2882_v55  ;;  %v3016_v36 = vld [vmem:[%s5483_s5 + $0x10] sm:$0xff] }
 0x4ca   : > { %v3032_v55 = vld [vmem:[%s5483_s5 + $0x90] sm:$0xff]  ;;  %3065 = vmatpush.msrb.mxu2 %v3016_v36 }
 0x4cb   : > { %2895 = vst.msk [vmem:[#allocation7 + $0x8] sm:$0xf] %vm2892_vm8, %v2890_v56  ;;  %3085 = vmatpush.msrb.mxu3 %v3032_v55  ;;  %v3015_v56 = vld [vmem:[%s5483_s5 + $0x8] sm:$0xff] }
 0x4cc   : > { %3066 = vmatpush.msrb.mxu2 %v3015_v56 }
 0x4d2   : > { %v2970_v19 = vld [vmem:[#allocation7 + $0x9] sm:$0x1]  ;;  %v2982_v29 = vld [vmem:[#allocation7 + $0xb] sm:$0x1]  ;;  %v2976_v12 = vld [vmem:[#allocation7 + $0xa] sm:$0x1] }
 0x4d3   : > { %2972 = vrot.lane.b32.xlu0 %v2970_v19, %s5504_s27  ;;  %2984 = vrot.lane.b32.xlu1 %v2982_v29, %s3594_s22  ;;  %v2968_v8 = vld [vmem:[#allocation7 + $0x8] sm:$0x1]  ;;  %s3596_s27 = smov 96   ;;  %v3014_v29 = vld [vmem:[%s5483_s5] sm:$0xff] }
 0x4d4   : > { %2978 = vrot.lane.b32.xlu2 %v2976_v12, %s5507_s24  ;;  %2969 = vst.msk [vmem:[#allocation8 + $0x1] sm:$0x1] %vm5161_vm9, %v2968_v8  ;;  %v3031_v19 = vld [vmem:[%s5483_s5 + $0x88] sm:$0xff]  ;;  %v3030_v12 = vld [vmem:[%s5483_s5 + $0x80] sm:$0xff]  ;;  %3067 = vmatpush.msrb.mxu2 %v3014_v29  ;;  %v3096_v8 = vld [vmem:[%s5485_s7 + $0x18] sm:$0xff]  ;;  %vm2954_vm9 = vcmp.ge.s32.totalorder %v2898_v51, 96 }
 0x4d5   : > { %v2842_v22 = vpop.f32.mrf.mxu1  ;;  %3086 = vmatpush.msrb.mxu3 %v3031_v19  ;;  %vm2956_vm11 = vmand %vm2954_vm9, %vm2955_vm10  ;;  %s3538_s24 = scalar_lea.hbm %s5487_s9, 2 }
 0x4d6   : > { %v2843_v0 = vadd.f32 %v5116_v13, %v2842_v22  ;;  %3114 = vmatpush.msra.mxu2 %v3096_v8 }
 0x4d7   : > { %3087 = vmatpush.msrb.mxu3 %v3030_v12 }
 0x4d8   : > { %2855 = vst.msk [vmem:[#allocation5 + $0x30] sm:$0xff] %vm2848_vm7, %v2843_v0 }
 0x4db   : > { %2923 = vrot.lane.b32.xlu0 %v2921_v3, %s3594_s22  ;;  %2942 = vrot.lane.b32.xlu1 %v2940_v16, %s3595_s29 }
 0x4dc   : > { %2933 = vrot.lane.b32.xlu2 %v2931_v33, %s5510_s28 }
 0x4ec   : > { %v2845_v4 = vpop.f32.mrf.mxu1 }
 0x4ed   : > { %v2846_v54 = vadd.f32 %v5116_v13, %v2845_v4  ;;  %v2958_v13 = vld [vmem:[#allocation7 + $0x7] sm:$0x1] }
 0x4ef   : > { %2856 = vst.msk [vmem:[#allocation5 + $0x38] sm:$0xff] %vm2848_vm7, %v2846_v54  ;;  %vm2938_vm7 = vmand %vm5330_vm3, %vm5335_vm4 }
 0x4f6   : > { %v2863_v23 = vld [vmem:[#allocation5 + $0x30] ss:$2 sm:$0xff]  ;;  %v2871_v28 = vld [vmem:[#allocation5 + $0x31] ss:$2 sm:$0xff] }
 0x4f7   : > { %v2875_v52 = vmax.f32 %v2863_v23, %v2871_v28 }
 0x4f9   : > { %v2883_v59 = vrot.slane %v2875_v52, 4 }
 0x4fb   : > { %v2891_v57 = vmax.f32 %v2875_v52, %v2883_v59  ;;  %v3095_v52 = vld [vmem:[%s5485_s7 + $0x10] sm:$0xff]  ;;  %v3093_v59 = vld [vmem:[%s5485_s7] sm:$0xff] }
 0x4fc   : > { %3115 = vmatpush.msra.mxu2 %v3095_v52 }
 0x4fd   : > { %2896 = vst.msk [vmem:[#allocation7 + $0xc] sm:$0xf] %vm2892_vm8, %v2891_v57  ;;  %vm2947_vm8 = vmand %vm5343_vm5, %vm5348_vm6  ;;  %v3046_v57 = vld [vmem:[%s5484_s6] sm:$0x1] }
 0x504   : > { %v2989_v24 = vld [vmem:[#allocation7 + $0xc] sm:$0x1]  ;;  %v3001_v44 = vld [vmem:[#allocation7 + $0xe] sm:$0x1]  ;;  %v2995_v31 = vld [vmem:[#allocation7 + $0xd] sm:$0x1] }
 0x505   : > { %2991 = vrot.lane.b32.xlu0 %v2989_v24, %s5510_s28  ;;  %3003 = vrot.lane.b32.xlu1 %v3001_v44, %s3596_s27  ;;  %v3007_v49 = vld [vmem:[#allocation7 + $0xf] sm:$0x1] }
 0x506   : > { %2997 = vrot.lane.b32.xlu2 %v2995_v31, %s3595_s29  ;;  %s3147_s29 = sshll.u32 %s324_s17, 4  ;;  %s3148_s29 = int_to_ptr.vmem [resolvable:$true] %s3147_s29 }
 0x50d   : > { %2951 = vrot.lane.b32.xlu0 %v2949_v58, %s3596_s27  ;;  %s3149_s27 = sshll.u32 %s3145_s14, 4  ;;  %s3150_s27 = int_to_ptr.hbm [resolvable:$true] %s3149_s27 }
 0x50e   : > { %2960 = vrot.lane.b32.xlu2 %v2958_v13, %s3597_s16  ;;  %s3532_s22 = sshra.s32 %s3150_s27, 4  ;;  %s3533_s22 = int_to_ptr.hbm [resolvable:$true] %s3532_s22 }
 0x50f   : > { %s3534_s25 = scalar_lea.hbm %s3533_s22, 1  ;;  %p3539_p0 = scmp.lt.s32.totalorder %s3533_s22, %s5487_s9 }
 0x510   : > { %p3535_p11 = scmp.ne.s32.totalorder %s3533_s22, %s3534_s25  ;;  %p3540_p1 = scmp.lt.s32.totalorder %s3538_s24, %s3534_s25 }
 0x512   : > { %p3536_p12 = pnand %p3535_p11, %p3686_p5  ;;  %p3541_p2 = por %p3540_p1, %p3539_p0 }
 0x514   : > { %p3537_p13 = pneg %p3536_p12 }
 0x515   : > { %3009 = vrot.lane.b32.xlu0 %v3007_v49, %s3597_s16  ;;  %v3097_v49 = vld [vmem:[%s5486_s8] sm:$0x1]  ;;  %s3137_s16 = scalar_lea.sflag [#allocation10], %s323_s23 }
 0x516   : > { %p3542_p3 = pnand %p3541_p2, %p3537_p13 }
 0x52e   : > { %v2979_v61 = vpop.permute.xlu2 %2978 }
 0x536   : > { %v2934_v35 = vpop.permute.xlu2 %2933 }
 0x545   : > { %v2973_v40 = vpop.permute.xlu0 %2972  ;;  %v2985_v15 = vpop.permute.xlu1 %2984 }
 0x546   : > { %2975 = vst.msk [vmem:[#allocation8 + $0x1] sm:$0x1] %vm2910_vm12, %v2973_v40  ;;  %vm2963_vm12 = vcmp.ge.s32.totalorder %v2898_v51, 112  ;;  %v3094_v51 = vld [vmem:[%s5485_s7 + $0x8] sm:$0xff] }
 0x547   : > { %2981 = vst.msk [vmem:[#allocation8 + $0x1] sm:$0x1] %vm2919_vm15, %v2979_v61  ;;  %vm2965_vm14 = vmand %vm2963_vm12, %vm2964_vm13  ;;  %3116 = vmatpush.msra.mxu2 %v3094_v51  ;;  %vm3098_vm15 = vcmask 261120  }
 0x548   : > { %2987 = vst.msk [vmem:[#allocation8 + $0x1] sm:$0x1] %vm2928_vm2, %v2985_v15 }
 0x549   : > { %3117 = vmatpush.msra.mxu2 %v3093_v59 }
 0x54d   : > { %v2924_v9 = vpop.permute.xlu0 %2923  ;;  %v2943_v30 = vpop.permute.xlu1 %2942 }
 0x54e   : > { %2929 = vst.msk [vmem:[#allocation8] sm:$0x1] %vm2928_vm2, %v2924_v9 }
 0x54f   : > { %2939 = vst.msk [vmem:[#allocation8] sm:$0x1] %vm2938_vm7, %v2934_v35 }
 0x550   : > { %2948 = vst.msk [vmem:[#allocation8] sm:$0x1] %vm2947_vm8, %v2943_v30 }
 0x560   : > { %v2998_v22 = vpop.permute.xlu2 %2997 }
 0x568   : > { %v2961_v33 = vpop.permute.xlu2 %2960 }
 0x577   : > { %v2992_v0 = vpop.permute.xlu0 %2991  ;;  %v3004_v3 = vpop.permute.xlu1 %3003 }
 0x578   : > { %2994 = vst.msk [vmem:[#allocation8 + $0x1] sm:$0x1] %vm2938_vm7, %v2992_v0 }
 0x579   : > { %3000 = vst.msk [vmem:[#allocation8 + $0x1] sm:$0x1] %vm2947_vm8, %v2998_v22 }
 0x57a   : > { %3006 = vst.msk [vmem:[#allocation8 + $0x1] sm:$0x1] %vm2956_vm11, %v3004_v3 }
 0x57f   : > { %v2952_v16 = vpop.permute.xlu0 %2951 }
 0x580   : > { %2957 = vst.msk [vmem:[#allocation8] sm:$0x1] %vm2956_vm11, %v2952_v16 }
 0x581   : > { %2966 = vst.msk [vmem:[#allocation8] sm:$0x1] %vm2965_vm14, %v2961_v33 }
 0x587   : > { %v3010_v4 = vpop.permute.xlu0 %3009 }
 0x588   : > { %3012 = vst.msk [vmem:[#allocation8 + $0x1] sm:$0x1] %vm2965_vm14, %v3010_v4 }
 0x58f   : > { %v3013_v54 = vld [vmem:[#allocation8] sm:$0x3] }
 0x590   : > { %v3048_v23 = vperm.slane %v3013_v54, 0  ;;  %v3049_v28 = vperm.slane %v3013_v54, 1 }
 0x592   : > { %3068 = vmatmul.f32.vlgmr.msrb.gmra.mxu2 %v3048_v23  ;;  %3088 = vmatmul.f32.vlgmr.msrb.gmra.mxu3 %v3049_v28 }
 0x615   : > { %v3069_v24 = vpop.f32.mrf.mxu2  ;;  %v3089_v31 = vpop.f32.mrf.mxu3 }
 0x616   : > { %v3070_v44 = vadd.f32 %v3069_v24, %v3046_v57 }
 0x618   : > { %v3090_v58 = vadd.f32 %v3089_v31, %v3070_v44 }
 0x61a   : > { %v3092_v13 = vmax.f32 %v3090_v58, 0.0 }
 0x61c   : > { %3442 = vmatmul.msk.f32.vlgmr.msra.gmra.mxu2 %vm3098_vm15, %v3092_v13 }
 0x69f   : > { %v3119_v39 = vpop.f32.mrf.mxu2 }
 0x6a0   : > { %v3120_v53 = vadd.f32 %v3119_v39, %v3097_v49 }
 0x6a2   : > { %v3123_v62 = vsel %vm3122_vm0, %v3120_v53, -inf }
 0x6a3   : > { %3124 = vmax.xlane.f32.xlu1 %v3123_v62 }
 0x716   : > { %v3125_v34 = vpop.xlane.xlu1 %3124 }
 0x717   : > { %v3126_v5 = vsub.f32 %v3120_v53, %v3125_v34 }
 0x719   : > { %v3127_v2 = vmul.f32 1.442695, %v3126_v5 }
 0x71b   : > { %3513 = vpow2.f32 %v3127_v2 }
 0x721   : > { %v3514_v1 = vpop.eup %3513 }
 0x722   : > { %v3129_v21 = vsel %vm3122_vm0, %v3514_v1, 0.0 }
 0x723   : > { %3130 = vadd.xlane.f32.xlu2 %v3129_v21 }
 0x796   : > { %v3131_v7 = vpop.xlane.xlu2 %3130 }
 0x797   : > { %3515 = vlog2.f32 %v3131_v7 }
 0x79d   : > { %v3516_v60 = vpop.eup %3515 }
 0x79e   : > { %v3133_v48 = vmul.f32 0.6931472, %v3516_v60 }
 0x7a0   : > { %v3134_v26 = vsub.f32 %v3126_v5, %v3133_v48 }
 0x7a2   : > { %3135 = vst.msk [vmem:[%s324_s17] sm:$0x1] %vm3122_vm0, %v3134_v26 }
 0x7a3   : > { %3545 = shalt.err (!%p3542_p3)
}
 0x7a4   : > { %3456 = dma.vmem_to_hbm [thread:$0]  (%p3686_p5), %s3148_s29, 16, %s3150_s27, %s3137_s16  }
 0x7a5 PF: > { %p3462_p4 = scmp.ge.s32.totalorder %s3580_s12, 2  ;;  %s3161_s23 = sand.u32 1, %s3568_s30  }
 0x7a6   : > { %s3162_s14 = scalar_lea.sflag [#allocation10], %s3161_s23 }
 0x7a7   : > { %p3459_p7 = pnand %p3462_p4, %p3690_p6 }
 0x7a9   : > { %p3460_p8 = pneg %p3459_p7 }
 0x7ab   : > { %3563 = dma.done.wait (%p3460_p8), %s3162_s14, 16  }
 0x7ac   : > { %3565 = vsyncadd (%p3460_p8), %s3162_s14, 4294967280  ;;  %p19_p9 = scmp.ge.s32.totalorder %s3673_s15, 4   ;;  %s5533_s30 = smov %s3572_s10 }
 0x7ad   : > { %s5534_s10 = smov %s3576_s11  ;;  %s5535_s11 = smov %s3684_s18 }
 0x7ae   : > { %s5536_s12 = smov %s3673_s15  ;;  %21 = sbr.rel (!%p19_p9) target bundleno = 3 (0x3), region = 137 }
 0x7b3   :  { %3167 = vsyncpa [#allocation10], 1 }
 0x7b4   :  { %3169 = vsyncpa [#allocation10 + $0x1], 1 }

</bundles_post_ra>
